<compile_context>
chip_gen: v7x
topology: tpu7x:2x2x1
jax: 0.10.0
libtpu: 0.0.40
codegen_flags: <defaults>
</compile_context>

<pallas_src>
import functools

import jax
import jax.numpy as jnp
from jax.experimental import pallas as pl
from jax.experimental.pallas import tpu as pltpu


# ----------------------------------------------------------------------------
# Fused forward kernel (one batch element per grid step)
# ----------------------------------------------------------------------------
def _fused_ae_kernel(x_ref, mask_ref,
                     we1_ref, be1_ref, we2_ref, be2_ref, we3_ref, be3_ref,
                     wef_ref, bef_ref, wdf_ref, bdf_ref,
                     wd1_ref, bd1_ref, wd2_ref, bd2_ref, wd3_ref, bd3_ref,
                     o_ref, *, H, W):
    HW = H * W

    def conv3x3(h, w_ref, b_ref, act):
        # h: (Cin, HW) f32; w_ref: (9, Cout, Cin) bf16; b_ref: (Cout, 1) f32.
        cout = w_ref.shape[1]
        h_bf = h.astype(jnp.bfloat16)
        acc = jnp.zeros((cout, HW), jnp.float32)
        for dy in range(3):
            for dx in range(3):
                k = dy * 3 + dx
                if (dy, dx) == (1, 1):
                    tap = h_bf                              # centre tap: no shift/mask
                else:
                    s = (dy - 1) * W + (dx - 1)             # flattened spatial shift
                    tap = jnp.roll(h_bf, -s, axis=1) * mask_ref[k]
                acc = acc + jnp.dot(w_ref[k], tap,
                                    preferred_element_type=jnp.float32)
        y = acc + b_ref[...]
        if act == "relu":
            y = jnp.maximum(y, 0.0)
        elif act == "sigmoid":
            y = jax.nn.sigmoid(y)
        return y

    # ---------------- encoder ----------------
    h = x_ref[0].astype(jnp.float32)                        # (Cin, HW)
    h = conv3x3(h, we1_ref, be1_ref, "relu")                # (32, HW)
    h = conv3x3(h, we2_ref, be2_ref, "relu")                # (16, HW)
    h = conv3x3(h, we3_ref, be3_ref, "relu")                # (8,  HW)

    # enc fc: PyTorch flatten is C*H*W order == row-major over (8, HW)
    h_bf = h.astype(jnp.bfloat16)
    z = bef_ref[...]                                        # (1, 128) bias folded into init
    for c in range(8):
        z = z + jnp.dot(h_bf[c:c + 1, :], wef_ref[c],
                        preferred_element_type=jnp.float32)

    # ---------------- decoder ----------------
    # dec fc + ReLU, un-flattened straight back into (8, HW)
    z_bf = z.astype(jnp.bfloat16)
    rows = [jnp.dot(z_bf, wdf_ref[c], preferred_element_type=jnp.float32)
            for c in range(8)]
    d = jnp.concatenate(rows, axis=0) + bdf_ref[...]        # (8, HW)
    d = jnp.maximum(d, 0.0)

    d = conv3x3(d, wd1_ref, bd1_ref, "relu")                # (16, HW)
    d = conv3x3(d, wd2_ref, bd2_ref, "relu")                # (32, HW)
    d = conv3x3(d, wd3_ref, bd3_ref, "sigmoid")             # (Cin, HW)

    o_ref[...] = d[None].astype(o_ref.dtype)


# ----------------------------------------------------------------------------
# Wrapper
# ----------------------------------------------------------------------------
_PARAM_ORDER = ("enc_conv1", "enc_conv2", "enc_conv3", "enc_fc", "dec_fc",
                "dec_conv1", "dec_conv2", "dec_conv3")


def _tap_masks(H, W):
    """Border-validity masks for the 9 (dy,dx) taps, shape (9, 1, H*W), bf16 {0,1}."""
    yy, xx = jnp.meshgrid(jnp.arange(H), jnp.arange(W), indexing="ij")
    yy = yy.reshape(1, H * W)
    xx = xx.reshape(1, H * W)
    masks = []
    for dy in range(3):
        for dx in range(3):
            ry, rx = yy + dy - 1, xx + dx - 1
            masks.append((ry >= 0) & (ry < H) & (rx >= 0) & (rx < W))
    return jnp.stack(masks, axis=0).astype(jnp.bfloat16)


def conv_autoencoder_forward(kparams, x_nchw):
    """x_nchw: (B, Cin, H, W) f32 -> (B, Cin, H, W) f32. Single fused pallas_call."""
    B, Cin, H, W = x_nchw.shape
    HW = H * W
    x_flat = x_nchw.reshape(B, Cin, HW)            # pure reshape (NCHW flatten order)
    masks = _tap_masks(H, W)

    flat = []
    for name in _PARAM_ORDER:
        flat.extend(kparams[name])

    def const_spec(a):
        return pl.BlockSpec(a.shape, lambda b, _n=a.ndim: (0,) * _n)

    in_specs = ([pl.BlockSpec((1, Cin, HW), lambda b: (b, 0, 0)),
                 const_spec(masks)]
                + [const_spec(a) for a in flat])

    out = pl.pallas_call(
        functools.partial(_fused_ae_kernel, H=H, W=W),
        out_shape=jax.ShapeDtypeStruct((B, Cin, HW), jnp.float32),
        grid_spec=pltpu.PrefetchScalarGridSpec(
            num_scalar_prefetch=0,
            grid=(B,),
            in_specs=in_specs,
            out_specs=pl.BlockSpec((1, Cin, HW), lambda b: (b, 0, 0)),
        ),
        compiler_params=pltpu.CompilerParams(
            dimension_semantics=("parallel",)),
    )(x_flat, masks, *flat)
    return out.reshape(B, Cin, H, W)


# ----------------------------------------------------------------------------
# Parameters: synthetic init in PyTorch layouts, then repacked for the kernel
# ----------------------------------------------------------------------------
def init_params(key, input_image_size, in_channels):
    """PyTorch-layout params: conv w (Cout,Cin,3,3), b (Cout,); linear w (Out,In), b (Out,)."""
    H = W = input_image_size
    fc_in = 8 * H * W
    keys = jax.random.split(key, 8)

    def conv_p(k, cin, cout):
        k1, k2 = jax.random.split(k)
        bound = 1.0 / jnp.sqrt(cin * 9.0)
        w = jax.random.uniform(k1, (cout, cin, 3, 3), jnp.float32, -bound, bound)
        b = jax.random.uniform(k2, (cout,), jnp.float32, -bound, bound)
        return w, b

    def lin_p(k, fin, fout):
        k1, k2 = jax.random.split(k)
        bound = 1.0 / jnp.sqrt(float(fin))
        w = jax.random.uniform(k1, (fout, fin), jnp.float32, -bound, bound)
        b = jax.random.uniform(k2, (fout,), jnp.float32, -bound, bound)
        return w, b

    return {
        "enc_conv1": conv_p(keys[0], in_channels, 32),
        "enc_conv2": conv_p(keys[1], 32, 16),
        "enc_conv3": conv_p(keys[2], 16, 8),
        "enc_fc": lin_p(keys[3], fc_in, 128),
        "dec_fc": lin_p(keys[4], 128, fc_in),
        "dec_conv1": conv_p(keys[5], 8, 16),
        "dec_conv2": conv_p(keys[6], 16, 32),
        "dec_conv3": conv_p(keys[7], 32, in_channels),
    }


def prepare_params(params, H, W):
    """Repack PyTorch-layout params into kernel layouts (bf16 mats, f32 biases)."""
    HW = H * W

    def conv(w, b):
        cout, cin = w.shape[0], w.shape[1]
        wk = jnp.transpose(w, (2, 3, 0, 1)).reshape(9, cout, cin)      # (9,Cout,Cin)
        return wk.astype(jnp.bfloat16), b.reshape(cout, 1).astype(jnp.float32)

    def enc_fc(w, b):                         # w: (128, 8*HW); z = h @ w.T + b
        wk = jnp.transpose(w, (1, 0)).reshape(8, HW, w.shape[0])       # (8,HW,128)
        return wk.astype(jnp.bfloat16), b.reshape(1, -1).astype(jnp.float32)

    def dec_fc(w, b):                         # w: (8*HW, 128); d = z @ w.T + b
        wk = jnp.transpose(w.reshape(8, HW, w.shape[1]), (0, 2, 1))    # (8,128,HW)
        return wk.astype(jnp.bfloat16), b.reshape(8, HW).astype(jnp.float32)

    return {
        "enc_conv1": conv(*params["enc_conv1"]),
        "enc_conv2": conv(*params["enc_conv2"]),
        "enc_conv3": conv(*params["enc_conv3"]),
        "enc_fc": enc_fc(*params["enc_fc"]),
        "dec_fc": dec_fc(*params["dec_fc"]),
        "dec_conv1": conv(*params["dec_conv1"]),
        "dec_conv2": conv(*params["dec_conv2"]),
        "dec_conv3": conv(*params["dec_conv3"]),
    }


# ----------------------------------------------------------------------------
# Pure-JAX (XLA) reference with the same bf16-operand / f32-accumulate math
# ----------------------------------------------------------------------------
def reference_forward(params, x):
    def conv(h, w, b, act):
        y = jax.lax.conv_general_dilated(
            h.astype(jnp.bfloat16), w.astype(jnp.bfloat16),
            window_strides=(1, 1), padding=((1, 1), (1, 1)),
            dimension_numbers=("NCHW", "OIHW", "NCHW"),
            preferred_element_type=jnp.float32,
        ) + b.reshape(1, -1, 1, 1)
        if act == "relu":
            y = jnp.maximum(y, 0.0)
        elif act == "sigmoid":
            y = jax.nn.sigmoid(y)
        return y

    def lin(h, w, b, act):
        y = jnp.dot(h.astype(jnp.bfloat16), w.T.astype(jnp.bfloat16),
                    preferred_element_type=jnp.float32) + b
        if act == "relu":
            y = jnp.maximum(y, 0.0)
        return y

    B, _, H, W = x.shape
    h = conv(x, *params["enc_conv1"], "relu")
    h = conv(h, *params["enc_conv2"], "relu")
    h = conv(h, *params["enc_conv3"], "relu")
    z = lin(h.reshape(B, -1), *params["enc_fc"], "none")
    d = lin(z, *params["dec_fc"], "relu").reshape(B, 8, H, W)
    d = conv(d, *params["dec_conv1"], "relu")
    d = conv(d, *params["dec_conv2"], "relu")
    d = conv(d, *params["dec_conv3"], "sigmoid")
    return d


if __name__ == "__main__":
    key = jax.random.PRNGKey(0)
    pkey, xkey = jax.random.split(key)

    batch, in_channels, img = 2, 4, 16
    params = init_params(pkey, img, in_channels)      # PyTorch-layout master params
    kparams = prepare_params(params, img, img)        # kernel-layout (bf16) params
    x = jax.random.uniform(xkey, (batch, in_channels, img, img), jnp.float32)

    fwd = jax.jit(conv_autoencoder_forward)
    out = jax.block_until_ready(fwd(kparams, x))

    assert out.shape == x.shape, (out.shape, x.shape)
    assert out.dtype == jnp.float32
    assert bool(jnp.all(jnp.isfinite(out)))
    assert bool(jnp.all((out >= 0.0) & (out <= 1.0)))  # sigmoid output range

    # Correctness check against a plain-XLA reference (same bf16/f32 math).
    ref = reference_forward(params, x)
    max_err = float(jnp.max(jnp.abs(out - ref)))
    assert max_err < 3e-2, f"mismatch vs reference: max abs err = {max_err}"

    print("KERNEL_OK")
</pallas_src>

<mosaic_0001>
module attributes {stable_mosaic.version = 11 : i64} {
  func.func @_fused_ae_kernel(%arg0: i32, %arg1: memref<1x4x256xf32, #tpu.memory_space<vmem>>, %arg2: memref<9x1x256xbf16, #tpu.memory_space<vmem>>, %arg3: memref<9x32x4xbf16, #tpu.memory_space<vmem>>, %arg4: memref<32x1xf32, #tpu.memory_space<vmem>>, %arg5: memref<9x16x32xbf16, #tpu.memory_space<vmem>>, %arg6: memref<16x1xf32, #tpu.memory_space<vmem>>, %arg7: memref<9x8x16xbf16, #tpu.memory_space<vmem>>, %arg8: memref<8x1xf32, #tpu.memory_space<vmem>>, %arg9: memref<8x256x128xbf16, #tpu.memory_space<vmem>>, %arg10: memref<1x128xf32, #tpu.memory_space<vmem>>, %arg11: memref<8x128x256xbf16, #tpu.memory_space<vmem>>, %arg12: memref<8x256xf32, #tpu.memory_space<vmem>>, %arg13: memref<9x16x8xbf16, #tpu.memory_space<vmem>>, %arg14: memref<16x1xf32, #tpu.memory_space<vmem>>, %arg15: memref<9x32x16xbf16, #tpu.memory_space<vmem>>, %arg16: memref<32x1xf32, #tpu.memory_space<vmem>>, %arg17: memref<9x4x32xbf16, #tpu.memory_space<vmem>>, %arg18: memref<4x1xf32, #tpu.memory_space<vmem>>, %arg19: memref<1x4x256xf32, #tpu.memory_space<vmem>>) attributes {dimension_semantics = [#tpu.dimension_semantics<parallel>], iteration_bounds = array<i64: 2>, scalar_prefetch = 0 : i64, scratch_operands = 0 : i64, tpu.core_type = #tpu.core_type<tc>, window_params = [{transform_indices = @transform_0, window_bounds = array<i64: 1, 4, 256>}, {pipeline_mode = #tpu.pipeline_mode<synchronous>, transform_indices = @transform_1, window_bounds = array<i64: 9, 1, 256>}, {pipeline_mode = #tpu.pipeline_mode<synchronous>, transform_indices = @transform_2, window_bounds = array<i64: 9, 32, 4>}, {pipeline_mode = #tpu.pipeline_mode<synchronous>, transform_indices = @transform_3, window_bounds = array<i64: 32, 1>}, {pipeline_mode = #tpu.pipeline_mode<synchronous>, transform_indices = @transform_4, window_bounds = array<i64: 9, 16, 32>}, {pipeline_mode = #tpu.pipeline_mode<synchronous>, transform_indices = @transform_5, window_bounds = array<i64: 16, 1>}, {pipeline_mode = #tpu.pipeline_mode<synchronous>, transform_indices = @transform_6, window_bounds = array<i64: 9, 8, 16>}, {pipeline_mode = #tpu.pipeline_mode<synchronous>, transform_indices = @transform_7, window_bounds = array<i64: 8, 1>}, {pipeline_mode = #tpu.pipeline_mode<synchronous>, transform_indices = @transform_8, window_bounds = array<i64: 8, 256, 128>}, {pipeline_mode = #tpu.pipeline_mode<synchronous>, transform_indices = @transform_9, window_bounds = array<i64: 1, 128>}, {pipeline_mode = #tpu.pipeline_mode<synchronous>, transform_indices = @transform_10, window_bounds = array<i64: 8, 128, 256>}, {pipeline_mode = #tpu.pipeline_mode<synchronous>, transform_indices = @transform_11, window_bounds = array<i64: 8, 256>}, {pipeline_mode = #tpu.pipeline_mode<synchronous>, transform_indices = @transform_12, window_bounds = array<i64: 9, 16, 8>}, {pipeline_mode = #tpu.pipeline_mode<synchronous>, transform_indices = @transform_13, window_bounds = array<i64: 16, 1>}, {pipeline_mode = #tpu.pipeline_mode<synchronous>, transform_indices = @transform_14, window_bounds = array<i64: 9, 32, 16>}, {pipeline_mode = #tpu.pipeline_mode<synchronous>, transform_indices = @transform_15, window_bounds = array<i64: 32, 1>}, {pipeline_mode = #tpu.pipeline_mode<synchronous>, transform_indices = @transform_16, window_bounds = array<i64: 9, 4, 32>}, {pipeline_mode = #tpu.pipeline_mode<synchronous>, transform_indices = @transform_17, window_bounds = array<i64: 4, 1>}, {transform_indices = @transform_18, window_bounds = array<i64: 1, 4, 256>}]} {
    %c0 = arith.constant 0 : index
    %c0_0 = arith.constant 0 : index
    %c0_1 = arith.constant 0 : index
    %0 = vector.load %arg1[%c0, %c0_0, %c0_1] : memref<1x4x256xf32, #tpu.memory_space<vmem>>, vector<1x4x256xf32>
    %1 = vector.shape_cast %0 : vector<1x4x256xf32> to vector<4x256xf32>
    %2 = arith.truncf %1 : vector<4x256xf32> to vector<4x256xbf16>
    %cst = arith.constant 0.000000e+00 : f32
    %3 = vector.broadcast %cst : f32 to vector<32x256xf32>
    %4 = vector.extract_strided_slice %2 {offsets = [0, 239], sizes = [4, 17], strides = [1, 1]} : vector<4x256xbf16> to vector<4x17xbf16>
    %5 = vector.extract_strided_slice %2 {offsets = [0, 0], sizes = [4, 239], strides = [1, 1]} : vector<4x256xbf16> to vector<4x239xbf16>
    %6 = tpu.concatenate %4, %5 in 1 : vector<4x17xbf16>, vector<4x239xbf16> -> vector<4x256xbf16>
    %c0_2 = arith.constant 0 : index
    %c0_3 = arith.constant 0 : index
    %c0_4 = arith.constant 0 : index
    %7 = vector.load %arg2[%c0_2, %c0_3, %c0_4] : memref<9x1x256xbf16, #tpu.memory_space<vmem>>, vector<1x1x256xbf16>
    %8 = vector.shape_cast %7 : vector<1x1x256xbf16> to vector<1x256xbf16>
    %9 = vector.broadcast %8 : vector<1x256xbf16> to vector<4x256xbf16>
    %10 = arith.mulf %6, %9 : vector<4x256xbf16>
    %c0_5 = arith.constant 0 : index
    %c0_6 = arith.constant 0 : index
    %c0_7 = arith.constant 0 : index
    %11 = vector.load %arg3[%c0_5, %c0_6, %c0_7] : memref<9x32x4xbf16, #tpu.memory_space<vmem>>, vector<1x32x4xbf16>
    %12 = vector.shape_cast %11 : vector<1x32x4xbf16> to vector<32x4xbf16>
    %cst_8 = arith.constant dense<0.000000e+00> : vector<32x256xf32>
    %13 = tpu.matmul %12, %10, %cst_8 {dimension_numbers = #tpu.dot_dimension_numbers<[1], [0], [0], [1], [0, 0, 1, 1], [], []>} : vector<32x4xbf16>, vector<4x256xbf16>, vector<32x256xf32> -> vector<32x256xf32>
    %14 = arith.addf %3, %13 : vector<32x256xf32>
    %15 = vector.extract_strided_slice %2 {offsets = [0, 240], sizes = [4, 16], strides = [1, 1]} : vector<4x256xbf16> to vector<4x16xbf16>
    %16 = vector.extract_strided_slice %2 {offsets = [0, 0], sizes = [4, 240], strides = [1, 1]} : vector<4x256xbf16> to vector<4x240xbf16>
    %17 = tpu.concatenate %15, %16 in 1 : vector<4x16xbf16>, vector<4x240xbf16> -> vector<4x256xbf16>
    %c1 = arith.constant 1 : index
    %c0_9 = arith.constant 0 : index
    %c0_10 = arith.constant 0 : index
    %18 = vector.load %arg2[%c1, %c0_9, %c0_10] : memref<9x1x256xbf16, #tpu.memory_space<vmem>>, vector<1x1x256xbf16>
    %19 = vector.shape_cast %18 : vector<1x1x256xbf16> to vector<1x256xbf16>
    %20 = vector.broadcast %19 : vector<1x256xbf16> to vector<4x256xbf16>
    %21 = arith.mulf %17, %20 : vector<4x256xbf16>
    %c1_11 = arith.constant 1 : index
    %c0_12 = arith.constant 0 : index
    %c0_13 = arith.constant 0 : index
    %22 = vector.load %arg3[%c1_11, %c0_12, %c0_13] : memref<9x32x4xbf16, #tpu.memory_space<vmem>>, vector<1x32x4xbf16>
    %23 = vector.shape_cast %22 : vector<1x32x4xbf16> to vector<32x4xbf16>
    %cst_14 = arith.constant dense<0.000000e+00> : vector<32x256xf32>
    %24 = tpu.matmul %23, %21, %cst_14 {dimension_numbers = #tpu.dot_dimension_numbers<[1], [0], [0], [1], [0, 0, 1, 1], [], []>} : vector<32x4xbf16>, vector<4x256xbf16>, vector<32x256xf32> -> vector<32x256xf32>
    %25 = arith.addf %14, %24 : vector<32x256xf32>
    %26 = vector.extract_strided_slice %2 {offsets = [0, 241], sizes = [4, 15], strides = [1, 1]} : vector<4x256xbf16> to vector<4x15xbf16>
    %27 = vector.extract_strided_slice %2 {offsets = [0, 0], sizes = [4, 241], strides = [1, 1]} : vector<4x256xbf16> to vector<4x241xbf16>
    %28 = tpu.concatenate %26, %27 in 1 : vector<4x15xbf16>, vector<4x241xbf16> -> vector<4x256xbf16>
    %c2 = arith.constant 2 : index
    %c0_15 = arith.constant 0 : index
    %c0_16 = arith.constant 0 : index
    %29 = vector.load %arg2[%c2, %c0_15, %c0_16] : memref<9x1x256xbf16, #tpu.memory_space<vmem>>, vector<1x1x256xbf16>
    %30 = vector.shape_cast %29 : vector<1x1x256xbf16> to vector<1x256xbf16>
    %31 = vector.broadcast %30 : vector<1x256xbf16> to vector<4x256xbf16>
    %32 = arith.mulf %28, %31 : vector<4x256xbf16>
    %c2_17 = arith.constant 2 : index
    %c0_18 = arith.constant 0 : index
    %c0_19 = arith.constant 0 : index
    %33 = vector.load %arg3[%c2_17, %c0_18, %c0_19] : memref<9x32x4xbf16, #tpu.memory_space<vmem>>, vector<1x32x4xbf16>
    %34 = vector.shape_cast %33 : vector<1x32x4xbf16> to vector<32x4xbf16>
    %cst_20 = arith.constant dense<0.000000e+00> : vector<32x256xf32>
    %35 = tpu.matmul %34, %32, %cst_20 {dimension_numbers = #tpu.dot_dimension_numbers<[1], [0], [0], [1], [0, 0, 1, 1], [], []>} : vector<32x4xbf16>, vector<4x256xbf16>, vector<32x256xf32> -> vector<32x256xf32>
    %36 = arith.addf %25, %35 : vector<32x256xf32>
    %37 = vector.extract_strided_slice %2 {offsets = [0, 255], sizes = [4, 1], strides = [1, 1]} : vector<4x256xbf16> to vector<4x1xbf16>
    %38 = vector.extract_strided_slice %2 {offsets = [0, 0], sizes = [4, 255], strides = [1, 1]} : vector<4x256xbf16> to vector<4x255xbf16>
    %39 = tpu.concatenate %37, %38 in 1 : vector<4x1xbf16>, vector<4x255xbf16> -> vector<4x256xbf16>
    %c3 = arith.constant 3 : index
    %c0_21 = arith.constant 0 : index
    %c0_22 = arith.constant 0 : index
    %40 = vector.load %arg2[%c3, %c0_21, %c0_22] : memref<9x1x256xbf16, #tpu.memory_space<vmem>>, vector<1x1x256xbf16>
    %41 = vector.shape_cast %40 : vector<1x1x256xbf16> to vector<1x256xbf16>
    %42 = vector.broadcast %41 : vector<1x256xbf16> to vector<4x256xbf16>
    %43 = arith.mulf %39, %42 : vector<4x256xbf16>
    %c3_23 = arith.constant 3 : index
    %c0_24 = arith.constant 0 : index
    %c0_25 = arith.constant 0 : index
    %44 = vector.load %arg3[%c3_23, %c0_24, %c0_25] : memref<9x32x4xbf16, #tpu.memory_space<vmem>>, vector<1x32x4xbf16>
    %45 = vector.shape_cast %44 : vector<1x32x4xbf16> to vector<32x4xbf16>
    %cst_26 = arith.constant dense<0.000000e+00> : vector<32x256xf32>
    %46 = tpu.matmul %45, %43, %cst_26 {dimension_numbers = #tpu.dot_dimension_numbers<[1], [0], [0], [1], [0, 0, 1, 1], [], []>} : vector<32x4xbf16>, vector<4x256xbf16>, vector<32x256xf32> -> vector<32x256xf32>
    %47 = arith.addf %36, %46 : vector<32x256xf32>
    %c4 = arith.constant 4 : index
    %c0_27 = arith.constant 0 : index
    %c0_28 = arith.constant 0 : index
    %48 = vector.load %arg3[%c4, %c0_27, %c0_28] : memref<9x32x4xbf16, #tpu.memory_space<vmem>>, vector<1x32x4xbf16>
    %49 = vector.shape_cast %48 : vector<1x32x4xbf16> to vector<32x4xbf16>
    %cst_29 = arith.constant dense<0.000000e+00> : vector<32x256xf32>
    %50 = tpu.matmul %49, %2, %cst_29 {dimension_numbers = #tpu.dot_dimension_numbers<[1], [0], [0], [1], [0, 0, 1, 1], [], []>} : vector<32x4xbf16>, vector<4x256xbf16>, vector<32x256xf32> -> vector<32x256xf32>
    %51 = arith.addf %47, %50 : vector<32x256xf32>
    %52 = vector.extract_strided_slice %2 {offsets = [0, 1], sizes = [4, 255], strides = [1, 1]} : vector<4x256xbf16> to vector<4x255xbf16>
    %53 = vector.extract_strided_slice %2 {offsets = [0, 0], sizes = [4, 1], strides = [1, 1]} : vector<4x256xbf16> to vector<4x1xbf16>
    %54 = tpu.concatenate %52, %53 in 1 : vector<4x255xbf16>, vector<4x1xbf16> -> vector<4x256xbf16>
    %c5 = arith.constant 5 : index
    %c0_30 = arith.constant 0 : index
    %c0_31 = arith.constant 0 : index
    %55 = vector.load %arg2[%c5, %c0_30, %c0_31] : memref<9x1x256xbf16, #tpu.memory_space<vmem>>, vector<1x1x256xbf16>
    %56 = vector.shape_cast %55 : vector<1x1x256xbf16> to vector<1x256xbf16>
    %57 = vector.broadcast %56 : vector<1x256xbf16> to vector<4x256xbf16>
    %58 = arith.mulf %54, %57 : vector<4x256xbf16>
    %c5_32 = arith.constant 5 : index
    %c0_33 = arith.constant 0 : index
    %c0_34 = arith.constant 0 : index
    %59 = vector.load %arg3[%c5_32, %c0_33, %c0_34] : memref<9x32x4xbf16, #tpu.memory_space<vmem>>, vector<1x32x4xbf16>
    %60 = vector.shape_cast %59 : vector<1x32x4xbf16> to vector<32x4xbf16>
    %cst_35 = arith.constant dense<0.000000e+00> : vector<32x256xf32>
    %61 = tpu.matmul %60, %58, %cst_35 {dimension_numbers = #tpu.dot_dimension_numbers<[1], [0], [0], [1], [0, 0, 1, 1], [], []>} : vector<32x4xbf16>, vector<4x256xbf16>, vector<32x256xf32> -> vector<32x256xf32>
    %62 = arith.addf %51, %61 : vector<32x256xf32>
    %63 = vector.extract_strided_slice %2 {offsets = [0, 15], sizes = [4, 241], strides = [1, 1]} : vector<4x256xbf16> to vector<4x241xbf16>
    %64 = vector.extract_strided_slice %2 {offsets = [0, 0], sizes = [4, 15], strides = [1, 1]} : vector<4x256xbf16> to vector<4x15xbf16>
    %65 = tpu.concatenate %63, %64 in 1 : vector<4x241xbf16>, vector<4x15xbf16> -> vector<4x256xbf16>
    %c6 = arith.constant 6 : index
    %c0_36 = arith.constant 0 : index
    %c0_37 = arith.constant 0 : index
    %66 = vector.load %arg2[%c6, %c0_36, %c0_37] : memref<9x1x256xbf16, #tpu.memory_space<vmem>>, vector<1x1x256xbf16>
    %67 = vector.shape_cast %66 : vector<1x1x256xbf16> to vector<1x256xbf16>
    %68 = vector.broadcast %67 : vector<1x256xbf16> to vector<4x256xbf16>
    %69 = arith.mulf %65, %68 : vector<4x256xbf16>
    %c6_38 = arith.constant 6 : index
    %c0_39 = arith.constant 0 : index
    %c0_40 = arith.constant 0 : index
    %70 = vector.load %arg3[%c6_38, %c0_39, %c0_40] : memref<9x32x4xbf16, #tpu.memory_space<vmem>>, vector<1x32x4xbf16>
    %71 = vector.shape_cast %70 : vector<1x32x4xbf16> to vector<32x4xbf16>
    %cst_41 = arith.constant dense<0.000000e+00> : vector<32x256xf32>
    %72 = tpu.matmul %71, %69, %cst_41 {dimension_numbers = #tpu.dot_dimension_numbers<[1], [0], [0], [1], [0, 0, 1, 1], [], []>} : vector<32x4xbf16>, vector<4x256xbf16>, vector<32x256xf32> -> vector<32x256xf32>
    %73 = arith.addf %62, %72 : vector<32x256xf32>
    %74 = vector.extract_strided_slice %2 {offsets = [0, 16], sizes = [4, 240], strides = [1, 1]} : vector<4x256xbf16> to vector<4x240xbf16>
    %75 = vector.extract_strided_slice %2 {offsets = [0, 0], sizes = [4, 16], strides = [1, 1]} : vector<4x256xbf16> to vector<4x16xbf16>
    %76 = tpu.concatenate %74, %75 in 1 : vector<4x240xbf16>, vector<4x16xbf16> -> vector<4x256xbf16>
    %c7 = arith.constant 7 : index
    %c0_42 = arith.constant 0 : index
    %c0_43 = arith.constant 0 : index
    %77 = vector.load %arg2[%c7, %c0_42, %c0_43] : memref<9x1x256xbf16, #tpu.memory_space<vmem>>, vector<1x1x256xbf16>
    %78 = vector.shape_cast %77 : vector<1x1x256xbf16> to vector<1x256xbf16>
    %79 = vector.broadcast %78 : vector<1x256xbf16> to vector<4x256xbf16>
    %80 = arith.mulf %76, %79 : vector<4x256xbf16>
    %c7_44 = arith.constant 7 : index
    %c0_45 = arith.constant 0 : index
    %c0_46 = arith.constant 0 : index
    %81 = vector.load %arg3[%c7_44, %c0_45, %c0_46] : memref<9x32x4xbf16, #tpu.memory_space<vmem>>, vector<1x32x4xbf16>
    %82 = vector.shape_cast %81 : vector<1x32x4xbf16> to vector<32x4xbf16>
    %cst_47 = arith.constant dense<0.000000e+00> : vector<32x256xf32>
    %83 = tpu.matmul %82, %80, %cst_47 {dimension_numbers = #tpu.dot_dimension_numbers<[1], [0], [0], [1], [0, 0, 1, 1], [], []>} : vector<32x4xbf16>, vector<4x256xbf16>, vector<32x256xf32> -> vector<32x256xf32>
    %84 = arith.addf %73, %83 : vector<32x256xf32>
    %85 = vector.extract_strided_slice %2 {offsets = [0, 17], sizes = [4, 239], strides = [1, 1]} : vector<4x256xbf16> to vector<4x239xbf16>
    %86 = vector.extract_strided_slice %2 {offsets = [0, 0], sizes = [4, 17], strides = [1, 1]} : vector<4x256xbf16> to vector<4x17xbf16>
    %87 = tpu.concatenate %85, %86 in 1 : vector<4x239xbf16>, vector<4x17xbf16> -> vector<4x256xbf16>
    %c8 = arith.constant 8 : index
    %c0_48 = arith.constant 0 : index
    %c0_49 = arith.constant 0 : index
    %88 = vector.load %arg2[%c8, %c0_48, %c0_49] : memref<9x1x256xbf16, #tpu.memory_space<vmem>>, vector<1x1x256xbf16>
    %89 = vector.shape_cast %88 : vector<1x1x256xbf16> to vector<1x256xbf16>
    %90 = vector.broadcast %89 : vector<1x256xbf16> to vector<4x256xbf16>
    %91 = arith.mulf %87, %90 : vector<4x256xbf16>
    %c8_50 = arith.constant 8 : index
    %c0_51 = arith.constant 0 : index
    %c0_52 = arith.constant 0 : index
    %92 = vector.load %arg3[%c8_50, %c0_51, %c0_52] : memref<9x32x4xbf16, #tpu.memory_space<vmem>>, vector<1x32x4xbf16>
    %93 = vector.shape_cast %92 : vector<1x32x4xbf16> to vector<32x4xbf16>
    %cst_53 = arith.constant dense<0.000000e+00> : vector<32x256xf32>
    %94 = tpu.matmul %93, %91, %cst_53 {dimension_numbers = #tpu.dot_dimension_numbers<[1], [0], [0], [1], [0, 0, 1, 1], [], []>} : vector<32x4xbf16>, vector<4x256xbf16>, vector<32x256xf32> -> vector<32x256xf32>
    %95 = arith.addf %84, %94 : vector<32x256xf32>
    %c0_54 = arith.constant 0 : index
    %c0_55 = arith.constant 0 : index
    %96 = vector.load %arg4[%c0_54, %c0_55] : memref<32x1xf32, #tpu.memory_space<vmem>>, vector<32x1xf32>
    %97 = vector.broadcast %96 : vector<32x1xf32> to vector<32x256xf32>
    %98 = arith.addf %95, %97 : vector<32x256xf32>
    %cst_56 = arith.constant 0.000000e+00 : f32
    %99 = vector.broadcast %cst_56 : f32 to vector<32x256xf32>
    %100 = arith.maximumf %98, %99 : vector<32x256xf32>
    %101 = arith.truncf %100 : vector<32x256xf32> to vector<32x256xbf16>
    %cst_57 = arith.constant 0.000000e+00 : f32
    %102 = vector.broadcast %cst_57 : f32 to vector<16x256xf32>
    %103 = vector.extract_strided_slice %101 {offsets = [0, 239], sizes = [32, 17], strides = [1, 1]} : vector<32x256xbf16> to vector<32x17xbf16>
    %104 = vector.extract_strided_slice %101 {offsets = [0, 0], sizes = [32, 239], strides = [1, 1]} : vector<32x256xbf16> to vector<32x239xbf16>
    %105 = tpu.concatenate %103, %104 in 1 : vector<32x17xbf16>, vector<32x239xbf16> -> vector<32x256xbf16>
    %c0_58 = arith.constant 0 : index
    %c0_59 = arith.constant 0 : index
    %c0_60 = arith.constant 0 : index
    %106 = vector.load %arg2[%c0_58, %c0_59, %c0_60] : memref<9x1x256xbf16, #tpu.memory_space<vmem>>, vector<1x1x256xbf16>
    %107 = vector.shape_cast %106 : vector<1x1x256xbf16> to vector<1x256xbf16>
    %108 = vector.broadcast %107 : vector<1x256xbf16> to vector<32x256xbf16>
    %109 = arith.mulf %105, %108 : vector<32x256xbf16>
    %c0_61 = arith.constant 0 : index
    %c0_62 = arith.constant 0 : index
    %c0_63 = arith.constant 0 : index
    %110 = vector.load %arg5[%c0_61, %c0_62, %c0_63] : memref<9x16x32xbf16, #tpu.memory_space<vmem>>, vector<1x16x32xbf16>
    %111 = vector.shape_cast %110 : vector<1x16x32xbf16> to vector<16x32xbf16>
    %cst_64 = arith.constant dense<0.000000e+00> : vector<16x256xf32>
    %112 = tpu.matmul %111, %109, %cst_64 {dimension_numbers = #tpu.dot_dimension_numbers<[1], [0], [0], [1], [0, 0, 1, 1], [], []>} : vector<16x32xbf16>, vector<32x256xbf16>, vector<16x256xf32> -> vector<16x256xf32>
    %113 = arith.addf %102, %112 : vector<16x256xf32>
    %114 = vector.extract_strided_slice %101 {offsets = [0, 240], sizes = [32, 16], strides = [1, 1]} : vector<32x256xbf16> to vector<32x16xbf16>
    %115 = vector.extract_strided_slice %101 {offsets = [0, 0], sizes = [32, 240], strides = [1, 1]} : vector<32x256xbf16> to vector<32x240xbf16>
    %116 = tpu.concatenate %114, %115 in 1 : vector<32x16xbf16>, vector<32x240xbf16> -> vector<32x256xbf16>
    %c1_65 = arith.constant 1 : index
    %c0_66 = arith.constant 0 : index
    %c0_67 = arith.constant 0 : index
    %117 = vector.load %arg2[%c1_65, %c0_66, %c0_67] : memref<9x1x256xbf16, #tpu.memory_space<vmem>>, vector<1x1x256xbf16>
    %118 = vector.shape_cast %117 : vector<1x1x256xbf16> to vector<1x256xbf16>
    %119 = vector.broadcast %118 : vector<1x256xbf16> to vector<32x256xbf16>
    %120 = arith.mulf %116, %119 : vector<32x256xbf16>
    %c1_68 = arith.constant 1 : index
    %c0_69 = arith.constant 0 : index
    %c0_70 = arith.constant 0 : index
    %121 = vector.load %arg5[%c1_68, %c0_69, %c0_70] : memref<9x16x32xbf16, #tpu.memory_space<vmem>>, vector<1x16x32xbf16>
    %122 = vector.shape_cast %121 : vector<1x16x32xbf16> to vector<16x32xbf16>
    %cst_71 = arith.constant dense<0.000000e+00> : vector<16x256xf32>
    %123 = tpu.matmul %122, %120, %cst_71 {dimension_numbers = #tpu.dot_dimension_numbers<[1], [0], [0], [1], [0, 0, 1, 1], [], []>} : vector<16x32xbf16>, vector<32x256xbf16>, vector<16x256xf32> -> vector<16x256xf32>
    %124 = arith.addf %113, %123 : vector<16x256xf32>
    %125 = vector.extract_strided_slice %101 {offsets = [0, 241], sizes = [32, 15], strides = [1, 1]} : vector<32x256xbf16> to vector<32x15xbf16>
    %126 = vector.extract_strided_slice %101 {offsets = [0, 0], sizes = [32, 241], strides = [1, 1]} : vector<32x256xbf16> to vector<32x241xbf16>
    %127 = tpu.concatenate %125, %126 in 1 : vector<32x15xbf16>, vector<32x241xbf16> -> vector<32x256xbf16>
    %c2_72 = arith.constant 2 : index
    %c0_73 = arith.constant 0 : index
    %c0_74 = arith.constant 0 : index
    %128 = vector.load %arg2[%c2_72, %c0_73, %c0_74] : memref<9x1x256xbf16, #tpu.memory_space<vmem>>, vector<1x1x256xbf16>
    %129 = vector.shape_cast %128 : vector<1x1x256xbf16> to vector<1x256xbf16>
    %130 = vector.broadcast %129 : vector<1x256xbf16> to vector<32x256xbf16>
    %131 = arith.mulf %127, %130 : vector<32x256xbf16>
    %c2_75 = arith.constant 2 : index
    %c0_76 = arith.constant 0 : index
    %c0_77 = arith.constant 0 : index
    %132 = vector.load %arg5[%c2_75, %c0_76, %c0_77] : memref<9x16x32xbf16, #tpu.memory_space<vmem>>, vector<1x16x32xbf16>
    %133 = vector.shape_cast %132 : vector<1x16x32xbf16> to vector<16x32xbf16>
    %cst_78 = arith.constant dense<0.000000e+00> : vector<16x256xf32>
    %134 = tpu.matmul %133, %131, %cst_78 {dimension_numbers = #tpu.dot_dimension_numbers<[1], [0], [0], [1], [0, 0, 1, 1], [], []>} : vector<16x32xbf16>, vector<32x256xbf16>, vector<16x256xf32> -> vector<16x256xf32>
    %135 = arith.addf %124, %134 : vector<16x256xf32>
    %136 = vector.extract_strided_slice %101 {offsets = [0, 255], sizes = [32, 1], strides = [1, 1]} : vector<32x256xbf16> to vector<32x1xbf16>
    %137 = vector.extract_strided_slice %101 {offsets = [0, 0], sizes = [32, 255], strides = [1, 1]} : vector<32x256xbf16> to vector<32x255xbf16>
    %138 = tpu.concatenate %136, %137 in 1 : vector<32x1xbf16>, vector<32x255xbf16> -> vector<32x256xbf16>
    %c3_79 = arith.constant 3 : index
    %c0_80 = arith.constant 0 : index
    %c0_81 = arith.constant 0 : index
    %139 = vector.load %arg2[%c3_79, %c0_80, %c0_81] : memref<9x1x256xbf16, #tpu.memory_space<vmem>>, vector<1x1x256xbf16>
    %140 = vector.shape_cast %139 : vector<1x1x256xbf16> to vector<1x256xbf16>
    %141 = vector.broadcast %140 : vector<1x256xbf16> to vector<32x256xbf16>
    %142 = arith.mulf %138, %141 : vector<32x256xbf16>
    %c3_82 = arith.constant 3 : index
    %c0_83 = arith.constant 0 : index
    %c0_84 = arith.constant 0 : index
    %143 = vector.load %arg5[%c3_82, %c0_83, %c0_84] : memref<9x16x32xbf16, #tpu.memory_space<vmem>>, vector<1x16x32xbf16>
    %144 = vector.shape_cast %143 : vector<1x16x32xbf16> to vector<16x32xbf16>
    %cst_85 = arith.constant dense<0.000000e+00> : vector<16x256xf32>
    %145 = tpu.matmul %144, %142, %cst_85 {dimension_numbers = #tpu.dot_dimension_numbers<[1], [0], [0], [1], [0, 0, 1, 1], [], []>} : vector<16x32xbf16>, vector<32x256xbf16>, vector<16x256xf32> -> vector<16x256xf32>
    %146 = arith.addf %135, %145 : vector<16x256xf32>
    %c4_86 = arith.constant 4 : index
    %c0_87 = arith.constant 0 : index
    %c0_88 = arith.constant 0 : index
    %147 = vector.load %arg5[%c4_86, %c0_87, %c0_88] : memref<9x16x32xbf16, #tpu.memory_space<vmem>>, vector<1x16x32xbf16>
    %148 = vector.shape_cast %147 : vector<1x16x32xbf16> to vector<16x32xbf16>
    %cst_89 = arith.constant dense<0.000000e+00> : vector<16x256xf32>
    %149 = tpu.matmul %148, %101, %cst_89 {dimension_numbers = #tpu.dot_dimension_numbers<[1], [0], [0], [1], [0, 0, 1, 1], [], []>} : vector<16x32xbf16>, vector<32x256xbf16>, vector<16x256xf32> -> vector<16x256xf32>
    %150 = arith.addf %146, %149 : vector<16x256xf32>
    %151 = vector.extract_strided_slice %101 {offsets = [0, 1], sizes = [32, 255], strides = [1, 1]} : vector<32x256xbf16> to vector<32x255xbf16>
    %152 = vector.extract_strided_slice %101 {offsets = [0, 0], sizes = [32, 1], strides = [1, 1]} : vector<32x256xbf16> to vector<32x1xbf16>
    %153 = tpu.concatenate %151, %152 in 1 : vector<32x255xbf16>, vector<32x1xbf16> -> vector<32x256xbf16>
    %c5_90 = arith.constant 5 : index
    %c0_91 = arith.constant 0 : index
    %c0_92 = arith.constant 0 : index
    %154 = vector.load %arg2[%c5_90, %c0_91, %c0_92] : memref<9x1x256xbf16, #tpu.memory_space<vmem>>, vector<1x1x256xbf16>
    %155 = vector.shape_cast %154 : vector<1x1x256xbf16> to vector<1x256xbf16>
    %156 = vector.broadcast %155 : vector<1x256xbf16> to vector<32x256xbf16>
    %157 = arith.mulf %153, %156 : vector<32x256xbf16>
    %c5_93 = arith.constant 5 : index
    %c0_94 = arith.constant 0 : index
    %c0_95 = arith.constant 0 : index
    %158 = vector.load %arg5[%c5_93, %c0_94, %c0_95] : memref<9x16x32xbf16, #tpu.memory_space<vmem>>, vector<1x16x32xbf16>
    %159 = vector.shape_cast %158 : vector<1x16x32xbf16> to vector<16x32xbf16>
    %cst_96 = arith.constant dense<0.000000e+00> : vector<16x256xf32>
    %160 = tpu.matmul %159, %157, %cst_96 {dimension_numbers = #tpu.dot_dimension_numbers<[1], [0], [0], [1], [0, 0, 1, 1], [], []>} : vector<16x32xbf16>, vector<32x256xbf16>, vector<16x256xf32> -> vector<16x256xf32>
    %161 = arith.addf %150, %160 : vector<16x256xf32>
    %162 = vector.extract_strided_slice %101 {offsets = [0, 15], sizes = [32, 241], strides = [1, 1]} : vector<32x256xbf16> to vector<32x241xbf16>
    %163 = vector.extract_strided_slice %101 {offsets = [0, 0], sizes = [32, 15], strides = [1, 1]} : vector<32x256xbf16> to vector<32x15xbf16>
    %164 = tpu.concatenate %162, %163 in 1 : vector<32x241xbf16>, vector<32x15xbf16> -> vector<32x256xbf16>
    %c6_97 = arith.constant 6 : index
    %c0_98 = arith.constant 0 : index
    %c0_99 = arith.constant 0 : index
    %165 = vector.load %arg2[%c6_97, %c0_98, %c0_99] : memref<9x1x256xbf16, #tpu.memory_space<vmem>>, vector<1x1x256xbf16>
    %166 = vector.shape_cast %165 : vector<1x1x256xbf16> to vector<1x256xbf16>
    %167 = vector.broadcast %166 : vector<1x256xbf16> to vector<32x256xbf16>
    %168 = arith.mulf %164, %167 : vector<32x256xbf16>
    %c6_100 = arith.constant 6 : index
    %c0_101 = arith.constant 0 : index
    %c0_102 = arith.constant 0 : index
    %169 = vector.load %arg5[%c6_100, %c0_101, %c0_102] : memref<9x16x32xbf16, #tpu.memory_space<vmem>>, vector<1x16x32xbf16>
    %170 = vector.shape_cast %169 : vector<1x16x32xbf16> to vector<16x32xbf16>
    %cst_103 = arith.constant dense<0.000000e+00> : vector<16x256xf32>
    %171 = tpu.matmul %170, %168, %cst_103 {dimension_numbers = #tpu.dot_dimension_numbers<[1], [0], [0], [1], [0, 0, 1, 1], [], []>} : vector<16x32xbf16>, vector<32x256xbf16>, vector<16x256xf32> -> vector<16x256xf32>
    %172 = arith.addf %161, %171 : vector<16x256xf32>
    %173 = vector.extract_strided_slice %101 {offsets = [0, 16], sizes = [32, 240], strides = [1, 1]} : vector<32x256xbf16> to vector<32x240xbf16>
    %174 = vector.extract_strided_slice %101 {offsets = [0, 0], sizes = [32, 16], strides = [1, 1]} : vector<32x256xbf16> to vector<32x16xbf16>
    %175 = tpu.concatenate %173, %174 in 1 : vector<32x240xbf16>, vector<32x16xbf16> -> vector<32x256xbf16>
    %c7_104 = arith.constant 7 : index
    %c0_105 = arith.constant 0 : index
    %c0_106 = arith.constant 0 : index
    %176 = vector.load %arg2[%c7_104, %c0_105, %c0_106] : memref<9x1x256xbf16, #tpu.memory_space<vmem>>, vector<1x1x256xbf16>
    %177 = vector.shape_cast %176 : vector<1x1x256xbf16> to vector<1x256xbf16>
    %178 = vector.broadcast %177 : vector<1x256xbf16> to vector<32x256xbf16>
    %179 = arith.mulf %175, %178 : vector<32x256xbf16>
    %c7_107 = arith.constant 7 : index
    %c0_108 = arith.constant 0 : index
    %c0_109 = arith.constant 0 : index
    %180 = vector.load %arg5[%c7_107, %c0_108, %c0_109] : memref<9x16x32xbf16, #tpu.memory_space<vmem>>, vector<1x16x32xbf16>
    %181 = vector.shape_cast %180 : vector<1x16x32xbf16> to vector<16x32xbf16>
    %cst_110 = arith.constant dense<0.000000e+00> : vector<16x256xf32>
    %182 = tpu.matmul %181, %179, %cst_110 {dimension_numbers = #tpu.dot_dimension_numbers<[1], [0], [0], [1], [0, 0, 1, 1], [], []>} : vector<16x32xbf16>, vector<32x256xbf16>, vector<16x256xf32> -> vector<16x256xf32>
    %183 = arith.addf %172, %182 : vector<16x256xf32>
    %184 = vector.extract_strided_slice %101 {offsets = [0, 17], sizes = [32, 239], strides = [1, 1]} : vector<32x256xbf16> to vector<32x239xbf16>
    %185 = vector.extract_strided_slice %101 {offsets = [0, 0], sizes = [32, 17], strides = [1, 1]} : vector<32x256xbf16> to vector<32x17xbf16>
    %186 = tpu.concatenate %184, %185 in 1 : vector<32x239xbf16>, vector<32x17xbf16> -> vector<32x256xbf16>
    %c8_111 = arith.constant 8 : index
    %c0_112 = arith.constant 0 : index
    %c0_113 = arith.constant 0 : index
    %187 = vector.load %arg2[%c8_111, %c0_112, %c0_113] : memref<9x1x256xbf16, #tpu.memory_space<vmem>>, vector<1x1x256xbf16>
    %188 = vector.shape_cast %187 : vector<1x1x256xbf16> to vector<1x256xbf16>
    %189 = vector.broadcast %188 : vector<1x256xbf16> to vector<32x256xbf16>
    %190 = arith.mulf %186, %189 : vector<32x256xbf16>
    %c8_114 = arith.constant 8 : index
    %c0_115 = arith.constant 0 : index
    %c0_116 = arith.constant 0 : index
    %191 = vector.load %arg5[%c8_114, %c0_115, %c0_116] : memref<9x16x32xbf16, #tpu.memory_space<vmem>>, vector<1x16x32xbf16>
    %192 = vector.shape_cast %191 : vector<1x16x32xbf16> to vector<16x32xbf16>
    %cst_117 = arith.constant dense<0.000000e+00> : vector<16x256xf32>
    %193 = tpu.matmul %192, %190, %cst_117 {dimension_numbers = #tpu.dot_dimension_numbers<[1], [0], [0], [1], [0, 0, 1, 1], [], []>} : vector<16x32xbf16>, vector<32x256xbf16>, vector<16x256xf32> -> vector<16x256xf32>
    %194 = arith.addf %183, %193 : vector<16x256xf32>
    %c0_118 = arith.constant 0 : index
    %c0_119 = arith.constant 0 : index
    %195 = vector.load %arg6[%c0_118, %c0_119] : memref<16x1xf32, #tpu.memory_space<vmem>>, vector<16x1xf32>
    %196 = vector.broadcast %195 : vector<16x1xf32> to vector<16x256xf32>
    %197 = arith.addf %194, %196 : vector<16x256xf32>
    %cst_120 = arith.constant 0.000000e+00 : f32
    %198 = vector.broadcast %cst_120 : f32 to vector<16x256xf32>
    %199 = arith.maximumf %197, %198 : vector<16x256xf32>
    %200 = arith.truncf %199 : vector<16x256xf32> to vector<16x256xbf16>
    %cst_121 = arith.constant 0.000000e+00 : f32
    %201 = vector.broadcast %cst_121 : f32 to vector<8x256xf32>
    %202 = vector.extract_strided_slice %200 {offsets = [0, 239], sizes = [16, 17], strides = [1, 1]} : vector<16x256xbf16> to vector<16x17xbf16>
    %203 = vector.extract_strided_slice %200 {offsets = [0, 0], sizes = [16, 239], strides = [1, 1]} : vector<16x256xbf16> to vector<16x239xbf16>
    %204 = tpu.concatenate %202, %203 in 1 : vector<16x17xbf16>, vector<16x239xbf16> -> vector<16x256xbf16>
    %c0_122 = arith.constant 0 : index
    %c0_123 = arith.constant 0 : index
    %c0_124 = arith.constant 0 : index
    %205 = vector.load %arg2[%c0_122, %c0_123, %c0_124] : memref<9x1x256xbf16, #tpu.memory_space<vmem>>, vector<1x1x256xbf16>
    %206 = vector.shape_cast %205 : vector<1x1x256xbf16> to vector<1x256xbf16>
    %207 = vector.broadcast %206 : vector<1x256xbf16> to vector<16x256xbf16>
    %208 = arith.mulf %204, %207 : vector<16x256xbf16>
    %c0_125 = arith.constant 0 : index
    %c0_126 = arith.constant 0 : index
    %c0_127 = arith.constant 0 : index
    %209 = vector.load %arg7[%c0_125, %c0_126, %c0_127] : memref<9x8x16xbf16, #tpu.memory_space<vmem>>, vector<1x8x16xbf16>
    %210 = vector.shape_cast %209 : vector<1x8x16xbf16> to vector<8x16xbf16>
    %cst_128 = arith.constant dense<0.000000e+00> : vector<8x256xf32>
    %211 = tpu.matmul %210, %208, %cst_128 {dimension_numbers = #tpu.dot_dimension_numbers<[1], [0], [0], [1], [0, 0, 1, 1], [], []>} : vector<8x16xbf16>, vector<16x256xbf16>, vector<8x256xf32> -> vector<8x256xf32>
    %212 = arith.addf %201, %211 : vector<8x256xf32>
    %213 = vector.extract_strided_slice %200 {offsets = [0, 240], sizes = [16, 16], strides = [1, 1]} : vector<16x256xbf16> to vector<16x16xbf16>
    %214 = vector.extract_strided_slice %200 {offsets = [0, 0], sizes = [16, 240], strides = [1, 1]} : vector<16x256xbf16> to vector<16x240xbf16>
    %215 = tpu.concatenate %213, %214 in 1 : vector<16x16xbf16>, vector<16x240xbf16> -> vector<16x256xbf16>
    %c1_129 = arith.constant 1 : index
    %c0_130 = arith.constant 0 : index
    %c0_131 = arith.constant 0 : index
    %216 = vector.load %arg2[%c1_129, %c0_130, %c0_131] : memref<9x1x256xbf16, #tpu.memory_space<vmem>>, vector<1x1x256xbf16>
    %217 = vector.shape_cast %216 : vector<1x1x256xbf16> to vector<1x256xbf16>
    %218 = vector.broadcast %217 : vector<1x256xbf16> to vector<16x256xbf16>
    %219 = arith.mulf %215, %218 : vector<16x256xbf16>
    %c1_132 = arith.constant 1 : index
    %c0_133 = arith.constant 0 : index
    %c0_134 = arith.constant 0 : index
    %220 = vector.load %arg7[%c1_132, %c0_133, %c0_134] : memref<9x8x16xbf16, #tpu.memory_space<vmem>>, vector<1x8x16xbf16>
    %221 = vector.shape_cast %220 : vector<1x8x16xbf16> to vector<8x16xbf16>
    %cst_135 = arith.constant dense<0.000000e+00> : vector<8x256xf32>
    %222 = tpu.matmul %221, %219, %cst_135 {dimension_numbers = #tpu.dot_dimension_numbers<[1], [0], [0], [1], [0, 0, 1, 1], [], []>} : vector<8x16xbf16>, vector<16x256xbf16>, vector<8x256xf32> -> vector<8x256xf32>
    %223 = arith.addf %212, %222 : vector<8x256xf32>
    %224 = vector.extract_strided_slice %200 {offsets = [0, 241], sizes = [16, 15], strides = [1, 1]} : vector<16x256xbf16> to vector<16x15xbf16>
    %225 = vector.extract_strided_slice %200 {offsets = [0, 0], sizes = [16, 241], strides = [1, 1]} : vector<16x256xbf16> to vector<16x241xbf16>
    %226 = tpu.concatenate %224, %225 in 1 : vector<16x15xbf16>, vector<16x241xbf16> -> vector<16x256xbf16>
    %c2_136 = arith.constant 2 : index
    %c0_137 = arith.constant 0 : index
    %c0_138 = arith.constant 0 : index
    %227 = vector.load %arg2[%c2_136, %c0_137, %c0_138] : memref<9x1x256xbf16, #tpu.memory_space<vmem>>, vector<1x1x256xbf16>
    %228 = vector.shape_cast %227 : vector<1x1x256xbf16> to vector<1x256xbf16>
    %229 = vector.broadcast %228 : vector<1x256xbf16> to vector<16x256xbf16>
    %230 = arith.mulf %226, %229 : vector<16x256xbf16>
    %c2_139 = arith.constant 2 : index
    %c0_140 = arith.constant 0 : index
    %c0_141 = arith.constant 0 : index
    %231 = vector.load %arg7[%c2_139, %c0_140, %c0_141] : memref<9x8x16xbf16, #tpu.memory_space<vmem>>, vector<1x8x16xbf16>
    %232 = vector.shape_cast %231 : vector<1x8x16xbf16> to vector<8x16xbf16>
    %cst_142 = arith.constant dense<0.000000e+00> : vector<8x256xf32>
    %233 = tpu.matmul %232, %230, %cst_142 {dimension_numbers = #tpu.dot_dimension_numbers<[1], [0], [0], [1], [0, 0, 1, 1], [], []>} : vector<8x16xbf16>, vector<16x256xbf16>, vector<8x256xf32> -> vector<8x256xf32>
    %234 = arith.addf %223, %233 : vector<8x256xf32>
    %235 = vector.extract_strided_slice %200 {offsets = [0, 255], sizes = [16, 1], strides = [1, 1]} : vector<16x256xbf16> to vector<16x1xbf16>
    %236 = vector.extract_strided_slice %200 {offsets = [0, 0], sizes = [16, 255], strides = [1, 1]} : vector<16x256xbf16> to vector<16x255xbf16>
    %237 = tpu.concatenate %235, %236 in 1 : vector<16x1xbf16>, vector<16x255xbf16> -> vector<16x256xbf16>
    %c3_143 = arith.constant 3 : index
    %c0_144 = arith.constant 0 : index
    %c0_145 = arith.constant 0 : index
    %238 = vector.load %arg2[%c3_143, %c0_144, %c0_145] : memref<9x1x256xbf16, #tpu.memory_space<vmem>>, vector<1x1x256xbf16>
    %239 = vector.shape_cast %238 : vector<1x1x256xbf16> to vector<1x256xbf16>
    %240 = vector.broadcast %239 : vector<1x256xbf16> to vector<16x256xbf16>
    %241 = arith.mulf %237, %240 : vector<16x256xbf16>
    %c3_146 = arith.constant 3 : index
    %c0_147 = arith.constant 0 : index
    %c0_148 = arith.constant 0 : index
    %242 = vector.load %arg7[%c3_146, %c0_147, %c0_148] : memref<9x8x16xbf16, #tpu.memory_space<vmem>>, vector<1x8x16xbf16>
    %243 = vector.shape_cast %242 : vector<1x8x16xbf16> to vector<8x16xbf16>
    %cst_149 = arith.constant dense<0.000000e+00> : vector<8x256xf32>
    %244 = tpu.matmul %243, %241, %cst_149 {dimension_numbers = #tpu.dot_dimension_numbers<[1], [0], [0], [1], [0, 0, 1, 1], [], []>} : vector<8x16xbf16>, vector<16x256xbf16>, vector<8x256xf32> -> vector<8x256xf32>
    %245 = arith.addf %234, %244 : vector<8x256xf32>
    %c4_150 = arith.constant 4 : index
    %c0_151 = arith.constant 0 : index
    %c0_152 = arith.constant 0 : index
    %246 = vector.load %arg7[%c4_150, %c0_151, %c0_152] : memref<9x8x16xbf16, #tpu.memory_space<vmem>>, vector<1x8x16xbf16>
    %247 = vector.shape_cast %246 : vector<1x8x16xbf16> to vector<8x16xbf16>
    %cst_153 = arith.constant dense<0.000000e+00> : vector<8x256xf32>
    %248 = tpu.matmul %247, %200, %cst_153 {dimension_numbers = #tpu.dot_dimension_numbers<[1], [0], [0], [1], [0, 0, 1, 1], [], []>} : vector<8x16xbf16>, vector<16x256xbf16>, vector<8x256xf32> -> vector<8x256xf32>
    %249 = arith.addf %245, %248 : vector<8x256xf32>
    %250 = vector.extract_strided_slice %200 {offsets = [0, 1], sizes = [16, 255], strides = [1, 1]} : vector<16x256xbf16> to vector<16x255xbf16>
    %251 = vector.extract_strided_slice %200 {offsets = [0, 0], sizes = [16, 1], strides = [1, 1]} : vector<16x256xbf16> to vector<16x1xbf16>
    %252 = tpu.concatenate %250, %251 in 1 : vector<16x255xbf16>, vector<16x1xbf16> -> vector<16x256xbf16>
    %c5_154 = arith.constant 5 : index
    %c0_155 = arith.constant 0 : index
    %c0_156 = arith.constant 0 : index
    %253 = vector.load %arg2[%c5_154, %c0_155, %c0_156] : memref<9x1x256xbf16, #tpu.memory_space<vmem>>, vector<1x1x256xbf16>
    %254 = vector.shape_cast %253 : vector<1x1x256xbf16> to vector<1x256xbf16>
    %255 = vector.broadcast %254 : vector<1x256xbf16> to vector<16x256xbf16>
    %256 = arith.mulf %252, %255 : vector<16x256xbf16>
    %c5_157 = arith.constant 5 : index
    %c0_158 = arith.constant 0 : index
    %c0_159 = arith.constant 0 : index
    %257 = vector.load %arg7[%c5_157, %c0_158, %c0_159] : memref<9x8x16xbf16, #tpu.memory_space<vmem>>, vector<1x8x16xbf16>
    %258 = vector.shape_cast %257 : vector<1x8x16xbf16> to vector<8x16xbf16>
    %cst_160 = arith.constant dense<0.000000e+00> : vector<8x256xf32>
    %259 = tpu.matmul %258, %256, %cst_160 {dimension_numbers = #tpu.dot_dimension_numbers<[1], [0], [0], [1], [0, 0, 1, 1], [], []>} : vector<8x16xbf16>, vector<16x256xbf16>, vector<8x256xf32> -> vector<8x256xf32>
    %260 = arith.addf %249, %259 : vector<8x256xf32>
    %261 = vector.extract_strided_slice %200 {offsets = [0, 15], sizes = [16, 241], strides = [1, 1]} : vector<16x256xbf16> to vector<16x241xbf16>
    %262 = vector.extract_strided_slice %200 {offsets = [0, 0], sizes = [16, 15], strides = [1, 1]} : vector<16x256xbf16> to vector<16x15xbf16>
    %263 = tpu.concatenate %261, %262 in 1 : vector<16x241xbf16>, vector<16x15xbf16> -> vector<16x256xbf16>
    %c6_161 = arith.constant 6 : index
    %c0_162 = arith.constant 0 : index
    %c0_163 = arith.constant 0 : index
    %264 = vector.load %arg2[%c6_161, %c0_162, %c0_163] : memref<9x1x256xbf16, #tpu.memory_space<vmem>>, vector<1x1x256xbf16>
    %265 = vector.shape_cast %264 : vector<1x1x256xbf16> to vector<1x256xbf16>
    %266 = vector.broadcast %265 : vector<1x256xbf16> to vector<16x256xbf16>
    %267 = arith.mulf %263, %266 : vector<16x256xbf16>
    %c6_164 = arith.constant 6 : index
    %c0_165 = arith.constant 0 : index
    %c0_166 = arith.constant 0 : index
    %268 = vector.load %arg7[%c6_164, %c0_165, %c0_166] : memref<9x8x16xbf16, #tpu.memory_space<vmem>>, vector<1x8x16xbf16>
    %269 = vector.shape_cast %268 : vector<1x8x16xbf16> to vector<8x16xbf16>
    %cst_167 = arith.constant dense<0.000000e+00> : vector<8x256xf32>
    %270 = tpu.matmul %269, %267, %cst_167 {dimension_numbers = #tpu.dot_dimension_numbers<[1], [0], [0], [1], [0, 0, 1, 1], [], []>} : vector<8x16xbf16>, vector<16x256xbf16>, vector<8x256xf32> -> vector<8x256xf32>
    %271 = arith.addf %260, %270 : vector<8x256xf32>
    %272 = vector.extract_strided_slice %200 {offsets = [0, 16], sizes = [16, 240], strides = [1, 1]} : vector<16x256xbf16> to vector<16x240xbf16>
    %273 = vector.extract_strided_slice %200 {offsets = [0, 0], sizes = [16, 16], strides = [1, 1]} : vector<16x256xbf16> to vector<16x16xbf16>
    %274 = tpu.concatenate %272, %273 in 1 : vector<16x240xbf16>, vector<16x16xbf16> -> vector<16x256xbf16>
    %c7_168 = arith.constant 7 : index
    %c0_169 = arith.constant 0 : index
    %c0_170 = arith.constant 0 : index
    %275 = vector.load %arg2[%c7_168, %c0_169, %c0_170] : memref<9x1x256xbf16, #tpu.memory_space<vmem>>, vector<1x1x256xbf16>
    %276 = vector.shape_cast %275 : vector<1x1x256xbf16> to vector<1x256xbf16>
    %277 = vector.broadcast %276 : vector<1x256xbf16> to vector<16x256xbf16>
    %278 = arith.mulf %274, %277 : vector<16x256xbf16>
    %c7_171 = arith.constant 7 : index
    %c0_172 = arith.constant 0 : index
    %c0_173 = arith.constant 0 : index
    %279 = vector.load %arg7[%c7_171, %c0_172, %c0_173] : memref<9x8x16xbf16, #tpu.memory_space<vmem>>, vector<1x8x16xbf16>
    %280 = vector.shape_cast %279 : vector<1x8x16xbf16> to vector<8x16xbf16>
    %cst_174 = arith.constant dense<0.000000e+00> : vector<8x256xf32>
    %281 = tpu.matmul %280, %278, %cst_174 {dimension_numbers = #tpu.dot_dimension_numbers<[1], [0], [0], [1], [0, 0, 1, 1], [], []>} : vector<8x16xbf16>, vector<16x256xbf16>, vector<8x256xf32> -> vector<8x256xf32>
    %282 = arith.addf %271, %281 : vector<8x256xf32>
    %283 = vector.extract_strided_slice %200 {offsets = [0, 17], sizes = [16, 239], strides = [1, 1]} : vector<16x256xbf16> to vector<16x239xbf16>
    %284 = vector.extract_strided_slice %200 {offsets = [0, 0], sizes = [16, 17], strides = [1, 1]} : vector<16x256xbf16> to vector<16x17xbf16>
    %285 = tpu.concatenate %283, %284 in 1 : vector<16x239xbf16>, vector<16x17xbf16> -> vector<16x256xbf16>
    %c8_175 = arith.constant 8 : index
    %c0_176 = arith.constant 0 : index
    %c0_177 = arith.constant 0 : index
    %286 = vector.load %arg2[%c8_175, %c0_176, %c0_177] : memref<9x1x256xbf16, #tpu.memory_space<vmem>>, vector<1x1x256xbf16>
    %287 = vector.shape_cast %286 : vector<1x1x256xbf16> to vector<1x256xbf16>
    %288 = vector.broadcast %287 : vector<1x256xbf16> to vector<16x256xbf16>
    %289 = arith.mulf %285, %288 : vector<16x256xbf16>
    %c8_178 = arith.constant 8 : index
    %c0_179 = arith.constant 0 : index
    %c0_180 = arith.constant 0 : index
    %290 = vector.load %arg7[%c8_178, %c0_179, %c0_180] : memref<9x8x16xbf16, #tpu.memory_space<vmem>>, vector<1x8x16xbf16>
    %291 = vector.shape_cast %290 : vector<1x8x16xbf16> to vector<8x16xbf16>
    %cst_181 = arith.constant dense<0.000000e+00> : vector<8x256xf32>
    %292 = tpu.matmul %291, %289, %cst_181 {dimension_numbers = #tpu.dot_dimension_numbers<[1], [0], [0], [1], [0, 0, 1, 1], [], []>} : vector<8x16xbf16>, vector<16x256xbf16>, vector<8x256xf32> -> vector<8x256xf32>
    %293 = arith.addf %282, %292 : vector<8x256xf32>
    %c0_182 = arith.constant 0 : index
    %c0_183 = arith.constant 0 : index
    %294 = vector.load %arg8[%c0_182, %c0_183] : memref<8x1xf32, #tpu.memory_space<vmem>>, vector<8x1xf32>
    %295 = vector.broadcast %294 : vector<8x1xf32> to vector<8x256xf32>
    %296 = arith.addf %293, %295 : vector<8x256xf32>
    %cst_184 = arith.constant 0.000000e+00 : f32
    %297 = vector.broadcast %cst_184 : f32 to vector<8x256xf32>
    %298 = arith.maximumf %296, %297 : vector<8x256xf32>
    %299 = arith.truncf %298 : vector<8x256xf32> to vector<8x256xbf16>
    %c0_185 = arith.constant 0 : index
    %c0_186 = arith.constant 0 : index
    %300 = vector.load %arg10[%c0_185, %c0_186] : memref<1x128xf32, #tpu.memory_space<vmem>>, vector<1x128xf32>
    %301 = vector.extract_strided_slice %299 {offsets = [0, 0], sizes = [1, 256], strides = [1, 1]} : vector<8x256xbf16> to vector<1x256xbf16>
    %c0_187 = arith.constant 0 : index
    %c0_188 = arith.constant 0 : index
    %c0_189 = arith.constant 0 : index
    %302 = vector.load %arg9[%c0_187, %c0_188, %c0_189] : memref<8x256x128xbf16, #tpu.memory_space<vmem>>, vector<1x256x128xbf16>
    %303 = vector.shape_cast %302 : vector<1x256x128xbf16> to vector<256x128xbf16>
    %cst_190 = arith.constant dense<0.000000e+00> : vector<1x128xf32>
    %304 = tpu.matmul %301, %303, %cst_190 {dimension_numbers = #tpu.dot_dimension_numbers<[1], [0], [0], [1], [0, 0, 1, 1], [], []>} : vector<1x256xbf16>, vector<256x128xbf16>, vector<1x128xf32> -> vector<1x128xf32>
    %305 = arith.addf %300, %304 : vector<1x128xf32>
    %306 = vector.extract_strided_slice %299 {offsets = [1, 0], sizes = [1, 256], strides = [1, 1]} : vector<8x256xbf16> to vector<1x256xbf16>
    %c1_191 = arith.constant 1 : index
    %c0_192 = arith.constant 0 : index
    %c0_193 = arith.constant 0 : index
    %307 = vector.load %arg9[%c1_191, %c0_192, %c0_193] : memref<8x256x128xbf16, #tpu.memory_space<vmem>>, vector<1x256x128xbf16>
    %308 = vector.shape_cast %307 : vector<1x256x128xbf16> to vector<256x128xbf16>
    %cst_194 = arith.constant dense<0.000000e+00> : vector<1x128xf32>
    %309 = tpu.matmul %306, %308, %cst_194 {dimension_numbers = #tpu.dot_dimension_numbers<[1], [0], [0], [1], [0, 0, 1, 1], [], []>} : vector<1x256xbf16>, vector<256x128xbf16>, vector<1x128xf32> -> vector<1x128xf32>
    %310 = arith.addf %305, %309 : vector<1x128xf32>
    %311 = vector.extract_strided_slice %299 {offsets = [2, 0], sizes = [1, 256], strides = [1, 1]} : vector<8x256xbf16> to vector<1x256xbf16>
    %c2_195 = arith.constant 2 : index
    %c0_196 = arith.constant 0 : index
    %c0_197 = arith.constant 0 : index
    %312 = vector.load %arg9[%c2_195, %c0_196, %c0_197] : memref<8x256x128xbf16, #tpu.memory_space<vmem>>, vector<1x256x128xbf16>
    %313 = vector.shape_cast %312 : vector<1x256x128xbf16> to vector<256x128xbf16>
    %cst_198 = arith.constant dense<0.000000e+00> : vector<1x128xf32>
    %314 = tpu.matmul %311, %313, %cst_198 {dimension_numbers = #tpu.dot_dimension_numbers<[1], [0], [0], [1], [0, 0, 1, 1], [], []>} : vector<1x256xbf16>, vector<256x128xbf16>, vector<1x128xf32> -> vector<1x128xf32>
    %315 = arith.addf %310, %314 : vector<1x128xf32>
    %316 = vector.extract_strided_slice %299 {offsets = [3, 0], sizes = [1, 256], strides = [1, 1]} : vector<8x256xbf16> to vector<1x256xbf16>
    %c3_199 = arith.constant 3 : index
    %c0_200 = arith.constant 0 : index
    %c0_201 = arith.constant 0 : index
    %317 = vector.load %arg9[%c3_199, %c0_200, %c0_201] : memref<8x256x128xbf16, #tpu.memory_space<vmem>>, vector<1x256x128xbf16>
    %318 = vector.shape_cast %317 : vector<1x256x128xbf16> to vector<256x128xbf16>
    %cst_202 = arith.constant dense<0.000000e+00> : vector<1x128xf32>
    %319 = tpu.matmul %316, %318, %cst_202 {dimension_numbers = #tpu.dot_dimension_numbers<[1], [0], [0], [1], [0, 0, 1, 1], [], []>} : vector<1x256xbf16>, vector<256x128xbf16>, vector<1x128xf32> -> vector<1x128xf32>
    %320 = arith.addf %315, %319 : vector<1x128xf32>
    %321 = vector.extract_strided_slice %299 {offsets = [4, 0], sizes = [1, 256], strides = [1, 1]} : vector<8x256xbf16> to vector<1x256xbf16>
    %c4_203 = arith.constant 4 : index
    %c0_204 = arith.constant 0 : index
    %c0_205 = arith.constant 0 : index
    %322 = vector.load %arg9[%c4_203, %c0_204, %c0_205] : memref<8x256x128xbf16, #tpu.memory_space<vmem>>, vector<1x256x128xbf16>
    %323 = vector.shape_cast %322 : vector<1x256x128xbf16> to vector<256x128xbf16>
    %cst_206 = arith.constant dense<0.000000e+00> : vector<1x128xf32>
    %324 = tpu.matmul %321, %323, %cst_206 {dimension_numbers = #tpu.dot_dimension_numbers<[1], [0], [0], [1], [0, 0, 1, 1], [], []>} : vector<1x256xbf16>, vector<256x128xbf16>, vector<1x128xf32> -> vector<1x128xf32>
    %325 = arith.addf %320, %324 : vector<1x128xf32>
    %326 = vector.extract_strided_slice %299 {offsets = [5, 0], sizes = [1, 256], strides = [1, 1]} : vector<8x256xbf16> to vector<1x256xbf16>
    %c5_207 = arith.constant 5 : index
    %c0_208 = arith.constant 0 : index
    %c0_209 = arith.constant 0 : index
    %327 = vector.load %arg9[%c5_207, %c0_208, %c0_209] : memref<8x256x128xbf16, #tpu.memory_space<vmem>>, vector<1x256x128xbf16>
    %328 = vector.shape_cast %327 : vector<1x256x128xbf16> to vector<256x128xbf16>
    %cst_210 = arith.constant dense<0.000000e+00> : vector<1x128xf32>
    %329 = tpu.matmul %326, %328, %cst_210 {dimension_numbers = #tpu.dot_dimension_numbers<[1], [0], [0], [1], [0, 0, 1, 1], [], []>} : vector<1x256xbf16>, vector<256x128xbf16>, vector<1x128xf32> -> vector<1x128xf32>
    %330 = arith.addf %325, %329 : vector<1x128xf32>
    %331 = vector.extract_strided_slice %299 {offsets = [6, 0], sizes = [1, 256], strides = [1, 1]} : vector<8x256xbf16> to vector<1x256xbf16>
    %c6_211 = arith.constant 6 : index
    %c0_212 = arith.constant 0 : index
    %c0_213 = arith.constant 0 : index
    %332 = vector.load %arg9[%c6_211, %c0_212, %c0_213] : memref<8x256x128xbf16, #tpu.memory_space<vmem>>, vector<1x256x128xbf16>
    %333 = vector.shape_cast %332 : vector<1x256x128xbf16> to vector<256x128xbf16>
    %cst_214 = arith.constant dense<0.000000e+00> : vector<1x128xf32>
    %334 = tpu.matmul %331, %333, %cst_214 {dimension_numbers = #tpu.dot_dimension_numbers<[1], [0], [0], [1], [0, 0, 1, 1], [], []>} : vector<1x256xbf16>, vector<256x128xbf16>, vector<1x128xf32> -> vector<1x128xf32>
    %335 = arith.addf %330, %334 : vector<1x128xf32>
    %336 = vector.extract_strided_slice %299 {offsets = [7, 0], sizes = [1, 256], strides = [1, 1]} : vector<8x256xbf16> to vector<1x256xbf16>
    %c7_215 = arith.constant 7 : index
    %c0_216 = arith.constant 0 : index
    %c0_217 = arith.constant 0 : index
    %337 = vector.load %arg9[%c7_215, %c0_216, %c0_217] : memref<8x256x128xbf16, #tpu.memory_space<vmem>>, vector<1x256x128xbf16>
    %338 = vector.shape_cast %337 : vector<1x256x128xbf16> to vector<256x128xbf16>
    %cst_218 = arith.constant dense<0.000000e+00> : vector<1x128xf32>
    %339 = tpu.matmul %336, %338, %cst_218 {dimension_numbers = #tpu.dot_dimension_numbers<[1], [0], [0], [1], [0, 0, 1, 1], [], []>} : vector<1x256xbf16>, vector<256x128xbf16>, vector<1x128xf32> -> vector<1x128xf32>
    %340 = arith.addf %335, %339 : vector<1x128xf32>
    %341 = arith.truncf %340 : vector<1x128xf32> to vector<1x128xbf16>
    %c0_219 = arith.constant 0 : index
    %c0_220 = arith.constant 0 : index
    %c0_221 = arith.constant 0 : index
    %342 = vector.load %arg11[%c0_219, %c0_220, %c0_221] : memref<8x128x256xbf16, #tpu.memory_space<vmem>>, vector<1x128x256xbf16>
    %343 = vector.shape_cast %342 : vector<1x128x256xbf16> to vector<128x256xbf16>
    %cst_222 = arith.constant dense<0.000000e+00> : vector<1x256xf32>
    %344 = tpu.matmul %341, %343, %cst_222 {dimension_numbers = #tpu.dot_dimension_numbers<[1], [0], [0], [1], [0, 0, 1, 1], [], []>} : vector<1x128xbf16>, vector<128x256xbf16>, vector<1x256xf32> -> vector<1x256xf32>
    %c1_223 = arith.constant 1 : index
    %c0_224 = arith.constant 0 : index
    %c0_225 = arith.constant 0 : index
    %345 = vector.load %arg11[%c1_223, %c0_224, %c0_225] : memref<8x128x256xbf16, #tpu.memory_space<vmem>>, vector<1x128x256xbf16>
    %346 = vector.shape_cast %345 : vector<1x128x256xbf16> to vector<128x256xbf16>
    %cst_226 = arith.constant dense<0.000000e+00> : vector<1x256xf32>
    %347 = tpu.matmul %341, %346, %cst_226 {dimension_numbers = #tpu.dot_dimension_numbers<[1], [0], [0], [1], [0, 0, 1, 1], [], []>} : vector<1x128xbf16>, vector<128x256xbf16>, vector<1x256xf32> -> vector<1x256xf32>
    %c2_227 = arith.constant 2 : index
    %c0_228 = arith.constant 0 : index
    %c0_229 = arith.constant 0 : index
    %348 = vector.load %arg11[%c2_227, %c0_228, %c0_229] : memref<8x128x256xbf16, #tpu.memory_space<vmem>>, vector<1x128x256xbf16>
    %349 = vector.shape_cast %348 : vector<1x128x256xbf16> to vector<128x256xbf16>
    %cst_230 = arith.constant dense<0.000000e+00> : vector<1x256xf32>
    %350 = tpu.matmul %341, %349, %cst_230 {dimension_numbers = #tpu.dot_dimension_numbers<[1], [0], [0], [1], [0, 0, 1, 1], [], []>} : vector<1x128xbf16>, vector<128x256xbf16>, vector<1x256xf32> -> vector<1x256xf32>
    %c3_231 = arith.constant 3 : index
    %c0_232 = arith.constant 0 : index
    %c0_233 = arith.constant 0 : index
    %351 = vector.load %arg11[%c3_231, %c0_232, %c0_233] : memref<8x128x256xbf16, #tpu.memory_space<vmem>>, vector<1x128x256xbf16>
    %352 = vector.shape_cast %351 : vector<1x128x256xbf16> to vector<128x256xbf16>
    %cst_234 = arith.constant dense<0.000000e+00> : vector<1x256xf32>
    %353 = tpu.matmul %341, %352, %cst_234 {dimension_numbers = #tpu.dot_dimension_numbers<[1], [0], [0], [1], [0, 0, 1, 1], [], []>} : vector<1x128xbf16>, vector<128x256xbf16>, vector<1x256xf32> -> vector<1x256xf32>
    %c4_235 = arith.constant 4 : index
    %c0_236 = arith.constant 0 : index
    %c0_237 = arith.constant 0 : index
    %354 = vector.load %arg11[%c4_235, %c0_236, %c0_237] : memref<8x128x256xbf16, #tpu.memory_space<vmem>>, vector<1x128x256xbf16>
    %355 = vector.shape_cast %354 : vector<1x128x256xbf16> to vector<128x256xbf16>
    %cst_238 = arith.constant dense<0.000000e+00> : vector<1x256xf32>
    %356 = tpu.matmul %341, %355, %cst_238 {dimension_numbers = #tpu.dot_dimension_numbers<[1], [0], [0], [1], [0, 0, 1, 1], [], []>} : vector<1x128xbf16>, vector<128x256xbf16>, vector<1x256xf32> -> vector<1x256xf32>
    %c5_239 = arith.constant 5 : index
    %c0_240 = arith.constant 0 : index
    %c0_241 = arith.constant 0 : index
    %357 = vector.load %arg11[%c5_239, %c0_240, %c0_241] : memref<8x128x256xbf16, #tpu.memory_space<vmem>>, vector<1x128x256xbf16>
    %358 = vector.shape_cast %357 : vector<1x128x256xbf16> to vector<128x256xbf16>
    %cst_242 = arith.constant dense<0.000000e+00> : vector<1x256xf32>
    %359 = tpu.matmul %341, %358, %cst_242 {dimension_numbers = #tpu.dot_dimension_numbers<[1], [0], [0], [1], [0, 0, 1, 1], [], []>} : vector<1x128xbf16>, vector<128x256xbf16>, vector<1x256xf32> -> vector<1x256xf32>
    %c6_243 = arith.constant 6 : index
    %c0_244 = arith.constant 0 : index
    %c0_245 = arith.constant 0 : index
    %360 = vector.load %arg11[%c6_243, %c0_244, %c0_245] : memref<8x128x256xbf16, #tpu.memory_space<vmem>>, vector<1x128x256xbf16>
    %361 = vector.shape_cast %360 : vector<1x128x256xbf16> to vector<128x256xbf16>
    %cst_246 = arith.constant dense<0.000000e+00> : vector<1x256xf32>
    %362 = tpu.matmul %341, %361, %cst_246 {dimension_numbers = #tpu.dot_dimension_numbers<[1], [0], [0], [1], [0, 0, 1, 1], [], []>} : vector<1x128xbf16>, vector<128x256xbf16>, vector<1x256xf32> -> vector<1x256xf32>
    %c7_247 = arith.constant 7 : index
    %c0_248 = arith.constant 0 : index
    %c0_249 = arith.constant 0 : index
    %363 = vector.load %arg11[%c7_247, %c0_248, %c0_249] : memref<8x128x256xbf16, #tpu.memory_space<vmem>>, vector<1x128x256xbf16>
    %364 = vector.shape_cast %363 : vector<1x128x256xbf16> to vector<128x256xbf16>
    %cst_250 = arith.constant dense<0.000000e+00> : vector<1x256xf32>
    %365 = tpu.matmul %341, %364, %cst_250 {dimension_numbers = #tpu.dot_dimension_numbers<[1], [0], [0], [1], [0, 0, 1, 1], [], []>} : vector<1x128xbf16>, vector<128x256xbf16>, vector<1x256xf32> -> vector<1x256xf32>
    %366 = tpu.concatenate %344, %347, %350, %353, %356, %359, %362, %365 in 0 : vector<1x256xf32>, vector<1x256xf32>, vector<1x256xf32>, vector<1x256xf32>, vector<1x256xf32>, vector<1x256xf32>, vector<1x256xf32>, vector<1x256xf32> -> vector<8x256xf32>
    %c0_251 = arith.constant 0 : index
    %c0_252 = arith.constant 0 : index
    %367 = vector.load %arg12[%c0_251, %c0_252] : memref<8x256xf32, #tpu.memory_space<vmem>>, vector<8x256xf32>
    %368 = arith.addf %366, %367 : vector<8x256xf32>
    %cst_253 = arith.constant 0.000000e+00 : f32
    %369 = vector.broadcast %cst_253 : f32 to vector<8x256xf32>
    %370 = arith.maximumf %368, %369 : vector<8x256xf32>
    %371 = arith.truncf %370 : vector<8x256xf32> to vector<8x256xbf16>
    %cst_254 = arith.constant 0.000000e+00 : f32
    %372 = vector.broadcast %cst_254 : f32 to vector<16x256xf32>
    %373 = vector.extract_strided_slice %371 {offsets = [0, 239], sizes = [8, 17], strides = [1, 1]} : vector<8x256xbf16> to vector<8x17xbf16>
    %374 = vector.extract_strided_slice %371 {offsets = [0, 0], sizes = [8, 239], strides = [1, 1]} : vector<8x256xbf16> to vector<8x239xbf16>
    %375 = tpu.concatenate %373, %374 in 1 : vector<8x17xbf16>, vector<8x239xbf16> -> vector<8x256xbf16>
    %c0_255 = arith.constant 0 : index
    %c0_256 = arith.constant 0 : index
    %c0_257 = arith.constant 0 : index
    %376 = vector.load %arg2[%c0_255, %c0_256, %c0_257] : memref<9x1x256xbf16, #tpu.memory_space<vmem>>, vector<1x1x256xbf16>
    %377 = vector.shape_cast %376 : vector<1x1x256xbf16> to vector<1x256xbf16>
    %378 = vector.broadcast %377 : vector<1x256xbf16> to vector<8x256xbf16>
    %379 = arith.mulf %375, %378 : vector<8x256xbf16>
    %c0_258 = arith.constant 0 : index
    %c0_259 = arith.constant 0 : index
    %c0_260 = arith.constant 0 : index
    %380 = vector.load %arg13[%c0_258, %c0_259, %c0_260] : memref<9x16x8xbf16, #tpu.memory_space<vmem>>, vector<1x16x8xbf16>
    %381 = vector.shape_cast %380 : vector<1x16x8xbf16> to vector<16x8xbf16>
    %cst_261 = arith.constant dense<0.000000e+00> : vector<16x256xf32>
    %382 = tpu.matmul %381, %379, %cst_261 {dimension_numbers = #tpu.dot_dimension_numbers<[1], [0], [0], [1], [0, 0, 1, 1], [], []>} : vector<16x8xbf16>, vector<8x256xbf16>, vector<16x256xf32> -> vector<16x256xf32>
    %383 = arith.addf %372, %382 : vector<16x256xf32>
    %384 = vector.extract_strided_slice %371 {offsets = [0, 240], sizes = [8, 16], strides = [1, 1]} : vector<8x256xbf16> to vector<8x16xbf16>
    %385 = vector.extract_strided_slice %371 {offsets = [0, 0], sizes = [8, 240], strides = [1, 1]} : vector<8x256xbf16> to vector<8x240xbf16>
    %386 = tpu.concatenate %384, %385 in 1 : vector<8x16xbf16>, vector<8x240xbf16> -> vector<8x256xbf16>
    %c1_262 = arith.constant 1 : index
    %c0_263 = arith.constant 0 : index
    %c0_264 = arith.constant 0 : index
    %387 = vector.load %arg2[%c1_262, %c0_263, %c0_264] : memref<9x1x256xbf16, #tpu.memory_space<vmem>>, vector<1x1x256xbf16>
    %388 = vector.shape_cast %387 : vector<1x1x256xbf16> to vector<1x256xbf16>
    %389 = vector.broadcast %388 : vector<1x256xbf16> to vector<8x256xbf16>
    %390 = arith.mulf %386, %389 : vector<8x256xbf16>
    %c1_265 = arith.constant 1 : index
    %c0_266 = arith.constant 0 : index
    %c0_267 = arith.constant 0 : index
    %391 = vector.load %arg13[%c1_265, %c0_266, %c0_267] : memref<9x16x8xbf16, #tpu.memory_space<vmem>>, vector<1x16x8xbf16>
    %392 = vector.shape_cast %391 : vector<1x16x8xbf16> to vector<16x8xbf16>
    %cst_268 = arith.constant dense<0.000000e+00> : vector<16x256xf32>
    %393 = tpu.matmul %392, %390, %cst_268 {dimension_numbers = #tpu.dot_dimension_numbers<[1], [0], [0], [1], [0, 0, 1, 1], [], []>} : vector<16x8xbf16>, vector<8x256xbf16>, vector<16x256xf32> -> vector<16x256xf32>
    %394 = arith.addf %383, %393 : vector<16x256xf32>
    %395 = vector.extract_strided_slice %371 {offsets = [0, 241], sizes = [8, 15], strides = [1, 1]} : vector<8x256xbf16> to vector<8x15xbf16>
    %396 = vector.extract_strided_slice %371 {offsets = [0, 0], sizes = [8, 241], strides = [1, 1]} : vector<8x256xbf16> to vector<8x241xbf16>
    %397 = tpu.concatenate %395, %396 in 1 : vector<8x15xbf16>, vector<8x241xbf16> -> vector<8x256xbf16>
    %c2_269 = arith.constant 2 : index
    %c0_270 = arith.constant 0 : index
    %c0_271 = arith.constant 0 : index
    %398 = vector.load %arg2[%c2_269, %c0_270, %c0_271] : memref<9x1x256xbf16, #tpu.memory_space<vmem>>, vector<1x1x256xbf16>
    %399 = vector.shape_cast %398 : vector<1x1x256xbf16> to vector<1x256xbf16>
    %400 = vector.broadcast %399 : vector<1x256xbf16> to vector<8x256xbf16>
    %401 = arith.mulf %397, %400 : vector<8x256xbf16>
    %c2_272 = arith.constant 2 : index
    %c0_273 = arith.constant 0 : index
    %c0_274 = arith.constant 0 : index
    %402 = vector.load %arg13[%c2_272, %c0_273, %c0_274] : memref<9x16x8xbf16, #tpu.memory_space<vmem>>, vector<1x16x8xbf16>
    %403 = vector.shape_cast %402 : vector<1x16x8xbf16> to vector<16x8xbf16>
    %cst_275 = arith.constant dense<0.000000e+00> : vector<16x256xf32>
    %404 = tpu.matmul %403, %401, %cst_275 {dimension_numbers = #tpu.dot_dimension_numbers<[1], [0], [0], [1], [0, 0, 1, 1], [], []>} : vector<16x8xbf16>, vector<8x256xbf16>, vector<16x256xf32> -> vector<16x256xf32>
    %405 = arith.addf %394, %404 : vector<16x256xf32>
    %406 = vector.extract_strided_slice %371 {offsets = [0, 255], sizes = [8, 1], strides = [1, 1]} : vector<8x256xbf16> to vector<8x1xbf16>
    %407 = vector.extract_strided_slice %371 {offsets = [0, 0], sizes = [8, 255], strides = [1, 1]} : vector<8x256xbf16> to vector<8x255xbf16>
    %408 = tpu.concatenate %406, %407 in 1 : vector<8x1xbf16>, vector<8x255xbf16> -> vector<8x256xbf16>
    %c3_276 = arith.constant 3 : index
    %c0_277 = arith.constant 0 : index
    %c0_278 = arith.constant 0 : index
    %409 = vector.load %arg2[%c3_276, %c0_277, %c0_278] : memref<9x1x256xbf16, #tpu.memory_space<vmem>>, vector<1x1x256xbf16>
    %410 = vector.shape_cast %409 : vector<1x1x256xbf16> to vector<1x256xbf16>
    %411 = vector.broadcast %410 : vector<1x256xbf16> to vector<8x256xbf16>
    %412 = arith.mulf %408, %411 : vector<8x256xbf16>
    %c3_279 = arith.constant 3 : index
    %c0_280 = arith.constant 0 : index
    %c0_281 = arith.constant 0 : index
    %413 = vector.load %arg13[%c3_279, %c0_280, %c0_281] : memref<9x16x8xbf16, #tpu.memory_space<vmem>>, vector<1x16x8xbf16>
    %414 = vector.shape_cast %413 : vector<1x16x8xbf16> to vector<16x8xbf16>
    %cst_282 = arith.constant dense<0.000000e+00> : vector<16x256xf32>
    %415 = tpu.matmul %414, %412, %cst_282 {dimension_numbers = #tpu.dot_dimension_numbers<[1], [0], [0], [1], [0, 0, 1, 1], [], []>} : vector<16x8xbf16>, vector<8x256xbf16>, vector<16x256xf32> -> vector<16x256xf32>
    %416 = arith.addf %405, %415 : vector<16x256xf32>
    %c4_283 = arith.constant 4 : index
    %c0_284 = arith.constant 0 : index
    %c0_285 = arith.constant 0 : index
    %417 = vector.load %arg13[%c4_283, %c0_284, %c0_285] : memref<9x16x8xbf16, #tpu.memory_space<vmem>>, vector<1x16x8xbf16>
    %418 = vector.shape_cast %417 : vector<1x16x8xbf16> to vector<16x8xbf16>
    %cst_286 = arith.constant dense<0.000000e+00> : vector<16x256xf32>
    %419 = tpu.matmul %418, %371, %cst_286 {dimension_numbers = #tpu.dot_dimension_numbers<[1], [0], [0], [1], [0, 0, 1, 1], [], []>} : vector<16x8xbf16>, vector<8x256xbf16>, vector<16x256xf32> -> vector<16x256xf32>
    %420 = arith.addf %416, %419 : vector<16x256xf32>
    %421 = vector.extract_strided_slice %371 {offsets = [0, 1], sizes = [8, 255], strides = [1, 1]} : vector<8x256xbf16> to vector<8x255xbf16>
    %422 = vector.extract_strided_slice %371 {offsets = [0, 0], sizes = [8, 1], strides = [1, 1]} : vector<8x256xbf16> to vector<8x1xbf16>
    %423 = tpu.concatenate %421, %422 in 1 : vector<8x255xbf16>, vector<8x1xbf16> -> vector<8x256xbf16>
    %c5_287 = arith.constant 5 : index
    %c0_288 = arith.constant 0 : index
    %c0_289 = arith.constant 0 : index
    %424 = vector.load %arg2[%c5_287, %c0_288, %c0_289] : memref<9x1x256xbf16, #tpu.memory_space<vmem>>, vector<1x1x256xbf16>
    %425 = vector.shape_cast %424 : vector<1x1x256xbf16> to vector<1x256xbf16>
    %426 = vector.broadcast %425 : vector<1x256xbf16> to vector<8x256xbf16>
    %427 = arith.mulf %423, %426 : vector<8x256xbf16>
    %c5_290 = arith.constant 5 : index
    %c0_291 = arith.constant 0 : index
    %c0_292 = arith.constant 0 : index
    %428 = vector.load %arg13[%c5_290, %c0_291, %c0_292] : memref<9x16x8xbf16, #tpu.memory_space<vmem>>, vector<1x16x8xbf16>
    %429 = vector.shape_cast %428 : vector<1x16x8xbf16> to vector<16x8xbf16>
    %cst_293 = arith.constant dense<0.000000e+00> : vector<16x256xf32>
    %430 = tpu.matmul %429, %427, %cst_293 {dimension_numbers = #tpu.dot_dimension_numbers<[1], [0], [0], [1], [0, 0, 1, 1], [], []>} : vector<16x8xbf16>, vector<8x256xbf16>, vector<16x256xf32> -> vector<16x256xf32>
    %431 = arith.addf %420, %430 : vector<16x256xf32>
    %432 = vector.extract_strided_slice %371 {offsets = [0, 15], sizes = [8, 241], strides = [1, 1]} : vector<8x256xbf16> to vector<8x241xbf16>
    %433 = vector.extract_strided_slice %371 {offsets = [0, 0], sizes = [8, 15], strides = [1, 1]} : vector<8x256xbf16> to vector<8x15xbf16>
    %434 = tpu.concatenate %432, %433 in 1 : vector<8x241xbf16>, vector<8x15xbf16> -> vector<8x256xbf16>
    %c6_294 = arith.constant 6 : index
    %c0_295 = arith.constant 0 : index
    %c0_296 = arith.constant 0 : index
    %435 = vector.load %arg2[%c6_294, %c0_295, %c0_296] : memref<9x1x256xbf16, #tpu.memory_space<vmem>>, vector<1x1x256xbf16>
    %436 = vector.shape_cast %435 : vector<1x1x256xbf16> to vector<1x256xbf16>
    %437 = vector.broadcast %436 : vector<1x256xbf16> to vector<8x256xbf16>
    %438 = arith.mulf %434, %437 : vector<8x256xbf16>
    %c6_297 = arith.constant 6 : index
    %c0_298 = arith.constant 0 : index
    %c0_299 = arith.constant 0 : index
    %439 = vector.load %arg13[%c6_297, %c0_298, %c0_299] : memref<9x16x8xbf16, #tpu.memory_space<vmem>>, vector<1x16x8xbf16>
    %440 = vector.shape_cast %439 : vector<1x16x8xbf16> to vector<16x8xbf16>
    %cst_300 = arith.constant dense<0.000000e+00> : vector<16x256xf32>
    %441 = tpu.matmul %440, %438, %cst_300 {dimension_numbers = #tpu.dot_dimension_numbers<[1], [0], [0], [1], [0, 0, 1, 1], [], []>} : vector<16x8xbf16>, vector<8x256xbf16>, vector<16x256xf32> -> vector<16x256xf32>
    %442 = arith.addf %431, %441 : vector<16x256xf32>
    %443 = vector.extract_strided_slice %371 {offsets = [0, 16], sizes = [8, 240], strides = [1, 1]} : vector<8x256xbf16> to vector<8x240xbf16>
    %444 = vector.extract_strided_slice %371 {offsets = [0, 0], sizes = [8, 16], strides = [1, 1]} : vector<8x256xbf16> to vector<8x16xbf16>
    %445 = tpu.concatenate %443, %444 in 1 : vector<8x240xbf16>, vector<8x16xbf16> -> vector<8x256xbf16>
    %c7_301 = arith.constant 7 : index
    %c0_302 = arith.constant 0 : index
    %c0_303 = arith.constant 0 : index
    %446 = vector.load %arg2[%c7_301, %c0_302, %c0_303] : memref<9x1x256xbf16, #tpu.memory_space<vmem>>, vector<1x1x256xbf16>
    %447 = vector.shape_cast %446 : vector<1x1x256xbf16> to vector<1x256xbf16>
    %448 = vector.broadcast %447 : vector<1x256xbf16> to vector<8x256xbf16>
    %449 = arith.mulf %445, %448 : vector<8x256xbf16>
    %c7_304 = arith.constant 7 : index
    %c0_305 = arith.constant 0 : index
    %c0_306 = arith.constant 0 : index
    %450 = vector.load %arg13[%c7_304, %c0_305, %c0_306] : memref<9x16x8xbf16, #tpu.memory_space<vmem>>, vector<1x16x8xbf16>
    %451 = vector.shape_cast %450 : vector<1x16x8xbf16> to vector<16x8xbf16>
    %cst_307 = arith.constant dense<0.000000e+00> : vector<16x256xf32>
    %452 = tpu.matmul %451, %449, %cst_307 {dimension_numbers = #tpu.dot_dimension_numbers<[1], [0], [0], [1], [0, 0, 1, 1], [], []>} : vector<16x8xbf16>, vector<8x256xbf16>, vector<16x256xf32> -> vector<16x256xf32>
    %453 = arith.addf %442, %452 : vector<16x256xf32>
    %454 = vector.extract_strided_slice %371 {offsets = [0, 17], sizes = [8, 239], strides = [1, 1]} : vector<8x256xbf16> to vector<8x239xbf16>
    %455 = vector.extract_strided_slice %371 {offsets = [0, 0], sizes = [8, 17], strides = [1, 1]} : vector<8x256xbf16> to vector<8x17xbf16>
    %456 = tpu.concatenate %454, %455 in 1 : vector<8x239xbf16>, vector<8x17xbf16> -> vector<8x256xbf16>
    %c8_308 = arith.constant 8 : index
    %c0_309 = arith.constant 0 : index
    %c0_310 = arith.constant 0 : index
    %457 = vector.load %arg2[%c8_308, %c0_309, %c0_310] : memref<9x1x256xbf16, #tpu.memory_space<vmem>>, vector<1x1x256xbf16>
    %458 = vector.shape_cast %457 : vector<1x1x256xbf16> to vector<1x256xbf16>
    %459 = vector.broadcast %458 : vector<1x256xbf16> to vector<8x256xbf16>
    %460 = arith.mulf %456, %459 : vector<8x256xbf16>
    %c8_311 = arith.constant 8 : index
    %c0_312 = arith.constant 0 : index
    %c0_313 = arith.constant 0 : index
    %461 = vector.load %arg13[%c8_311, %c0_312, %c0_313] : memref<9x16x8xbf16, #tpu.memory_space<vmem>>, vector<1x16x8xbf16>
    %462 = vector.shape_cast %461 : vector<1x16x8xbf16> to vector<16x8xbf16>
    %cst_314 = arith.constant dense<0.000000e+00> : vector<16x256xf32>
    %463 = tpu.matmul %462, %460, %cst_314 {dimension_numbers = #tpu.dot_dimension_numbers<[1], [0], [0], [1], [0, 0, 1, 1], [], []>} : vector<16x8xbf16>, vector<8x256xbf16>, vector<16x256xf32> -> vector<16x256xf32>
    %464 = arith.addf %453, %463 : vector<16x256xf32>
    %c0_315 = arith.constant 0 : index
    %c0_316 = arith.constant 0 : index
    %465 = vector.load %arg14[%c0_315, %c0_316] : memref<16x1xf32, #tpu.memory_space<vmem>>, vector<16x1xf32>
    %466 = vector.broadcast %465 : vector<16x1xf32> to vector<16x256xf32>
    %467 = arith.addf %464, %466 : vector<16x256xf32>
    %cst_317 = arith.constant 0.000000e+00 : f32
    %468 = vector.broadcast %cst_317 : f32 to vector<16x256xf32>
    %469 = arith.maximumf %467, %468 : vector<16x256xf32>
    %470 = arith.truncf %469 : vector<16x256xf32> to vector<16x256xbf16>
    %cst_318 = arith.constant 0.000000e+00 : f32
    %471 = vector.broadcast %cst_318 : f32 to vector<32x256xf32>
    %472 = vector.extract_strided_slice %470 {offsets = [0, 239], sizes = [16, 17], strides = [1, 1]} : vector<16x256xbf16> to vector<16x17xbf16>
    %473 = vector.extract_strided_slice %470 {offsets = [0, 0], sizes = [16, 239], strides = [1, 1]} : vector<16x256xbf16> to vector<16x239xbf16>
    %474 = tpu.concatenate %472, %473 in 1 : vector<16x17xbf16>, vector<16x239xbf16> -> vector<16x256xbf16>
    %c0_319 = arith.constant 0 : index
    %c0_320 = arith.constant 0 : index
    %c0_321 = arith.constant 0 : index
    %475 = vector.load %arg2[%c0_319, %c0_320, %c0_321] : memref<9x1x256xbf16, #tpu.memory_space<vmem>>, vector<1x1x256xbf16>
    %476 = vector.shape_cast %475 : vector<1x1x256xbf16> to vector<1x256xbf16>
    %477 = vector.broadcast %476 : vector<1x256xbf16> to vector<16x256xbf16>
    %478 = arith.mulf %474, %477 : vector<16x256xbf16>
    %c0_322 = arith.constant 0 : index
    %c0_323 = arith.constant 0 : index
    %c0_324 = arith.constant 0 : index
    %479 = vector.load %arg15[%c0_322, %c0_323, %c0_324] : memref<9x32x16xbf16, #tpu.memory_space<vmem>>, vector<1x32x16xbf16>
    %480 = vector.shape_cast %479 : vector<1x32x16xbf16> to vector<32x16xbf16>
    %cst_325 = arith.constant dense<0.000000e+00> : vector<32x256xf32>
    %481 = tpu.matmul %480, %478, %cst_325 {dimension_numbers = #tpu.dot_dimension_numbers<[1], [0], [0], [1], [0, 0, 1, 1], [], []>} : vector<32x16xbf16>, vector<16x256xbf16>, vector<32x256xf32> -> vector<32x256xf32>
    %482 = arith.addf %471, %481 : vector<32x256xf32>
    %483 = vector.extract_strided_slice %470 {offsets = [0, 240], sizes = [16, 16], strides = [1, 1]} : vector<16x256xbf16> to vector<16x16xbf16>
    %484 = vector.extract_strided_slice %470 {offsets = [0, 0], sizes = [16, 240], strides = [1, 1]} : vector<16x256xbf16> to vector<16x240xbf16>
    %485 = tpu.concatenate %483, %484 in 1 : vector<16x16xbf16>, vector<16x240xbf16> -> vector<16x256xbf16>
    %c1_326 = arith.constant 1 : index
    %c0_327 = arith.constant 0 : index
    %c0_328 = arith.constant 0 : index
    %486 = vector.load %arg2[%c1_326, %c0_327, %c0_328] : memref<9x1x256xbf16, #tpu.memory_space<vmem>>, vector<1x1x256xbf16>
    %487 = vector.shape_cast %486 : vector<1x1x256xbf16> to vector<1x256xbf16>
    %488 = vector.broadcast %487 : vector<1x256xbf16> to vector<16x256xbf16>
    %489 = arith.mulf %485, %488 : vector<16x256xbf16>
    %c1_329 = arith.constant 1 : index
    %c0_330 = arith.constant 0 : index
    %c0_331 = arith.constant 0 : index
    %490 = vector.load %arg15[%c1_329, %c0_330, %c0_331] : memref<9x32x16xbf16, #tpu.memory_space<vmem>>, vector<1x32x16xbf16>
    %491 = vector.shape_cast %490 : vector<1x32x16xbf16> to vector<32x16xbf16>
    %cst_332 = arith.constant dense<0.000000e+00> : vector<32x256xf32>
    %492 = tpu.matmul %491, %489, %cst_332 {dimension_numbers = #tpu.dot_dimension_numbers<[1], [0], [0], [1], [0, 0, 1, 1], [], []>} : vector<32x16xbf16>, vector<16x256xbf16>, vector<32x256xf32> -> vector<32x256xf32>
    %493 = arith.addf %482, %492 : vector<32x256xf32>
    %494 = vector.extract_strided_slice %470 {offsets = [0, 241], sizes = [16, 15], strides = [1, 1]} : vector<16x256xbf16> to vector<16x15xbf16>
    %495 = vector.extract_strided_slice %470 {offsets = [0, 0], sizes = [16, 241], strides = [1, 1]} : vector<16x256xbf16> to vector<16x241xbf16>
    %496 = tpu.concatenate %494, %495 in 1 : vector<16x15xbf16>, vector<16x241xbf16> -> vector<16x256xbf16>
    %c2_333 = arith.constant 2 : index
    %c0_334 = arith.constant 0 : index
    %c0_335 = arith.constant 0 : index
    %497 = vector.load %arg2[%c2_333, %c0_334, %c0_335] : memref<9x1x256xbf16, #tpu.memory_space<vmem>>, vector<1x1x256xbf16>
    %498 = vector.shape_cast %497 : vector<1x1x256xbf16> to vector<1x256xbf16>
    %499 = vector.broadcast %498 : vector<1x256xbf16> to vector<16x256xbf16>
    %500 = arith.mulf %496, %499 : vector<16x256xbf16>
    %c2_336 = arith.constant 2 : index
    %c0_337 = arith.constant 0 : index
    %c0_338 = arith.constant 0 : index
    %501 = vector.load %arg15[%c2_336, %c0_337, %c0_338] : memref<9x32x16xbf16, #tpu.memory_space<vmem>>, vector<1x32x16xbf16>
    %502 = vector.shape_cast %501 : vector<1x32x16xbf16> to vector<32x16xbf16>
    %cst_339 = arith.constant dense<0.000000e+00> : vector<32x256xf32>
    %503 = tpu.matmul %502, %500, %cst_339 {dimension_numbers = #tpu.dot_dimension_numbers<[1], [0], [0], [1], [0, 0, 1, 1], [], []>} : vector<32x16xbf16>, vector<16x256xbf16>, vector<32x256xf32> -> vector<32x256xf32>
    %504 = arith.addf %493, %503 : vector<32x256xf32>
    %505 = vector.extract_strided_slice %470 {offsets = [0, 255], sizes = [16, 1], strides = [1, 1]} : vector<16x256xbf16> to vector<16x1xbf16>
    %506 = vector.extract_strided_slice %470 {offsets = [0, 0], sizes = [16, 255], strides = [1, 1]} : vector<16x256xbf16> to vector<16x255xbf16>
    %507 = tpu.concatenate %505, %506 in 1 : vector<16x1xbf16>, vector<16x255xbf16> -> vector<16x256xbf16>
    %c3_340 = arith.constant 3 : index
    %c0_341 = arith.constant 0 : index
    %c0_342 = arith.constant 0 : index
    %508 = vector.load %arg2[%c3_340, %c0_341, %c0_342] : memref<9x1x256xbf16, #tpu.memory_space<vmem>>, vector<1x1x256xbf16>
    %509 = vector.shape_cast %508 : vector<1x1x256xbf16> to vector<1x256xbf16>
    %510 = vector.broadcast %509 : vector<1x256xbf16> to vector<16x256xbf16>
    %511 = arith.mulf %507, %510 : vector<16x256xbf16>
    %c3_343 = arith.constant 3 : index
    %c0_344 = arith.constant 0 : index
    %c0_345 = arith.constant 0 : index
    %512 = vector.load %arg15[%c3_343, %c0_344, %c0_345] : memref<9x32x16xbf16, #tpu.memory_space<vmem>>, vector<1x32x16xbf16>
    %513 = vector.shape_cast %512 : vector<1x32x16xbf16> to vector<32x16xbf16>
    %cst_346 = arith.constant dense<0.000000e+00> : vector<32x256xf32>
    %514 = tpu.matmul %513, %511, %cst_346 {dimension_numbers = #tpu.dot_dimension_numbers<[1], [0], [0], [1], [0, 0, 1, 1], [], []>} : vector<32x16xbf16>, vector<16x256xbf16>, vector<32x256xf32> -> vector<32x256xf32>
    %515 = arith.addf %504, %514 : vector<32x256xf32>
    %c4_347 = arith.constant 4 : index
    %c0_348 = arith.constant 0 : index
    %c0_349 = arith.constant 0 : index
    %516 = vector.load %arg15[%c4_347, %c0_348, %c0_349] : memref<9x32x16xbf16, #tpu.memory_space<vmem>>, vector<1x32x16xbf16>
    %517 = vector.shape_cast %516 : vector<1x32x16xbf16> to vector<32x16xbf16>
    %cst_350 = arith.constant dense<0.000000e+00> : vector<32x256xf32>
    %518 = tpu.matmul %517, %470, %cst_350 {dimension_numbers = #tpu.dot_dimension_numbers<[1], [0], [0], [1], [0, 0, 1, 1], [], []>} : vector<32x16xbf16>, vector<16x256xbf16>, vector<32x256xf32> -> vector<32x256xf32>
    %519 = arith.addf %515, %518 : vector<32x256xf32>
    %520 = vector.extract_strided_slice %470 {offsets = [0, 1], sizes = [16, 255], strides = [1, 1]} : vector<16x256xbf16> to vector<16x255xbf16>
    %521 = vector.extract_strided_slice %470 {offsets = [0, 0], sizes = [16, 1], strides = [1, 1]} : vector<16x256xbf16> to vector<16x1xbf16>
    %522 = tpu.concatenate %520, %521 in 1 : vector<16x255xbf16>, vector<16x1xbf16> -> vector<16x256xbf16>
    %c5_351 = arith.constant 5 : index
    %c0_352 = arith.constant 0 : index
    %c0_353 = arith.constant 0 : index
    %523 = vector.load %arg2[%c5_351, %c0_352, %c0_353] : memref<9x1x256xbf16, #tpu.memory_space<vmem>>, vector<1x1x256xbf16>
    %524 = vector.shape_cast %523 : vector<1x1x256xbf16> to vector<1x256xbf16>
    %525 = vector.broadcast %524 : vector<1x256xbf16> to vector<16x256xbf16>
    %526 = arith.mulf %522, %525 : vector<16x256xbf16>
    %c5_354 = arith.constant 5 : index
    %c0_355 = arith.constant 0 : index
    %c0_356 = arith.constant 0 : index
    %527 = vector.load %arg15[%c5_354, %c0_355, %c0_356] : memref<9x32x16xbf16, #tpu.memory_space<vmem>>, vector<1x32x16xbf16>
    %528 = vector.shape_cast %527 : vector<1x32x16xbf16> to vector<32x16xbf16>
    %cst_357 = arith.constant dense<0.000000e+00> : vector<32x256xf32>
    %529 = tpu.matmul %528, %526, %cst_357 {dimension_numbers = #tpu.dot_dimension_numbers<[1], [0], [0], [1], [0, 0, 1, 1], [], []>} : vector<32x16xbf16>, vector<16x256xbf16>, vector<32x256xf32> -> vector<32x256xf32>
    %530 = arith.addf %519, %529 : vector<32x256xf32>
    %531 = vector.extract_strided_slice %470 {offsets = [0, 15], sizes = [16, 241], strides = [1, 1]} : vector<16x256xbf16> to vector<16x241xbf16>
    %532 = vector.extract_strided_slice %470 {offsets = [0, 0], sizes = [16, 15], strides = [1, 1]} : vector<16x256xbf16> to vector<16x15xbf16>
    %533 = tpu.concatenate %531, %532 in 1 : vector<16x241xbf16>, vector<16x15xbf16> -> vector<16x256xbf16>
    %c6_358 = arith.constant 6 : index
    %c0_359 = arith.constant 0 : index
    %c0_360 = arith.constant 0 : index
    %534 = vector.load %arg2[%c6_358, %c0_359, %c0_360] : memref<9x1x256xbf16, #tpu.memory_space<vmem>>, vector<1x1x256xbf16>
    %535 = vector.shape_cast %534 : vector<1x1x256xbf16> to vector<1x256xbf16>
    %536 = vector.broadcast %535 : vector<1x256xbf16> to vector<16x256xbf16>
    %537 = arith.mulf %533, %536 : vector<16x256xbf16>
    %c6_361 = arith.constant 6 : index
    %c0_362 = arith.constant 0 : index
    %c0_363 = arith.constant 0 : index
    %538 = vector.load %arg15[%c6_361, %c0_362, %c0_363] : memref<9x32x16xbf16, #tpu.memory_space<vmem>>, vector<1x32x16xbf16>
    %539 = vector.shape_cast %538 : vector<1x32x16xbf16> to vector<32x16xbf16>
    %cst_364 = arith.constant dense<0.000000e+00> : vector<32x256xf32>
    %540 = tpu.matmul %539, %537, %cst_364 {dimension_numbers = #tpu.dot_dimension_numbers<[1], [0], [0], [1], [0, 0, 1, 1], [], []>} : vector<32x16xbf16>, vector<16x256xbf16>, vector<32x256xf32> -> vector<32x256xf32>
    %541 = arith.addf %530, %540 : vector<32x256xf32>
    %542 = vector.extract_strided_slice %470 {offsets = [0, 16], sizes = [16, 240], strides = [1, 1]} : vector<16x256xbf16> to vector<16x240xbf16>
    %543 = vector.extract_strided_slice %470 {offsets = [0, 0], sizes = [16, 16], strides = [1, 1]} : vector<16x256xbf16> to vector<16x16xbf16>
    %544 = tpu.concatenate %542, %543 in 1 : vector<16x240xbf16>, vector<16x16xbf16> -> vector<16x256xbf16>
    %c7_365 = arith.constant 7 : index
    %c0_366 = arith.constant 0 : index
    %c0_367 = arith.constant 0 : index
    %545 = vector.load %arg2[%c7_365, %c0_366, %c0_367] : memref<9x1x256xbf16, #tpu.memory_space<vmem>>, vector<1x1x256xbf16>
    %546 = vector.shape_cast %545 : vector<1x1x256xbf16> to vector<1x256xbf16>
    %547 = vector.broadcast %546 : vector<1x256xbf16> to vector<16x256xbf16>
    %548 = arith.mulf %544, %547 : vector<16x256xbf16>
    %c7_368 = arith.constant 7 : index
    %c0_369 = arith.constant 0 : index
    %c0_370 = arith.constant 0 : index
    %549 = vector.load %arg15[%c7_368, %c0_369, %c0_370] : memref<9x32x16xbf16, #tpu.memory_space<vmem>>, vector<1x32x16xbf16>
    %550 = vector.shape_cast %549 : vector<1x32x16xbf16> to vector<32x16xbf16>
    %cst_371 = arith.constant dense<0.000000e+00> : vector<32x256xf32>
    %551 = tpu.matmul %550, %548, %cst_371 {dimension_numbers = #tpu.dot_dimension_numbers<[1], [0], [0], [1], [0, 0, 1, 1], [], []>} : vector<32x16xbf16>, vector<16x256xbf16>, vector<32x256xf32> -> vector<32x256xf32>
    %552 = arith.addf %541, %551 : vector<32x256xf32>
    %553 = vector.extract_strided_slice %470 {offsets = [0, 17], sizes = [16, 239], strides = [1, 1]} : vector<16x256xbf16> to vector<16x239xbf16>
    %554 = vector.extract_strided_slice %470 {offsets = [0, 0], sizes = [16, 17], strides = [1, 1]} : vector<16x256xbf16> to vector<16x17xbf16>
    %555 = tpu.concatenate %553, %554 in 1 : vector<16x239xbf16>, vector<16x17xbf16> -> vector<16x256xbf16>
    %c8_372 = arith.constant 8 : index
    %c0_373 = arith.constant 0 : index
    %c0_374 = arith.constant 0 : index
    %556 = vector.load %arg2[%c8_372, %c0_373, %c0_374] : memref<9x1x256xbf16, #tpu.memory_space<vmem>>, vector<1x1x256xbf16>
    %557 = vector.shape_cast %556 : vector<1x1x256xbf16> to vector<1x256xbf16>
    %558 = vector.broadcast %557 : vector<1x256xbf16> to vector<16x256xbf16>
    %559 = arith.mulf %555, %558 : vector<16x256xbf16>
    %c8_375 = arith.constant 8 : index
    %c0_376 = arith.constant 0 : index
    %c0_377 = arith.constant 0 : index
    %560 = vector.load %arg15[%c8_375, %c0_376, %c0_377] : memref<9x32x16xbf16, #tpu.memory_space<vmem>>, vector<1x32x16xbf16>
    %561 = vector.shape_cast %560 : vector<1x32x16xbf16> to vector<32x16xbf16>
    %cst_378 = arith.constant dense<0.000000e+00> : vector<32x256xf32>
    %562 = tpu.matmul %561, %559, %cst_378 {dimension_numbers = #tpu.dot_dimension_numbers<[1], [0], [0], [1], [0, 0, 1, 1], [], []>} : vector<32x16xbf16>, vector<16x256xbf16>, vector<32x256xf32> -> vector<32x256xf32>
    %563 = arith.addf %552, %562 : vector<32x256xf32>
    %c0_379 = arith.constant 0 : index
    %c0_380 = arith.constant 0 : index
    %564 = vector.load %arg16[%c0_379, %c0_380] : memref<32x1xf32, #tpu.memory_space<vmem>>, vector<32x1xf32>
    %565 = vector.broadcast %564 : vector<32x1xf32> to vector<32x256xf32>
    %566 = arith.addf %563, %565 : vector<32x256xf32>
    %cst_381 = arith.constant 0.000000e+00 : f32
    %567 = vector.broadcast %cst_381 : f32 to vector<32x256xf32>
    %568 = arith.maximumf %566, %567 : vector<32x256xf32>
    %569 = arith.truncf %568 : vector<32x256xf32> to vector<32x256xbf16>
    %cst_382 = arith.constant 0.000000e+00 : f32
    %570 = vector.broadcast %cst_382 : f32 to vector<4x256xf32>
    %571 = vector.extract_strided_slice %569 {offsets = [0, 239], sizes = [32, 17], strides = [1, 1]} : vector<32x256xbf16> to vector<32x17xbf16>
    %572 = vector.extract_strided_slice %569 {offsets = [0, 0], sizes = [32, 239], strides = [1, 1]} : vector<32x256xbf16> to vector<32x239xbf16>
    %573 = tpu.concatenate %571, %572 in 1 : vector<32x17xbf16>, vector<32x239xbf16> -> vector<32x256xbf16>
    %c0_383 = arith.constant 0 : index
    %c0_384 = arith.constant 0 : index
    %c0_385 = arith.constant 0 : index
    %574 = vector.load %arg2[%c0_383, %c0_384, %c0_385] : memref<9x1x256xbf16, #tpu.memory_space<vmem>>, vector<1x1x256xbf16>
    %575 = vector.shape_cast %574 : vector<1x1x256xbf16> to vector<1x256xbf16>
    %576 = vector.broadcast %575 : vector<1x256xbf16> to vector<32x256xbf16>
    %577 = arith.mulf %573, %576 : vector<32x256xbf16>
    %c0_386 = arith.constant 0 : index
    %c0_387 = arith.constant 0 : index
    %c0_388 = arith.constant 0 : index
    %578 = vector.load %arg17[%c0_386, %c0_387, %c0_388] : memref<9x4x32xbf16, #tpu.memory_space<vmem>>, vector<1x4x32xbf16>
    %579 = vector.shape_cast %578 : vector<1x4x32xbf16> to vector<4x32xbf16>
    %cst_389 = arith.constant dense<0.000000e+00> : vector<4x256xf32>
    %580 = tpu.matmul %579, %577, %cst_389 {dimension_numbers = #tpu.dot_dimension_numbers<[1], [0], [0], [1], [0, 0, 1, 1], [], []>} : vector<4x32xbf16>, vector<32x256xbf16>, vector<4x256xf32> -> vector<4x256xf32>
    %581 = arith.addf %570, %580 : vector<4x256xf32>
    %582 = vector.extract_strided_slice %569 {offsets = [0, 240], sizes = [32, 16], strides = [1, 1]} : vector<32x256xbf16> to vector<32x16xbf16>
    %583 = vector.extract_strided_slice %569 {offsets = [0, 0], sizes = [32, 240], strides = [1, 1]} : vector<32x256xbf16> to vector<32x240xbf16>
    %584 = tpu.concatenate %582, %583 in 1 : vector<32x16xbf16>, vector<32x240xbf16> -> vector<32x256xbf16>
    %c1_390 = arith.constant 1 : index
    %c0_391 = arith.constant 0 : index
    %c0_392 = arith.constant 0 : index
    %585 = vector.load %arg2[%c1_390, %c0_391, %c0_392] : memref<9x1x256xbf16, #tpu.memory_space<vmem>>, vector<1x1x256xbf16>
    %586 = vector.shape_cast %585 : vector<1x1x256xbf16> to vector<1x256xbf16>
    %587 = vector.broadcast %586 : vector<1x256xbf16> to vector<32x256xbf16>
    %588 = arith.mulf %584, %587 : vector<32x256xbf16>
    %c1_393 = arith.constant 1 : index
    %c0_394 = arith.constant 0 : index
    %c0_395 = arith.constant 0 : index
    %589 = vector.load %arg17[%c1_393, %c0_394, %c0_395] : memref<9x4x32xbf16, #tpu.memory_space<vmem>>, vector<1x4x32xbf16>
    %590 = vector.shape_cast %589 : vector<1x4x32xbf16> to vector<4x32xbf16>
    %cst_396 = arith.constant dense<0.000000e+00> : vector<4x256xf32>
    %591 = tpu.matmul %590, %588, %cst_396 {dimension_numbers = #tpu.dot_dimension_numbers<[1], [0], [0], [1], [0, 0, 1, 1], [], []>} : vector<4x32xbf16>, vector<32x256xbf16>, vector<4x256xf32> -> vector<4x256xf32>
    %592 = arith.addf %581, %591 : vector<4x256xf32>
    %593 = vector.extract_strided_slice %569 {offsets = [0, 241], sizes = [32, 15], strides = [1, 1]} : vector<32x256xbf16> to vector<32x15xbf16>
    %594 = vector.extract_strided_slice %569 {offsets = [0, 0], sizes = [32, 241], strides = [1, 1]} : vector<32x256xbf16> to vector<32x241xbf16>
    %595 = tpu.concatenate %593, %594 in 1 : vector<32x15xbf16>, vector<32x241xbf16> -> vector<32x256xbf16>
    %c2_397 = arith.constant 2 : index
    %c0_398 = arith.constant 0 : index
    %c0_399 = arith.constant 0 : index
    %596 = vector.load %arg2[%c2_397, %c0_398, %c0_399] : memref<9x1x256xbf16, #tpu.memory_space<vmem>>, vector<1x1x256xbf16>
    %597 = vector.shape_cast %596 : vector<1x1x256xbf16> to vector<1x256xbf16>
    %598 = vector.broadcast %597 : vector<1x256xbf16> to vector<32x256xbf16>
    %599 = arith.mulf %595, %598 : vector<32x256xbf16>
    %c2_400 = arith.constant 2 : index
    %c0_401 = arith.constant 0 : index
    %c0_402 = arith.constant 0 : index
    %600 = vector.load %arg17[%c2_400, %c0_401, %c0_402] : memref<9x4x32xbf16, #tpu.memory_space<vmem>>, vector<1x4x32xbf16>
    %601 = vector.shape_cast %600 : vector<1x4x32xbf16> to vector<4x32xbf16>
    %cst_403 = arith.constant dense<0.000000e+00> : vector<4x256xf32>
    %602 = tpu.matmul %601, %599, %cst_403 {dimension_numbers = #tpu.dot_dimension_numbers<[1], [0], [0], [1], [0, 0, 1, 1], [], []>} : vector<4x32xbf16>, vector<32x256xbf16>, vector<4x256xf32> -> vector<4x256xf32>
    %603 = arith.addf %592, %602 : vector<4x256xf32>
    %604 = vector.extract_strided_slice %569 {offsets = [0, 255], sizes = [32, 1], strides = [1, 1]} : vector<32x256xbf16> to vector<32x1xbf16>
    %605 = vector.extract_strided_slice %569 {offsets = [0, 0], sizes = [32, 255], strides = [1, 1]} : vector<32x256xbf16> to vector<32x255xbf16>
    %606 = tpu.concatenate %604, %605 in 1 : vector<32x1xbf16>, vector<32x255xbf16> -> vector<32x256xbf16>
    %c3_404 = arith.constant 3 : index
    %c0_405 = arith.constant 0 : index
    %c0_406 = arith.constant 0 : index
    %607 = vector.load %arg2[%c3_404, %c0_405, %c0_406] : memref<9x1x256xbf16, #tpu.memory_space<vmem>>, vector<1x1x256xbf16>
    %608 = vector.shape_cast %607 : vector<1x1x256xbf16> to vector<1x256xbf16>
    %609 = vector.broadcast %608 : vector<1x256xbf16> to vector<32x256xbf16>
    %610 = arith.mulf %606, %609 : vector<32x256xbf16>
    %c3_407 = arith.constant 3 : index
    %c0_408 = arith.constant 0 : index
    %c0_409 = arith.constant 0 : index
    %611 = vector.load %arg17[%c3_407, %c0_408, %c0_409] : memref<9x4x32xbf16, #tpu.memory_space<vmem>>, vector<1x4x32xbf16>
    %612 = vector.shape_cast %611 : vector<1x4x32xbf16> to vector<4x32xbf16>
    %cst_410 = arith.constant dense<0.000000e+00> : vector<4x256xf32>
    %613 = tpu.matmul %612, %610, %cst_410 {dimension_numbers = #tpu.dot_dimension_numbers<[1], [0], [0], [1], [0, 0, 1, 1], [], []>} : vector<4x32xbf16>, vector<32x256xbf16>, vector<4x256xf32> -> vector<4x256xf32>
    %614 = arith.addf %603, %613 : vector<4x256xf32>
    %c4_411 = arith.constant 4 : index
    %c0_412 = arith.constant 0 : index
    %c0_413 = arith.constant 0 : index
    %615 = vector.load %arg17[%c4_411, %c0_412, %c0_413] : memref<9x4x32xbf16, #tpu.memory_space<vmem>>, vector<1x4x32xbf16>
    %616 = vector.shape_cast %615 : vector<1x4x32xbf16> to vector<4x32xbf16>
    %cst_414 = arith.constant dense<0.000000e+00> : vector<4x256xf32>
    %617 = tpu.matmul %616, %569, %cst_414 {dimension_numbers = #tpu.dot_dimension_numbers<[1], [0], [0], [1], [0, 0, 1, 1], [], []>} : vector<4x32xbf16>, vector<32x256xbf16>, vector<4x256xf32> -> vector<4x256xf32>
    %618 = arith.addf %614, %617 : vector<4x256xf32>
    %619 = vector.extract_strided_slice %569 {offsets = [0, 1], sizes = [32, 255], strides = [1, 1]} : vector<32x256xbf16> to vector<32x255xbf16>
    %620 = vector.extract_strided_slice %569 {offsets = [0, 0], sizes = [32, 1], strides = [1, 1]} : vector<32x256xbf16> to vector<32x1xbf16>
    %621 = tpu.concatenate %619, %620 in 1 : vector<32x255xbf16>, vector<32x1xbf16> -> vector<32x256xbf16>
    %c5_415 = arith.constant 5 : index
    %c0_416 = arith.constant 0 : index
    %c0_417 = arith.constant 0 : index
    %622 = vector.load %arg2[%c5_415, %c0_416, %c0_417] : memref<9x1x256xbf16, #tpu.memory_space<vmem>>, vector<1x1x256xbf16>
    %623 = vector.shape_cast %622 : vector<1x1x256xbf16> to vector<1x256xbf16>
    %624 = vector.broadcast %623 : vector<1x256xbf16> to vector<32x256xbf16>
    %625 = arith.mulf %621, %624 : vector<32x256xbf16>
    %c5_418 = arith.constant 5 : index
    %c0_419 = arith.constant 0 : index
    %c0_420 = arith.constant 0 : index
    %626 = vector.load %arg17[%c5_418, %c0_419, %c0_420] : memref<9x4x32xbf16, #tpu.memory_space<vmem>>, vector<1x4x32xbf16>
    %627 = vector.shape_cast %626 : vector<1x4x32xbf16> to vector<4x32xbf16>
    %cst_421 = arith.constant dense<0.000000e+00> : vector<4x256xf32>
    %628 = tpu.matmul %627, %625, %cst_421 {dimension_numbers = #tpu.dot_dimension_numbers<[1], [0], [0], [1], [0, 0, 1, 1], [], []>} : vector<4x32xbf16>, vector<32x256xbf16>, vector<4x256xf32> -> vector<4x256xf32>
    %629 = arith.addf %618, %628 : vector<4x256xf32>
    %630 = vector.extract_strided_slice %569 {offsets = [0, 15], sizes = [32, 241], strides = [1, 1]} : vector<32x256xbf16> to vector<32x241xbf16>
    %631 = vector.extract_strided_slice %569 {offsets = [0, 0], sizes = [32, 15], strides = [1, 1]} : vector<32x256xbf16> to vector<32x15xbf16>
    %632 = tpu.concatenate %630, %631 in 1 : vector<32x241xbf16>, vector<32x15xbf16> -> vector<32x256xbf16>
    %c6_422 = arith.constant 6 : index
    %c0_423 = arith.constant 0 : index
    %c0_424 = arith.constant 0 : index
    %633 = vector.load %arg2[%c6_422, %c0_423, %c0_424] : memref<9x1x256xbf16, #tpu.memory_space<vmem>>, vector<1x1x256xbf16>
    %634 = vector.shape_cast %633 : vector<1x1x256xbf16> to vector<1x256xbf16>
    %635 = vector.broadcast %634 : vector<1x256xbf16> to vector<32x256xbf16>
    %636 = arith.mulf %632, %635 : vector<32x256xbf16>
    %c6_425 = arith.constant 6 : index
    %c0_426 = arith.constant 0 : index
    %c0_427 = arith.constant 0 : index
    %637 = vector.load %arg17[%c6_425, %c0_426, %c0_427] : memref<9x4x32xbf16, #tpu.memory_space<vmem>>, vector<1x4x32xbf16>
    %638 = vector.shape_cast %637 : vector<1x4x32xbf16> to vector<4x32xbf16>
    %cst_428 = arith.constant dense<0.000000e+00> : vector<4x256xf32>
    %639 = tpu.matmul %638, %636, %cst_428 {dimension_numbers = #tpu.dot_dimension_numbers<[1], [0], [0], [1], [0, 0, 1, 1], [], []>} : vector<4x32xbf16>, vector<32x256xbf16>, vector<4x256xf32> -> vector<4x256xf32>
    %640 = arith.addf %629, %639 : vector<4x256xf32>
    %641 = vector.extract_strided_slice %569 {offsets = [0, 16], sizes = [32, 240], strides = [1, 1]} : vector<32x256xbf16> to vector<32x240xbf16>
    %642 = vector.extract_strided_slice %569 {offsets = [0, 0], sizes = [32, 16], strides = [1, 1]} : vector<32x256xbf16> to vector<32x16xbf16>
    %643 = tpu.concatenate %641, %642 in 1 : vector<32x240xbf16>, vector<32x16xbf16> -> vector<32x256xbf16>
    %c7_429 = arith.constant 7 : index
    %c0_430 = arith.constant 0 : index
    %c0_431 = arith.constant 0 : index
    %644 = vector.load %arg2[%c7_429, %c0_430, %c0_431] : memref<9x1x256xbf16, #tpu.memory_space<vmem>>, vector<1x1x256xbf16>
    %645 = vector.shape_cast %644 : vector<1x1x256xbf16> to vector<1x256xbf16>
    %646 = vector.broadcast %645 : vector<1x256xbf16> to vector<32x256xbf16>
    %647 = arith.mulf %643, %646 : vector<32x256xbf16>
    %c7_432 = arith.constant 7 : index
    %c0_433 = arith.constant 0 : index
    %c0_434 = arith.constant 0 : index
    %648 = vector.load %arg17[%c7_432, %c0_433, %c0_434] : memref<9x4x32xbf16, #tpu.memory_space<vmem>>, vector<1x4x32xbf16>
    %649 = vector.shape_cast %648 : vector<1x4x32xbf16> to vector<4x32xbf16>
    %cst_435 = arith.constant dense<0.000000e+00> : vector<4x256xf32>
    %650 = tpu.matmul %649, %647, %cst_435 {dimension_numbers = #tpu.dot_dimension_numbers<[1], [0], [0], [1], [0, 0, 1, 1], [], []>} : vector<4x32xbf16>, vector<32x256xbf16>, vector<4x256xf32> -> vector<4x256xf32>
    %651 = arith.addf %640, %650 : vector<4x256xf32>
    %652 = vector.extract_strided_slice %569 {offsets = [0, 17], sizes = [32, 239], strides = [1, 1]} : vector<32x256xbf16> to vector<32x239xbf16>
    %653 = vector.extract_strided_slice %569 {offsets = [0, 0], sizes = [32, 17], strides = [1, 1]} : vector<32x256xbf16> to vector<32x17xbf16>
    %654 = tpu.concatenate %652, %653 in 1 : vector<32x239xbf16>, vector<32x17xbf16> -> vector<32x256xbf16>
    %c8_436 = arith.constant 8 : index
    %c0_437 = arith.constant 0 : index
    %c0_438 = arith.constant 0 : index
    %655 = vector.load %arg2[%c8_436, %c0_437, %c0_438] : memref<9x1x256xbf16, #tpu.memory_space<vmem>>, vector<1x1x256xbf16>
    %656 = vector.shape_cast %655 : vector<1x1x256xbf16> to vector<1x256xbf16>
    %657 = vector.broadcast %656 : vector<1x256xbf16> to vector<32x256xbf16>
    %658 = arith.mulf %654, %657 : vector<32x256xbf16>
    %c8_439 = arith.constant 8 : index
    %c0_440 = arith.constant 0 : index
    %c0_441 = arith.constant 0 : index
    %659 = vector.load %arg17[%c8_439, %c0_440, %c0_441] : memref<9x4x32xbf16, #tpu.memory_space<vmem>>, vector<1x4x32xbf16>
    %660 = vector.shape_cast %659 : vector<1x4x32xbf16> to vector<4x32xbf16>
    %cst_442 = arith.constant dense<0.000000e+00> : vector<4x256xf32>
    %661 = tpu.matmul %660, %658, %cst_442 {dimension_numbers = #tpu.dot_dimension_numbers<[1], [0], [0], [1], [0, 0, 1, 1], [], []>} : vector<4x32xbf16>, vector<32x256xbf16>, vector<4x256xf32> -> vector<4x256xf32>
    %662 = arith.addf %651, %661 : vector<4x256xf32>
    %c0_443 = arith.constant 0 : index
    %c0_444 = arith.constant 0 : index
    %663 = vector.load %arg18[%c0_443, %c0_444] : memref<4x1xf32, #tpu.memory_space<vmem>>, vector<4x1xf32>
    %664 = vector.broadcast %663 : vector<4x1xf32> to vector<4x256xf32>
    %665 = arith.addf %662, %664 : vector<4x256xf32>
    %666 = arith.negf %665 : vector<4x256xf32>
    %667 = math.exp %666 : vector<4x256xf32>
    %cst_445 = arith.constant 1.000000e+00 : f32
    %668 = vector.broadcast %cst_445 : f32 to vector<4x256xf32>
    %669 = arith.addf %668, %667 : vector<4x256xf32>
    %670 = arith.divf %668, %669 : vector<4x256xf32>
    %671 = vector.shape_cast %670 : vector<4x256xf32> to vector<1x4x256xf32>
    %c0_446 = arith.constant 0 : index
    %c0_447 = arith.constant 0 : index
    %c0_448 = arith.constant 0 : index
    %672 = vector.load %arg19[%c0_446, %c0_447, %c0_448] : memref<1x4x256xf32, #tpu.memory_space<vmem>>, vector<1x4x256xf32>
    tpu.vector_store %arg19[%c0_446, %c0_447, %c0_448], %671 {strides = array<i32>} : memref<1x4x256xf32, #tpu.memory_space<vmem>>, vector<1x4x256xf32>,
    return
  }
  func.func @transform_0(%arg0: i32) -> (i32, i32, i32) {
    %c0_i32 = arith.constant 0 : i32
    %c0_i32_0 = arith.constant 0 : i32
    %c0_i32_1 = arith.constant 0 : i32
    return %arg0, %c0_i32, %c0_i32_0 : i32, i32, i32
  }
  func.func @transform_1(%arg0: i32) -> (i32, i32, i32) {
    %c0_i32 = arith.constant 0 : i32
    %c0_i32_0 = arith.constant 0 : i32
    %c0_i32_1 = arith.constant 0 : i32
    %c0_i32_2 = arith.constant 0 : i32
    return %c0_i32, %c0_i32_0, %c0_i32_1 : i32, i32, i32
  }
  func.func @transform_2(%arg0: i32) -> (i32, i32, i32) {
    %c0_i32 = arith.constant 0 : i32
    %c0_i32_0 = arith.constant 0 : i32
    %c0_i32_1 = arith.constant 0 : i32
    %c0_i32_2 = arith.constant 0 : i32
    return %c0_i32, %c0_i32_0, %c0_i32_1 : i32, i32, i32
  }
  func.func @transform_3(%arg0: i32) -> (i32, i32) {
    %c0_i32 = arith.constant 0 : i32
    %c0_i32_0 = arith.constant 0 : i32
    %c0_i32_1 = arith.constant 0 : i32
    return %c0_i32, %c0_i32_0 : i32, i32
  }
  func.func @transform_4(%arg0: i32) -> (i32, i32, i32) {
    %c0_i32 = arith.constant 0 : i32
    %c0_i32_0 = arith.constant 0 : i32
    %c0_i32_1 = arith.constant 0 : i32
    %c0_i32_2 = arith.constant 0 : i32
    return %c0_i32, %c0_i32_0, %c0_i32_1 : i32, i32, i32
  }
  func.func @transform_5(%arg0: i32) -> (i32, i32) {
    %c0_i32 = arith.constant 0 : i32
    %c0_i32_0 = arith.constant 0 : i32
    %c0_i32_1 = arith.constant 0 : i32
    return %c0_i32, %c0_i32_0 : i32, i32
  }
  func.func @transform_6(%arg0: i32) -> (i32, i32, i32) {
    %c0_i32 = arith.constant 0 : i32
    %c0_i32_0 = arith.constant 0 : i32
    %c0_i32_1 = arith.constant 0 : i32
    %c0_i32_2 = arith.constant 0 : i32
    return %c0_i32, %c0_i32_0, %c0_i32_1 : i32, i32, i32
  }
  func.func @transform_7(%arg0: i32) -> (i32, i32) {
    %c0_i32 = arith.constant 0 : i32
    %c0_i32_0 = arith.constant 0 : i32
    %c0_i32_1 = arith.constant 0 : i32
    return %c0_i32, %c0_i32_0 : i32, i32
  }
  func.func @transform_8(%arg0: i32) -> (i32, i32, i32) {
    %c0_i32 = arith.constant 0 : i32
    %c0_i32_0 = arith.constant 0 : i32
    %c0_i32_1 = arith.constant 0 : i32
    %c0_i32_2 = arith.constant 0 : i32
    return %c0_i32, %c0_i32_0, %c0_i32_1 : i32, i32, i32
  }
  func.func @transform_9(%arg0: i32) -> (i32, i32) {
    %c0_i32 = arith.constant 0 : i32
    %c0_i32_0 = arith.constant 0 : i32
    %c0_i32_1 = arith.constant 0 : i32
    return %c0_i32, %c0_i32_0 : i32, i32
  }
  func.func @transform_10(%arg0: i32) -> (i32, i32, i32) {
    %c0_i32 = arith.constant 0 : i32
    %c0_i32_0 = arith.constant 0 : i32
    %c0_i32_1 = arith.constant 0 : i32
    %c0_i32_2 = arith.constant 0 : i32
    return %c0_i32, %c0_i32_0, %c0_i32_1 : i32, i32, i32
  }
  func.func @transform_11(%arg0: i32) -> (i32, i32) {
    %c0_i32 = arith.constant 0 : i32
    %c0_i32_0 = arith.constant 0 : i32
    %c0_i32_1 = arith.constant 0 : i32
    return %c0_i32, %c0_i32_0 : i32, i32
  }
  func.func @transform_12(%arg0: i32) -> (i32, i32, i32) {
    %c0_i32 = arith.constant 0 : i32
    %c0_i32_0 = arith.constant 0 : i32
    %c0_i32_1 = arith.constant 0 : i32
    %c0_i32_2 = arith.constant 0 : i32
    return %c0_i32, %c0_i32_0, %c0_i32_1 : i32, i32, i32
  }
  func.func @transform_13(%arg0: i32) -> (i32, i32) {
    %c0_i32 = arith.constant 0 : i32
    %c0_i32_0 = arith.constant 0 : i32
    %c0_i32_1 = arith.constant 0 : i32
    return %c0_i32, %c0_i32_0 : i32, i32
  }
  func.func @transform_14(%arg0: i32) -> (i32, i32, i32) {
    %c0_i32 = arith.constant 0 : i32
    %c0_i32_0 = arith.constant 0 : i32
    %c0_i32_1 = arith.constant 0 : i32
    %c0_i32_2 = arith.constant 0 : i32
    return %c0_i32, %c0_i32_0, %c0_i32_1 : i32, i32, i32
  }
  func.func @transform_15(%arg0: i32) -> (i32, i32) {
    %c0_i32 = arith.constant 0 : i32
    %c0_i32_0 = arith.constant 0 : i32
    %c0_i32_1 = arith.constant 0 : i32
    return %c0_i32, %c0_i32_0 : i32, i32
  }
  func.func @transform_16(%arg0: i32) -> (i32, i32, i32) {
    %c0_i32 = arith.constant 0 : i32
    %c0_i32_0 = arith.constant 0 : i32
    %c0_i32_1 = arith.constant 0 : i32
    %c0_i32_2 = arith.constant 0 : i32
    return %c0_i32, %c0_i32_0, %c0_i32_1 : i32, i32, i32
  }
  func.func @transform_17(%arg0: i32) -> (i32, i32) {
    %c0_i32 = arith.constant 0 : i32
    %c0_i32_0 = arith.constant 0 : i32
    %c0_i32_1 = arith.constant 0 : i32
    return %c0_i32, %c0_i32_0 : i32, i32
  }
  func.func @transform_18(%arg0: i32) -> (i32, i32, i32) {
    %c0_i32 = arith.constant 0 : i32
    %c0_i32_0 = arith.constant 0 : i32
    %c0_i32_1 = arith.constant 0 : i32
    return %arg0, %c0_i32, %c0_i32_0 : i32, i32, i32
  }
}

</mosaic_0001>

<bundles_post_ra>
// kernel: conv_autoencoder_forward.1
= control target key start
LH: loop header
LB: loop body
LE: loop exit
PB: predicated region body
PF: predicated region fallthrough
CT: control target
= control target key end

     0   :  { %s10739_s0 = inlined_call_operand.vmem [shape: f32[2,4,256], index: 0, kind: input, shape index: {}]   ;;  %s10740_s1 = inlined_call_operand.vmem [shape: bf16[9,1,256], index: 1, kind: input, shape index: {}]   ;;  %s10741_s2 = inlined_call_operand.vmem [shape: bf16[9,32,4], index: 2, kind: input, shape index: {}]   ;;  %s10742_s3 = inlined_call_operand.vmem [shape: f32[32,1], index: 3, kind: input, shape index: {}]   ;;  %s10743_s4 = inlined_call_operand.vmem [shape: bf16[9,16,32], index: 4, kind: input, shape index: {}]   ;;  %s10744_s5 = inlined_call_operand.vmem [shape: f32[16,1], index: 5, kind: input, shape index: {}]   ;;  %s10745_s6 = inlined_call_operand.vmem [shape: bf16[9,8,16], index: 6, kind: input, shape index: {}]   ;;  %s10746_s7 = inlined_call_operand.vmem [shape: f32[8,1], index: 7, kind: input, shape index: {}]   ;;  %s10747_s8 = inlined_call_operand.hbm [shape: bf16[8,256,128], index: 8, kind: input, shape index: {}]   ;;  %s10748_s9 = inlined_call_operand.vmem [shape: f32[1,128], index: 9, kind: input, shape index: {}]   ;;  %s10749_s10 = inlined_call_operand.hbm [shape: bf16[8,128,256], index: 10, kind: input, shape index: {}]   ;;  %s10750_s11 = inlined_call_operand.vmem [shape: f32[8,256], index: 11, kind: input, shape index: {}]   ;;  %s10751_s12 = inlined_call_operand.vmem [shape: bf16[9,16,8], index: 12, kind: input, shape index: {}]   ;;  %s10752_s13 = inlined_call_operand.vmem [shape: f32[16,1], index: 13, kind: input, shape index: {}]   ;;  %s10753_s14 = inlined_call_operand.vmem [shape: bf16[9,32,16], index: 14, kind: input, shape index: {}]   ;;  %s10754_s15 = inlined_call_operand.vmem [shape: f32[32,1], index: 15, kind: input, shape index: {}]   ;;  %s10755_s16 = inlined_call_operand.vmem [shape: bf16[9,4,32], index: 16, kind: input, shape index: {}]   ;;  %s10756_s17 = inlined_call_operand.vmem [shape: f32[4,1], index: 17, kind: input, shape index: {}]   ;;  %s10757_s18 = inlined_call_operand.vmem [shape: f32[2,4,256], index: 18, kind: output, shape index: {}]  }
   0x1   :  { %10780 = sst [smem:[#allocation9_spill]] %s10739_s0 }
   0x2   :  { %10781 = sst [smem:[#allocation10_spill]] %s10740_s1 }
   0x3   :  { %10782 = sst [smem:[#allocation11_spill]] %s10741_s2 }
   0x4   :  { %10783 = sst [smem:[#allocation12_spill]] %s10757_s18 }
   0x5   :  { %23 = vsyncpa [#allocation3], 0 }
   0x6   :  { %24 = vsyncpa [#allocation5], 0  ;;  %s9499_s27 = smov 0  }
   0x7 LB: > { %10784 = sst [smem:[#allocation8_spill]] %s9386_s27  ;;  %s9388_s28 = smov [#allocation2]   ;;  %s9386_s27 = sphi %s9499_s27, %s30_s27  }
   0x8   : > { %s477_s29 = sshll.u32 %s9388_s28, 4  ;;  %s9505_s30 = sadd.s32 4294967295, %s9386_s27   ;;  %s478_s29 = int_to_ptr.vmem [resolvable:$true] %s477_s29 }
   0x9   : > { %p7974_p0 = scmp.ge.s32.totalorder %s9386_s27, 1  ;;  %p444_p1 = scmp.lt.s32.totalorder %s9386_s27, 3 }
   0xa   : > { %p10760_p3 = scmp.eq.s32.totalorder %s9505_s30, 0  ;;  %s9389_s19 = smov [#allocation4]  }
   0xb   : > { %p9509_p2 = pnand %p7974_p0, %p444_p1  ;;  %s493_s1 = sshll.u32 %s9389_s19, 4  ;;  %s9522_s1 = int_to_ptr.vmem [resolvable:$true] %s493_s1 }
   0xc   : > { %s9316_s2 = scalar_lea.hbm %s10747_s8, 16384 }
   0xd   : > { %s10785_s0 = scalar_select %p9509_p2, 1, 0 }
   0xe   : > { %p8896_p4 = pneg %p9509_p2  ;;  %p9317_p6 = scmp.ne.s32.totalorder %s10747_s8, %s9316_s2 }
   0xf   : > { %p9323_p10 = scmp.lt.u32.totalorder %s9316_s2, %s10747_s8 }
  0x10   : > { %p9518_p5 = pnand %p10760_p3, %p8896_p4 }
  0x12   : > { %p9318_p7 = pneg %p9518_p5 }
  0x14   : > { %p9319_p8 = pnand %p9318_p7, %p9317_p6 }
  0x16   : > { %p9320_p9 = pneg %p9319_p8 }
  0x18   : > { %p9325_p11 = pnand %p9323_p10, %p9320_p9 }
  0x1a   : > { %9328 = shalt.err (!%p9325_p11)
}
  0x1b   : > { %s9329_s28 = scalar_lea.vmem %s478_s29, 16384  ;;  %p9337_p1 = scmp.lt.s32.totalorder %s478_s29, %s478_s29 }
  0x1c   : > { %p9330_p12 = scmp.ne.s32.totalorder %s478_s29, %s9329_s28  ;;  %p9338_p4 = scmp.lt.s32.totalorder %s9329_s28, %s9329_s28 }
  0x1e   : > { %p9332_p13 = pnand %p9330_p12, %p9318_p7  ;;  %p9339_p3 = por %p9338_p4, %p9337_p1 }
  0x20   : > { %p9333_p0 = pneg %p9332_p13 }
  0x22   : > { %p9340_p2 = pnand %p9339_p3, %p9333_p0 }
  0x24   : > { %9343 = shalt.err (!%p9340_p2)
}
  0x25   : > { %s9390_s19 = smov 64   ;;  %s9391_s21 = smov 4  }
  0x26   : > { %8899 = dma.hbm_to_vmem [thread:$0]  (!%p9518_p5), %s10747_s8, 16384, %s478_s29, [#allocation3], %s9390_s19, %s9390_s19, %s9391_s21  }
  0x27   : > { %s9344_s25 = scalar_lea.hbm %s10749_s10, 16384 }
  0x28   : > { %p9345_p6 = scmp.ne.s32.totalorder %s10749_s10, %s9344_s25  ;;  %p9351_p8 = scmp.lt.u32.totalorder %s9344_s25, %s10749_s10 }
  0x2a   : > { %p9347_p2 = pnand %p9345_p6, %p9318_p7 }
  0x2c   : > { %p9348_p3 = pneg %p9347_p2 }
  0x2e   : > { %p9353_p9 = pnand %p9351_p8, %p9348_p3 }
  0x30   : > { %9356 = shalt.err (!%p9353_p9)
}
  0x31   : > { %s9357_s29 = scalar_lea.vmem %s9522_s1, 16384  ;;  %p9365_p13 = scmp.lt.s32.totalorder %s9522_s1, %s9522_s1 }
  0x32   : > { %p9358_p10 = scmp.ne.s32.totalorder %s9522_s1, %s9357_s29  ;;  %p9366_p0 = scmp.lt.s32.totalorder %s9357_s29, %s9357_s29 }
  0x34   : > { %p9360_p11 = pnand %p9358_p10, %p9318_p7  ;;  %p9367_p1 = por %p9366_p0, %p9365_p13 }
  0x36   : > { %p9361_p12 = pneg %p9360_p11 }
  0x38   : > { %p9368_p4 = pnand %p9367_p1, %p9361_p12 }
  0x3a   : > { %9371 = shalt.err (!%p9368_p4)
}
  0x3b   : > { %s9392_s18 = smov 128   ;;  %s9393_s27 = smov 8  }
  0x3c   : > { %8902 = dma.hbm_to_vmem [thread:$0]  (!%p9518_p5), %s10749_s10, 16384, %s9522_s1, [#allocation5], %s9392_s18, %s9392_s18, %s9393_s27  }
  0x3d   : > { %p10787_p6 = scmp.ne.s32.totalorder %s10785_s0, 0 }
  0x3e   : > { %p10788_p7 = scmp.eq.s32.totalorder (!%p10787_p6), %s9505_s30, 0 }
  0x3f   : > { %538 = sbr.rel (%p10787_p6) target bundleno = 3395 (0xd43), region = 92 }
  0x46   : > { %9377 = dma.done.wait (%p10788_p7), [#allocation3], 16384   ;;  %p10789_p2 = pmov %p10788_p7 }
  0x48   : > { %9379 = vsyncadd (%p10789_p2), [#allocation3], 4294950912  ;;  %p10790_p3 = pmov %p10789_p2 }
  0x49   : > { %p10791_p8 = pmov %p10789_p2 }
  0x4a   : > { %9381 = dma.done.wait (%p10790_p3), [#allocation5], 16384  }
  0x4b   : > { %9383 = vsyncadd (%p10791_p8), [#allocation5], 4294950912  ;;  %p596_p9 = scmp.lt.s32.totalorder %s9505_s30, 1  ;;  %s10792_s22 = sld [smem:[#allocation9_spill]]  ;;  %v9394_v3 = vmov 0   ;;  %v640_v5 = vlaneseq  ;;  %vm619_vm0 = vcmask 138240  }
  0x4c   : > { %785 = vmatprep.mubr.bf16.mxu0 %v9394_v3  ;;  %8931 = vset.pattern.permute.xlu0 %v9394_v3  ;;  %s10778_s23 = smov 16   ;;  %s10776_s24 = smov 17   ;;  %v9403_v7 = vmov 1966171168   ;;  %vm675_vm1 = vcmask 130048   ;;  %vm746_vm2 = vcmask 1041408  }
  0x4d   : > { %s10807_s30 = smov (!%p596_p9, %s9505_s30), 1  ;;  %8932 = vset.pattern.permute.xlu1 %v9394_v3  ;;  %1957 = vmatprep.mubr.bf16.mxu1 %v9394_v3  ;;  %s10774_s25 = smov 15   ;;  %v641_v6 = vshrl.u32 %v640_v5, 7  ;;  %v638_v8 = vunpack.c.l.s4 %v9403_v7  ;;  %vm885_vm3 = vcmask 121856   ;;  %vm739_vm4 = vcmask 31744   ;;  %v1815_v63 = vld [vmem:[%s10742_s3] sm:$0xff] }
  0x4e   : > { %s10763_s0 = sshll.u32 %s10807_s30, 3  ;;  %s10772_s26 = smov 1   ;;  %vm1026_vm5 = vcmask 7168   ;;  %v1818_v5 = vld [vmem:[%s10742_s3 + $0x18] sm:$0xff]  ;;  %vm1255_vm6 = vcmask 1039360   ;;  %vm1396_vm7 = vcmask 924672  }
  0x4f   : > { %s10770_s28 = smov 127   ;;  %s10768_s29 = smov 113   ;;  %v639_v11 = vunpack.c.0.s8 %v638_v8  ;;  %v9647_v22 = vsub.s32 0, %v641_v6  ;;  %vm1537_vm8 = vcmask 916480   ;;  %vm1678_vm9 = vcmask 908288  }
  0x50   : > { %s10766_s18 = smov 112   ;;  %s10764_s27 = smov 111   ;;  %vm1921_vm10 = vcmask 261120   ;;  %vm5668_vm11 = vcmask 1040384   ;;  %vm5673_vm12 = vcmask 1042432   ;;  %vm5676_vm13 = vcmask 1043456  }
  0x51   : > { %s600_s2 = scalar_lea.vmem %s10792_s22, %s10763_s0  ;;  %s10793_s1 = sld [smem:[#allocation10_spill]]  ;;  %v9640_v14 = vsub.s32 %v639_v11, %v641_v6  ;;  %vm5679_vm14 = vcmask 1044480   ;;  %vm5682_vm15 = vcmask 1045504  }
  0x52   : > { %v607_v0 = vld [vmem:[%s600_s2] sm:$0xff]  ;;  %s10794_s22 = sld [smem:[#allocation11_spill]]  ;;  %s10795_s2 = smov 1  }
  0x53   : > { %v609_v1 = vcombine.high %v607_v0, %v607_v0  ;;  %v9601_v4 = vpack.c.bf16 %v607_v0, %v607_v0  ;;  %v1816_v0 = vld [vmem:[%s10742_s3 + $0x8] sm:$0xff]  ;;  %s10796_s0 = smov 127   ;;  %s10801_s19 = smov 17  }
  0x54   : > { %s10802_s21 = smov 15  }
  0x55   : > { %v9591_v2 = vpack.c.bf16 %v609_v1, %v609_v1  ;;  %v1817_v1 = vld [vmem:[%s10742_s3 + $0x10] sm:$0xff] }
  0x57   : > { %671 = vrot.lane.b32.xlu0 %v9591_v2, %s10778_s23  ;;  %614 = vrot.lane.b32.xlu1 %v9591_v2, %s10776_s24  ;;  %v7985_v9 = vld.sshfl [vmem:[%s10793_s1] sm:$0x11 pattern:$0x75316420] }
  0x58   : > { %v7987_v10 = vld.sshfl [vmem:[%s10793_s1 + $0x2] sm:$0x11 pattern:$0x75316420]  ;;  %v636_v13 = vcombine.high %v7985_v9, %v7985_v9  ;;  %v643_v17 = vrot.slane %v7985_v9, %v9640_v14  ;;  %v8934_v46 = vld [vmem:[%s10794_s22 + $0x10] sm:$0xff]   ;;  %v8935_v55 = vld [vmem:[%s10794_s22 + $0x18] sm:$0xff]  }
  0x59   : > { %v8003_v12 = vld.sshfl [vmem:[%s10793_s1 + $0x4] sm:$0x11 pattern:$0x75316420]  ;;  %v693_v15 = vcombine.high %v7987_v10, %v7987_v10  ;;  %v700_v20 = vrot.slane %v7987_v10, %v9640_v14 }
  0x5a   : > { %v903_v16 = vcombine.high %v8003_v12, %v8003_v12  ;;  %v650_v18 = vrot.slane %v636_v13, %v9640_v14  ;;  %v652_v23 = vpack.i.b16 %v643_v17, %v643_v17  ;;  %v8014_v41 = vld.sshfl [vmem:[%s10793_s1 + $0x6] sm:$0x11 pattern:$0x75316420]  ;;  %v910_v52 = vrot.slane %v8003_v12, %v9640_v14 }
  0x5b   : > { %673 = vrot.lane.b32.xlu0 %v9601_v4, %s10778_s23  ;;  %617 = vrot.lane.b32.xlu1 %v9601_v4, %s10776_s24  ;;  %v707_v19 = vrot.slane %v693_v15, %v9640_v14  ;;  %v709_v26 = vpack.i.b16 %v700_v20, %v700_v20  ;;  %v1044_v54 = vcombine.high %v8014_v41, %v8014_v41  ;;  %v8936_v6 = vld [vmem:[%s10794_s22] sm:$0xff]   ;;  %v8937_v15 = vld [vmem:[%s10794_s22 + $0x8] sm:$0xff]  }
  0x5c   : > { %v917_v21 = vrot.slane %v903_v16, %v9640_v14  ;;  %v659_v24 = vpack.i.b16 %v650_v18, %v650_v18  ;;  %v9650_v30 = vrot.slane %v652_v23, %v9647_v22  ;;  %v919_v56 = vpack.i.b16 %v910_v52, %v910_v52  ;;  %v8938_v20 = vld [vmem:[%s10794_s22 + $0x20] sm:$0xff]  }
  0x5d   : > { %v716_v25 = vpack.i.b16 %v707_v19, %v707_v19  ;;  %v9659_v33 = vrot.slane %v709_v26, %v9647_v22  ;;  %v1058_v57 = vrot.slane %v1044_v54, %v9640_v14  ;;  %v1051_v9 = vrot.slane %v8014_v41, %v9640_v14  ;;  %v8034_v19 = vld.sshfl [vmem:[%s10793_s1 + $0xa] sm:$0x11 pattern:$0x75316420]  ;;  %v8942_v52 = vld [vmem:[%s10794_s22 + $0x40] sm:$0xff]  }
  0x5e   : > { %v926_v29 = vpack.i.b16 %v917_v21, %v917_v21  ;;  %v9653_v31 = vrot.slane %v659_v24, %v9647_v22  ;;  %v9693_v58 = vrot.slane %v919_v56, %v9647_v22  ;;  %v1273_v23 = vcombine.high %v8034_v19, %v8034_v19  ;;  %v8939_v24 = vld [vmem:[%s10794_s22 + $0x28] sm:$0xff]  }
  0x5f   : > { %883 = vrot.lane.b32.xlu1 %v9601_v4, %s10774_s25  ;;  %881 = vrot.lane.b32.xlu0 %v9591_v2, %s10774_s25  ;;  %v9656_v32 = vrot.slane %v716_v25, %v9647_v22  ;;  %v1067_v59 = vpack.i.b16 %v1058_v57, %v1058_v57  ;;  %v1060_v13 = vpack.i.b16 %v1051_v9, %v1051_v9  ;;  %v8067_v9 = vld.sshfl [vmem:[%s10793_s1 + $0x10] sm:$0x11 pattern:$0x75316420] }
  0x60   : > { %v9662_v36 = vrot.slane %v926_v29, %v9647_v22  ;;  %v1287_v25 = vrot.slane %v1273_v23, %v9640_v14  ;;  %v8045_v29 = vld.sshfl [vmem:[%s10793_s1 + $0xc] sm:$0x11 pattern:$0x75316420] }
  0x61   : > { %v9715_v8 = vrot.slane %v1067_v59, %v9647_v22  ;;  %v9728_v16 = vrot.slane %v1060_v13, %v9647_v22  ;;  %v1421_v54 = vrot.slane %v8045_v29, %v9640_v14 }
  0x62   : > { %v1296_v26 = vpack.i.b16 %v1287_v25, %v1287_v25 }
  0x63   : > { %1024 = vrot.lane.b32.xlu1 %v9601_v4, %s10772_s26  ;;  %1022 = vrot.lane.b32.xlu0 %v9591_v2, %s10772_s26  ;;  %v1430_v57 = vpack.i.b16 %v1421_v54, %v1421_v54  ;;  %s10797_s26 = smov 113  }
  0x67   : > { %1253 = vrot.lane.b32.xlu1 %v9591_v2, %s10770_s28  ;;  %1251 = vrot.lane.b32.xlu0 %v9601_v4, %s10770_s28  ;;  %s10798_s28 = smov 112  }
  0x6b   : > { %1394 = vrot.lane.b32.xlu1 %v9591_v2, %s10768_s29  ;;  %1392 = vrot.lane.b32.xlu0 %v9601_v4, %s10768_s29  ;;  %s10799_s29 = smov 111  }
  0x6f   : > { %1535 = vrot.lane.b32.xlu1 %v9591_v2, %s10766_s18  ;;  %1533 = vrot.lane.b32.xlu0 %v9601_v4, %s10766_s18  ;;  %s10803_s18 = sshll.u32 %s10807_s30, 3 }
  0x73   : > { %1676 = vrot.lane.b32.xlu1 %v9591_v2, %s10764_s27  ;;  %1674 = vrot.lane.b32.xlu0 %v9601_v4, %s10764_s27  ;;  %s10800_s27 = smov 16  }
  0x77   : > { %1821 = vperm.xlu0 %8931, %v1815_v63   ;;  %1826 = vperm.xlu1 %8932, %v1816_v0  }
  0x7b   : > { %1836 = vperm.xlu0 %8931, %v1818_v5   ;;  %1831 = vperm.xlu1 %8932, %v1817_v1  }
  0xc9   : > { %v672_v27 = vpop.permute.xlu0 %671  ;;  %v615_v28 = vpop.permute.xlu1 %614 }
  0xcd   : > { %v674_v34 = vpop.permute.xlu0 %673  ;;  %v618_v35 = vpop.permute.xlu1 %617 }
  0xce   : > { %v620_v37 = vsel %vm619_vm0, %v618_v35, %v615_v28  ;;  %v625_v38 = vsel %vm619_vm0, %v615_v28, %v618_v35  ;;  %v676_v39 = vsel %vm675_vm1, %v674_v34, %v672_v27  ;;  %v681_v40 = vsel %vm675_vm1, %v672_v27, %v674_v34  ;;  %v8940_v34 = vld [vmem:[%s10794_s22 + $0x30] sm:$0xff]  }
  0xcf   : > { %v665_v42 = vmul.bf16 %v9650_v30, %v625_v38  ;;  %v666_v43 = vmul.bf16 %v9653_v31, %v620_v37  ;;  %v723_v44 = vmul.bf16 %v9656_v32, %v676_v39  ;;  %v722_v45 = vmul.bf16 %v9659_v33, %v681_v40 }
  0xd0   : > { %v9758_v35 = vrot.slane %v1296_v26, %v9647_v22  ;;  %v1185_v37 = vsel %vm746_vm2, %v9601_v4, 0  ;;  %v1280_v38 = vrot.slane %v8034_v19, %v9640_v14  ;;  %v1414_v40 = vcombine.high %v8045_v29, %v8045_v29  ;;  %v8945_v19 = vld [vmem:[%s10794_s22 + $0x58] sm:$0xff]   ;;  %v8946_v29 = vld [vmem:[%s10794_s22 + $0x60] sm:$0xff]  }
  0xd1   : > { %7994 = vmatprep.subr.msk.bf16.mxu0 %vm746_vm2, %v723_v44  ;;  %v748_v47 = vsel %vm746_vm2, %v722_v45, 0  ;;  %v884_v48 = vpop.permute.xlu1 %883  ;;  %v882_v49 = vpop.permute.xlu0 %881  ;;  %v823_v51 = vsel %vm746_vm2, %v665_v42, 0 }
  0xd2   : > { %754 = vmatpush1.bf16.msra.mxu0 %v748_v47  ;;  %v886_v50 = vsel %vm885_vm3, %v884_v48, %v882_v49  ;;  %v891_v60 = vsel %vm885_vm3, %v882_v49, %v884_v48  ;;  %v1289_v41 = vpack.i.b16 %v1280_v38, %v1280_v38  ;;  %v1428_v42 = vrot.slane %v1414_v40, %v9640_v14 }
  0xd3   : > { %7999 = vmatprep.subr.msk.bf16.mxu0 %vm746_vm2, %v666_v43  ;;  %v933_v53 = vmul.bf16 %v9662_v36, %v886_v50  ;;  %v932_v7 = vmul.bf16 %v9693_v58, %v891_v60  ;;  %v8941_v43 = vld [vmem:[%s10794_s22 + $0x38] sm:$0xff]   ;;  %v8943_v60 = vld [vmem:[%s10794_s22 + $0x48] sm:$0xff]  }
  0xd4   : > { %v9773_v4 = vrot.slane %v1289_v41, %v9647_v22  ;;  %v1437_v44 = vpack.i.b16 %v1428_v42, %v1428_v42  ;;  %v8948_v42 = vld [vmem:[%s10794_s22 + $0x70] sm:$0xff]  }
  0xd5   : > { %7995 = vmatmul.mubr.msk.bf16.vlgmr.msra.gmra.mrb[0].mxu0 %vm739_vm4, %v8934_v46  ;;  %v1025_v61 = vpop.permute.xlu1 %1024  ;;  %v1023_v62 = vpop.permute.xlu0 %1022  ;;  %v956_v11 = vsel %vm746_vm2, %v932_v7, 0 }
  0xd6   : > { %829 = vmatpush1.bf16.msra.mxu0 %v823_v51  ;;  %795 = vmatprep.mubr.bf16.mxu0 %v9394_v3  ;;  %v1027_v10 = vsel %vm1026_vm5, %v1025_v61, %v1023_v62  ;;  %v1032_v17 = vsel %vm1026_vm5, %v1023_v62, %v1025_v61  ;;  %v9780_v49 = vrot.slane %v1437_v44, %v9647_v22  ;;  %v8056_v51 = vld.sshfl [vmem:[%s10793_s1 + $0xe] sm:$0x11 pattern:$0x75316420]  ;;  %v8950_v44 = vld [vmem:[%s10794_s22 + $0x80] sm:$0xff]  }
  0xd7   : > { %8010 = vmatprep.subr.msk.bf16.mxu0 %vm746_vm2, %v933_v53  ;;  %v1074_v12 = vmul.bf16 %v9715_v8, %v1027_v10  ;;  %v1073_v18 = vmul.bf16 %v9728_v16, %v1032_v17  ;;  %v1555_v56 = vcombine.high %v8056_v51, %v8056_v51  ;;  %v9800_v61 = vrot.slane %v1430_v57, %v9647_v22  ;;  %v8944_v10 = vld [vmem:[%s10794_s22 + $0x50] sm:$0xff]  }
  0xd9   : > { %v1097_v21 = vsel %vm746_vm2, %v1073_v18, 0  ;;  %v1254_v27 = vpop.permute.xlu1 %1253  ;;  %v1252_v28 = vpop.permute.xlu0 %1251  ;;  %v1569_v59 = vrot.slane %v1555_v56, %v9640_v14 }
  0xda   : > { %v1256_v45 = vsel %vm1255_vm6, %v1252_v28, %v1254_v27 }
  0xdb   : > { %v1302_v48 = vmul.bf16 %v9773_v4, %v1256_v45  ;;  %v1578_v62 = vpack.i.b16 %v1569_v59, %v1569_v59  ;;  %v8951_v45 = vld [vmem:[%s10794_s22 + $0x88] sm:$0xff]  }
  0xdd   : > { %7996 = vmatmul.mubr.msk.bf16.gmra.mrb[4].mxu0 %vm739_vm4, %v8935_v55  ;;  %v1395_v46 = vpop.permute.xlu1 %1394  ;;  %v1393_v47 = vpop.permute.xlu0 %1392  ;;  %v1326_v53 = vsel %vm746_vm2, %v1302_v48, 0 }
  0xde   : > { %860 = vmatprep.mubr.bf16.mxu0 %v9394_v3  ;;  %v1402_v50 = vsel %vm1396_vm7, %v1395_v46, %v1393_v47  ;;  %v1397_v63 = vsel %vm1396_vm7, %v1393_v47, %v1395_v46 }
  0xdf   : > { %v1444_v55 = vmul.bf16 %v9780_v49, %v1402_v50  ;;  %v1443_v5 = vmul.bf16 %v9800_v61, %v1397_v63 }
  0xe1   : > { %v1536_v0 = vpop.permute.xlu1 %1535  ;;  %v1534_v1 = vpop.permute.xlu0 %1533 }
  0xe2   : > { %v1543_v7 = vsel %vm1537_vm8, %v1536_v0, %v1534_v1  ;;  %v1538_v23 = vsel %vm1537_vm8, %v1534_v1, %v1536_v0 }
  0xe5   : > { %8000 = vmatmul.mubr.msk.bf16.vlgmr.msra.gmra.mrb[0].mxu0 %vm739_vm4, %v8936_v6  ;;  %v9807_v6 = vrot.slane %v1578_v62, %v9647_v22  ;;  %v1675_v25 = vpop.permute.xlu0 %1674 }
  0xe6   : > { %962 = vmatpush1.bf16.msra.mxu0 %v956_v11  ;;  %870 = vmatprep.mubr.bf16.mxu0 %v9394_v3  ;;  %v1467_v11 = vsel %vm746_vm2, %v1443_v5, 0 }
  0xe7   : > { %8021 = vmatprep.subr.msk.bf16.mxu0 %vm746_vm2, %v1074_v12  ;;  %v1562_v12 = vrot.slane %v8056_v51, %v9640_v14  ;;  %v1585_v13 = vmul.bf16 %v9807_v6, %v1543_v7 }
  0xe9   : > { %v1571_v17 = vpack.i.b16 %v1562_v12, %v1562_v12 }
  0xed   : > { %8001 = vmatmul.mubr.msk.bf16.gmra.mrb[4].mxu0 %vm739_vm4, %v8937_v15  ;;  %v1696_v15 = vcombine.high %v8067_v9, %v8067_v9 }
  0xee   : > { %993 = vmatprep.mubr.bf16.mxu0 %v9394_v3 }
  0xef   : > { %v1710_v18 = vrot.slane %v1696_v15, %v9640_v14 }
  0xf5   : > { %8011 = vmatmul.mubr.msk.bf16.vlgmr.msra.gmra.mrb[0].mxu0 %vm739_vm4, %v8938_v20  ;;  %v9827_v20 = vrot.slane %v1571_v17, %v9647_v22 }
  0xf6   : > { %1103 = vmatpush1.bf16.msra.mxu0 %v1097_v21  ;;  %1003 = vmatprep.mubr.bf16.mxu0 %v9394_v3  ;;  %v1719_v21 = vpack.i.b16 %v1710_v18, %v1710_v18  ;;  %v1822_v46 = vpop.permute.xlu0 %1821 }
  0xf7   : > { %8030 = vmatprep.subr.msk.bf16.mxu0 %vm746_vm2, %v9591_v2  ;;  %v1261_v2 = vsel %vm1255_vm6, %v1254_v27, %v1252_v28  ;;  %v1584_v26 = vmul.bf16 %v9827_v20, %v1538_v23 }
  0xf8   : > { %v1303_v39 = vmul.bf16 %v9758_v35, %v1261_v2  ;;  %v9834_v27 = vrot.slane %v1719_v21, %v9647_v22  ;;  %v1703_v2 = vrot.slane %v8067_v9, %v9640_v14 }
  0xfa   : > { %v1712_v38 = vpack.i.b16 %v1703_v2, %v1703_v2 }
  0xfc   : > { %v9850_v40 = vrot.slane %v1712_v38, %v9647_v22  ;;  %v8949_v22 = vld [vmem:[%s10794_s22 + $0x78] sm:$0xff]  }
  0xfd   : > { %8012 = vmatmul.mubr.msk.bf16.gmra.mrb[4].mxu0 %vm739_vm4, %v8939_v24  ;;  %v1677_v24 = vpop.permute.xlu1 %1676 }
  0xfe   : > { %1134 = vmatprep.mubr.bf16.mxu0 %v9394_v3  ;;  %v1684_v28 = vsel %vm1678_vm9, %v1677_v24, %v1675_v25  ;;  %v1679_v41 = vsel %vm1678_vm9, %v1675_v25, %v1677_v24 }
  0xff   : > { %v1725_v14 = vmul.bf16 %v9850_v40, %v1679_v41 }
 0x101   : > { %v1827_v48 = vpop.permute.xlu1 %1826 }
 0x105   : > { %8022 = vmatmul.mubr.msk.bf16.vlgmr.msra.gmra.mrb[0].mxu0 %vm739_vm4, %v8940_v34  ;;  %v1608_v34 = vsel %vm746_vm2, %v1584_v26, 0  ;;  %v1832_v63 = vpop.permute.xlu1 %1831  ;;  %v2570_v26 = vld [vmem:[%s10744_s5 + $0x8] sm:$0xff] }
 0x106   : > { %1191 = vmatpush1.bf16.msra.mxu0 %v1185_v37  ;;  %1144 = vmatprep.mubr.bf16.mxu0 %v9394_v3  ;;  %v1726_v37 = vmul.bf16 %v9834_v27, %v1684_v28  ;;  %v2569_v28 = vld [vmem:[%s10744_s5] sm:$0xff] }
 0x107   : > { %8041 = vmatprep.subr.msk.bf16.mxu0 %vm746_vm2, %v1303_v39  ;;  %v8947_v39 = vld [vmem:[%s10794_s22 + $0x68] sm:$0xff]  }
 0x10d   : > { %8023 = vmatmul.mubr.msk.bf16.gmra.mrb[4].mxu0 %vm739_vm4, %v8941_v43  ;;  %v1749_v43 = vsel %vm746_vm2, %v1725_v14, 0 }
 0x10e   : > { %1222 = vmatprep.mubr.bf16.mxu0 %v9394_v3 }
 0x115   : > { %8031 = vmatmul.mubr.msk.bf16.vlgmr.msra.gmra.mrb[0].mxu0 %vm739_vm4, %v8942_v52 }
 0x116   : > { %1332 = vmatpush1.bf16.msra.mxu0 %v1326_v53  ;;  %1232 = vmatprep.mubr.bf16.mxu0 %v9394_v3 }
 0x117   : > { %8052 = vmatprep.subr.msk.bf16.mxu0 %vm746_vm2, %v1444_v55 }
 0x11d   : > { %8032 = vmatmul.mubr.msk.bf16.gmra.mrb[4].mxu0 %vm739_vm4, %v8943_v60 }
 0x11e   : > { %1363 = vmatprep.mubr.bf16.mxu0 %v9394_v3 }
 0x125   : > { %8042 = vmatmul.mubr.msk.bf16.vlgmr.msra.gmra.mrb[0].mxu0 %vm739_vm4, %v8944_v10  ;;  %v1837_v10 = vpop.permute.xlu0 %1836 }
 0x126   : > { %1473 = vmatpush1.bf16.msra.mxu0 %v1467_v11  ;;  %1373 = vmatprep.mubr.bf16.mxu0 %v9394_v3 }
 0x127   : > { %8063 = vmatprep.subr.msk.bf16.mxu0 %vm746_vm2, %v1585_v13 }
 0x12d   : > { %8043 = vmatmul.mubr.msk.bf16.gmra.mrb[4].mxu0 %vm739_vm4, %v8945_v19 }
 0x12e   : > { %1504 = vmatprep.mubr.bf16.mxu0 %v9394_v3 }
 0x135   : > { %8053 = vmatmul.mubr.msk.bf16.vlgmr.msra.gmra.mrb[0].mxu0 %vm739_vm4, %v8946_v29 }
 0x136   : > { %1614 = vmatpush1.bf16.msra.mxu0 %v1608_v34  ;;  %1514 = vmatprep.mubr.bf16.mxu0 %v9394_v3 }
 0x137   : > { %8074 = vmatprep.subr.msk.bf16.mxu0 %vm746_vm2, %v1726_v37 }
 0x13d   : > { %8054 = vmatmul.mubr.msk.bf16.gmra.mrb[4].mxu0 %vm739_vm4, %v8947_v39 }
 0x13e   : > { %1645 = vmatprep.mubr.bf16.mxu0 %v9394_v3 }
 0x145   : > { %8064 = vmatmul.mubr.msk.bf16.vlgmr.msra.gmra.mrb[0].mxu0 %vm739_vm4, %v8948_v42 }
 0x146   : > { %1755 = vmatpush1.bf16.msra.mxu0 %v1749_v43  ;;  %1655 = vmatprep.mubr.bf16.mxu0 %v9394_v3 }
 0x14d   : > { %8065 = vmatmul.mubr.msk.bf16.gmra.mrb[4].mxu0 %vm739_vm4, %v8949_v22 }
 0x14e   : > { %1786 = vmatprep.mubr.bf16.mxu0 %v9394_v3 }
 0x155   : > { %8075 = vmatmul.mubr.msk.bf16.vlgmr.msra.gmra.mrb[0].mxu0 %vm739_vm4, %v8950_v44 }
 0x156   : > { %1796 = vmatprep.mubr.bf16.mxu0 %v9394_v3 }
 0x15d   : > { %8076 = vmatmul.mubr.msk.bf16.gmra.mrb[4].mxu0 %vm739_vm4, %v8951_v45  ;;  %vm5732_vm4 = vcmask 64512  }
 0x228   : > { %v1788_v47 = vpop.f32.mrb[0].mxu0 }
 0x229   : > { %v1839_v50 = vadd.f32 %v1822_v46, %v1788_v47  ;;  %v1790_v51 = vpop.f32.mrb[1].mxu0  ;;  %v8952_v47 = vld [vmem:[%s10743_s4 + $0x8] sm:$0xff]  }
 0x22a   : > { %v1840_v52 = vadd.f32 %v1822_v46, %v1790_v51  ;;  %v1792_v53 = vpop.f32.mrb[2].mxu0 }
 0x22b   : > { %v1841_v54 = vadd.f32 %v1827_v48, %v1792_v53  ;;  %v1794_v55 = vpop.f32.mrb[3].mxu0  ;;  %v1847_v57 = vmax.f32 %v1839_v50, 0.0 }
 0x22c   : > { %v1842_v56 = vadd.f32 %v1827_v48, %v1794_v55  ;;  %v1848_v60 = vmax.f32 %v1840_v52, 0.0 }
 0x22d   : > { %v1849_v59 = vmax.f32 %v1841_v54, 0.0 }
 0x22e   : > { %v1850_v62 = vmax.f32 %v1842_v56, 0.0 }
 0x22f   : > { %v9876_v0 = vpack.c.bf16 %v1849_v59, %v1847_v57 }
 0x230   : > { %v9878_v1 = vpack.c.bf16 %v1850_v62, %v1848_v60  ;;  %v1798_v5 = vpop.f32.mrb[4].mxu0 }
 0x231   : > { %v1843_v7 = vadd.f32 %v1832_v63, %v1798_v5  ;;  %v1800_v9 = vpop.f32.mrb[5].mxu0  ;;  %1893 = vrot.lane.b32.xlu0 %v9876_v0, %s10778_s23 }
 0x232   : > { %v1844_v11 = vadd.f32 %v1832_v63, %v1800_v9  ;;  %v1802_v12 = vpop.f32.mrb[6].mxu0  ;;  %1889 = vrot.lane.b32.xlu1 %v9878_v1, %s10778_s23 }
 0x233   : > { %v1845_v13 = vadd.f32 %v1837_v10, %v1802_v12  ;;  %v1804_v15 = vpop.f32.mrb[7].mxu0  ;;  %v1851_v18 = vmax.f32 %v1843_v7, 0.0 }
 0x234   : > { %v1846_v17 = vadd.f32 %v1837_v10, %v1804_v15  ;;  %v1852_v21 = vmax.f32 %v1844_v11, 0.0  ;;  %v8953_v11 = vld [vmem:[%s10743_s4] sm:$0xff]  }
 0x235   : > { %v1853_v19 = vmax.f32 %v1845_v13, 0.0 }
 0x236   : > { %v1854_v23 = vmax.f32 %v1846_v17, 0.0 }
 0x237   : > { %v9884_v24 = vpack.c.bf16 %v1853_v19, %v1851_v18 }
 0x238   : > { %v9886_v25 = vpack.c.bf16 %v1854_v23, %v1852_v21 }
 0x239   : > { %1895 = vrot.lane.b32.xlu0 %v9884_v24, %s10778_s23 }
 0x23a   : > { %1891 = vrot.lane.b32.xlu1 %v9886_v25, %s10778_s23 }
 0x23d   : > { %1867 = vrot.lane.b32.xlu0 %v9876_v0, %s10776_s24 }
 0x23e   : > { %1861 = vrot.lane.b32.xlu1 %v9878_v1, %s10776_s24 }
 0x241   : > { %1869 = vrot.lane.b32.xlu0 %v9884_v24, %s10776_s24 }
 0x242   : > { %1863 = vrot.lane.b32.xlu1 %v9886_v25, %s10776_s24 }
 0x245   : > { %2023 = vrot.lane.b32.xlu0 %v9876_v0, %s10774_s25 }
 0x246   : > { %2019 = vrot.lane.b32.xlu1 %v9878_v1, %s10774_s25 }
 0x249   : > { %2025 = vrot.lane.b32.xlu0 %v9884_v24, %s10774_s25 }
 0x24a   : > { %2021 = vrot.lane.b32.xlu1 %v9886_v25, %s10774_s25 }
 0x24d   : > { %2105 = vrot.lane.b32.xlu0 %v9876_v0, %s10795_s2 }
 0x24e   : > { %2101 = vrot.lane.b32.xlu1 %v9878_v1, %s10795_s2 }
 0x251   : > { %2107 = vrot.lane.b32.xlu0 %v9884_v24, %s10795_s2 }
 0x252   : > { %2103 = vrot.lane.b32.xlu1 %v9886_v25, %s10795_s2 }
 0x255   : > { %2243 = vrot.lane.b32.xlu0 %v9878_v1, %s10796_s0 }
 0x256   : > { %2241 = vrot.lane.b32.xlu1 %v9876_v0, %s10796_s0 }
 0x259   : > { %2247 = vrot.lane.b32.xlu0 %v9886_v25, %s10796_s0 }
 0x25a   : > { %2245 = vrot.lane.b32.xlu1 %v9884_v24, %s10796_s0 }
 0x25d   : > { %2325 = vrot.lane.b32.xlu0 %v9878_v1, %s10797_s26 }
 0x25e   : > { %2323 = vrot.lane.b32.xlu1 %v9876_v0, %s10797_s26 }
 0x261   : > { %2329 = vrot.lane.b32.xlu0 %v9886_v25, %s10797_s26 }
 0x262   : > { %2327 = vrot.lane.b32.xlu1 %v9884_v24, %s10797_s26 }
 0x265   : > { %2407 = vrot.lane.b32.xlu0 %v9878_v1, %s10798_s28 }
 0x266   : > { %2405 = vrot.lane.b32.xlu1 %v9876_v0, %s10798_s28 }
 0x269   : > { %2411 = vrot.lane.b32.xlu0 %v9886_v25, %s10798_s28 }
 0x26a   : > { %2409 = vrot.lane.b32.xlu1 %v9884_v24, %s10798_s28 }
 0x26d   : > { %2489 = vrot.lane.b32.xlu0 %v9878_v1, %s10799_s29 }
 0x26e   : > { %2487 = vrot.lane.b32.xlu1 %v9876_v0, %s10799_s29 }
 0x271   : > { %2493 = vrot.lane.b32.xlu0 %v9886_v25, %s10799_s29 }
 0x272   : > { %2491 = vrot.lane.b32.xlu1 %v9884_v24, %s10799_s29 }
 0x275   : > { %2578 = vperm.xlu0 %8931, %v2570_v26  }
 0x276   : > { %2573 = vperm.xlu1 %8932, %v2569_v28  }
 0x2a3   : > { %v1894_v29 = vpop.permute.xlu0 %1893 }
 0x2a4   : > { %v1890_v34 = vpop.permute.xlu1 %1889 }
 0x2a5   : > { %v1897_v2 = vsel %vm675_vm1, %v1894_v29, %v1890_v34  ;;  %v1903_v37 = vsel %vm675_vm1, %v1890_v34, %v1894_v29 }
 0x2a6   : > { %v1910_v38 = vmul.bf16 %v1897_v2, %v9656_v32  ;;  %v1909_v39 = vmul.bf16 %v1903_v37, %v9659_v33  ;;  %v8954_v2 = vld [vmem:[%s10743_s4 + $0x10] sm:$0xff]  }
 0x2a8   : > { %1925 = vmatprep.subr.bf16.mxu1 %v1910_v38 }
 0x2a9   : > { %1926 = vmatpush1.bf16.msra.mxu1 %v1909_v39 }
 0x2ab   : > { %v1896_v41 = vpop.permute.xlu0 %1895 }
 0x2ac   : > { %v1892_v14 = vpop.permute.xlu1 %1891 }
 0x2ad   : > { %v1898_v42 = vsel %vm675_vm1, %v1896_v41, %v1892_v14  ;;  %v1907_v43 = vsel %vm675_vm1, %v1892_v14, %v1896_v41 }
 0x2ae   : > { %v1912_v22 = vmul.bf16 %v1898_v42, %v9656_v32  ;;  %v1911_v44 = vmul.bf16 %v1907_v43, %v9659_v33  ;;  %v8955_v42 = vld [vmem:[%s10743_s4 + $0x18] sm:$0xff]  }
 0x2af   : > { %v1868_v45 = vpop.permute.xlu0 %1867 }
 0x2b0   : > { %v1862_v46 = vpop.permute.xlu1 %1861  ;;  %1927 = vmatprep.subr.bf16.mxu1 %v1912_v22 }
 0x2b1   : > { %v1871_v48 = vsel %vm619_vm0, %v1868_v45, %v1862_v46  ;;  %v1877_v50 = vsel %vm619_vm0, %v1862_v46, %v1868_v45  ;;  %1928 = vmatpush1.bf16.msra.mxu1 %v1911_v44 }
 0x2b2   : > { %v1883_v51 = vmul.bf16 %v1877_v50, %v9650_v30  ;;  %v1884_v52 = vmul.bf16 %v1871_v48, %v9653_v31  ;;  %v8956_v48 = vld [vmem:[%s10743_s4 + $0x20] sm:$0xff]  }
 0x2b3   : > { %v1870_v53 = vpop.permute.xlu0 %1869 }
 0x2b4   : > { %v1864_v54 = vpop.permute.xlu1 %1863  ;;  %8080 = vmatmul.mubr.msk.bf16.vlgmr.msra.gmra.mrb[0].mxu1 %vm1921_vm10, %v8952_v47  ;;  %1976 = vmatprep.subr.bf16.mxu1 %v1884_v52 }
 0x2b5   : > { %v1872_v55 = vsel %vm619_vm0, %v1870_v53, %v1864_v54  ;;  %v1881_v56 = vsel %vm619_vm0, %v1864_v54, %v1870_v53  ;;  %1977 = vmatpush1.bf16.msra.mxu1 %v1883_v51  ;;  %2008 = vmatprep.mubr.bf16.mxu1 %v9394_v3 }
 0x2b6   : > { %v1885_v57 = vmul.bf16 %v1881_v56, %v9650_v30  ;;  %v1886_v59 = vmul.bf16 %v1872_v55, %v9653_v31 }
 0x2b7   : > { %v2024_v60 = vpop.permute.xlu0 %2023 }
 0x2b8   : > { %v2020_v62 = vpop.permute.xlu1 %2019  ;;  %1978 = vmatprep.subr.bf16.mxu1 %v1886_v59 }
 0x2b9   : > { %v2027_v63 = vsel %vm885_vm3, %v2024_v60, %v2020_v62  ;;  %1979 = vmatpush1.bf16.msra.mxu1 %v1885_v57  ;;  %v2033_v9 = vsel %vm885_vm3, %v2020_v62, %v2024_v60  ;;  %v8957_v60 = vld [vmem:[%s10743_s4 + $0x28] sm:$0xff]  }
 0x2ba   : > { %v2040_v5 = vmul.bf16 %v2027_v63, %v9662_v36  ;;  %v2039_v15 = vmul.bf16 %v2033_v9, %v9693_v58 }
 0x2bb   : > { %v2026_v7 = vpop.permute.xlu0 %2025 }
 0x2bc   : > { %v2022_v10 = vpop.permute.xlu1 %2021  ;;  %2054 = vmatprep.subr.bf16.mxu1 %v2040_v5 }
 0x2bd   : > { %v2028_v12 = vsel %vm885_vm3, %v2026_v7, %v2022_v10  ;;  %v2037_v18 = vsel %vm885_vm3, %v2022_v10, %v2026_v7 }
 0x2be   : > { %v2042_v13 = vmul.bf16 %v2028_v12, %v9662_v36  ;;  %v2041_v26 = vmul.bf16 %v2037_v18, %v9693_v58 }
 0x2bf   : > { %v2106_v17 = vpop.permute.xlu0 %2105 }
 0x2c0   : > { %v2102_v19 = vpop.permute.xlu1 %2101  ;;  %8082 = vmatmul.mubr.msk.bf16.vlgmr.msra.gmra.mrb[0].mxu1 %vm1921_vm10, %v8953_v11 }
 0x2c1   : > { %v2109_v21 = vsel %vm1026_vm5, %v2106_v17, %v2102_v19  ;;  %2055 = vmatpush1.bf16.msra.mxu1 %v2039_v15  ;;  %2086 = vmatprep.mubr.bf16.mxu1 %v9394_v3  ;;  %v2115_v34 = vsel %vm1026_vm5, %v2102_v19, %v2106_v17  ;;  %v8958_v19 = vld [vmem:[%s10743_s4 + $0x30] sm:$0xff]  }
 0x2c2   : > { %2056 = vmatprep.subr.bf16.mxu1 %v2042_v13  ;;  %v2122_v23 = vmul.bf16 %v2109_v21, %v9715_v8  ;;  %v2121_v38 = vmul.bf16 %v2115_v34, %v9728_v16 }
 0x2c3   : > { %v2108_v28 = vpop.permute.xlu0 %2107 }
 0x2c4   : > { %v2104_v29 = vpop.permute.xlu1 %2103 }
 0x2c5   : > { %2057 = vmatpush1.bf16.msra.mxu1 %v2041_v26  ;;  %v2110_v37 = vsel %vm1026_vm5, %v2108_v28, %v2104_v29  ;;  %v2119_v39 = vsel %vm1026_vm5, %v2104_v29, %v2108_v28 }
 0x2c6   : > { %2136 = vmatprep.subr.bf16.mxu1 %v2122_v23  ;;  %v2124_v41 = vmul.bf16 %v2110_v37, %v9715_v8  ;;  %v2123_v14 = vmul.bf16 %v2119_v39, %v9728_v16 }
 0x2c7   : > { %v2244_v43 = vpop.permute.xlu0 %2243 }
 0x2c8   : > { %v2242_v22 = vpop.permute.xlu1 %2241 }
 0x2c9   : > { %v2255_v44 = vsel %vm1255_vm6, %v2244_v43, %v2242_v22  ;;  %v2249_v47 = vsel %vm1255_vm6, %v2242_v22, %v2244_v43 }
 0x2ca   : > { %v2261_v52 = vmul.bf16 %v2249_v47, %v9773_v4 }
 0x2cb   : > { %v2248_v45 = vpop.permute.xlu0 %2247 }
 0x2cc   : > { %8086 = vmatmul.mubr.msk.bf16.vlgmr.msra.gmra.mrb[0].mxu1 %vm1921_vm10, %v8954_v2  ;;  %v2246_v46 = vpop.permute.xlu1 %2245 }
 0x2cd   : > { %2137 = vmatpush1.bf16.msra.mxu1 %v2121_v38  ;;  %2168 = vmatprep.mubr.bf16.mxu1 %v9394_v3  ;;  %v2259_v50 = vsel %vm1255_vm6, %v2248_v45, %v2246_v46 }
 0x2ce   : > { %2138 = vmatprep.subr.bf16.mxu1 %v2124_v41  ;;  %v2264_v53 = vmul.bf16 %v2259_v50, %v9758_v35 }
 0x2d0   : > { %v2324_v51 = vpop.permute.xlu1 %2323 }
 0x2d1   : > { %2139 = vmatpush1.bf16.msra.mxu1 %v2123_v14 }
 0x2d2   : > { %2194 = vmatprep.subr.bf16.mxu1 %v9878_v1  ;;  %v2262_v1 = vmul.bf16 %v2255_v44, %v9758_v35 }
 0x2d4   : > { %v2328_v56 = vpop.permute.xlu1 %2327 }
 0x2d8   : > { %8090 = vmatmul.mubr.msk.bf16.vlgmr.msra.gmra.mrb[0].mxu1 %vm1921_vm10, %v8955_v42  ;;  %v2406_v5 = vpop.permute.xlu1 %2405  ;;  %v8959_v42 = vld [vmem:[%s10743_s4 + $0x38] sm:$0xff]  }
 0x2d9   : > { %2195 = vmatpush1.bf16.msra.mxu1 %v9876_v0  ;;  %2226 = vmatprep.mubr.bf16.mxu1 %v9394_v3  ;;  %v2326_v0 = vpop.permute.xlu0 %2325 }
 0x2da   : > { %2196 = vmatprep.subr.bf16.mxu1 %v9886_v25  ;;  %v2250_v25 = vsel %vm1255_vm6, %v2246_v46, %v2248_v45  ;;  %v2331_v59 = vsel %vm1396_vm7, %v2324_v51, %v2326_v0 }
 0x2db   : > { %v2263_v54 = vmul.bf16 %v2250_v25, %v9773_v4  ;;  %v2343_v7 = vmul.bf16 %v2331_v59, %v9800_v61 }
 0x2dc   : > { %v2410_v17 = vpop.permute.xlu1 %2409 }
 0x2dd   : > { %2197 = vmatpush1.bf16.msra.mxu1 %v9884_v24  ;;  %v2337_v24 = vsel %vm1396_vm7, %v2326_v0, %v2324_v51  ;;  %v2330_v55 = vpop.permute.xlu0 %2329 }
 0x2de   : > { %2276 = vmatprep.subr.bf16.mxu1 %v2262_v1  ;;  %v2344_v57 = vmul.bf16 %v2337_v24, %v9780_v49  ;;  %v2341_v62 = vsel %vm1396_vm7, %v2330_v55, %v2328_v56  ;;  %v2332_v9 = vsel %vm1396_vm7, %v2328_v56, %v2330_v55  ;;  %v8960_v1 = vld [vmem:[%s10743_s4 + $0x40] sm:$0xff]  }
 0x2df   : > { %v2346_v10 = vmul.bf16 %v2341_v62, %v9780_v49  ;;  %v2345_v12 = vmul.bf16 %v2332_v9, %v9800_v61 }
 0x2e0   : > { %v2488_v26 = vpop.permute.xlu1 %2487 }
 0x2e1   : > { %v2408_v63 = vpop.permute.xlu0 %2407 }
 0x2e2   : > { %v2419_v11 = vsel %vm1537_vm8, %v2408_v63, %v2406_v5  ;;  %v2413_v18 = vsel %vm1537_vm8, %v2406_v5, %v2408_v63  ;;  %v3116_v63 = vld [vmem:[%s10746_s7] sm:$0xff] }
 0x2e3   : > { %v2426_v13 = vmul.bf16 %v2419_v11, %v9807_v6  ;;  %v2425_v28 = vmul.bf16 %v2413_v18, %v9827_v20 }
 0x2e4   : > { %8094 = vmatmul.mubr.msk.bf16.vlgmr.msra.gmra.mrb[0].mxu1 %vm1921_vm10, %v8956_v48  ;;  %v2492_v41 = vpop.permute.xlu1 %2491 }
 0x2e5   : > { %2277 = vmatpush1.bf16.msra.mxu1 %v2261_v52  ;;  %2308 = vmatprep.mubr.bf16.mxu1 %v9394_v3  ;;  %v2412_v15 = vpop.permute.xlu0 %2411 }
 0x2e6   : > { %2278 = vmatprep.subr.bf16.mxu1 %v2264_v53  ;;  %v2423_v21 = vsel %vm1537_vm8, %v2412_v15, %v2410_v17  ;;  %v2414_v29 = vsel %vm1537_vm8, %v2410_v17, %v2412_v15 }
 0x2e7   : > { %v2428_v34 = vmul.bf16 %v2423_v21, %v9807_v6  ;;  %v2427_v37 = vmul.bf16 %v2414_v29, %v9827_v20 }
 0x2e9   : > { %2279 = vmatpush1.bf16.msra.mxu1 %v2263_v54  ;;  %v2490_v23 = vpop.permute.xlu0 %2489 }
 0x2ea   : > { %2358 = vmatprep.subr.bf16.mxu1 %v2344_v57  ;;  %v2501_v2 = vsel %vm1678_vm9, %v2490_v23, %v2488_v26  ;;  %v2495_v14 = vsel %vm1678_vm9, %v2488_v26, %v2490_v23 }
 0x2eb   : > { %v2508_v38 = vmul.bf16 %v2501_v2, %v9834_v27  ;;  %v2507_v22 = vmul.bf16 %v2495_v14, %v9850_v40 }
 0x2ed   : > { %v2494_v39 = vpop.permute.xlu0 %2493 }
 0x2ee   : > { %v2505_v43 = vsel %vm1678_vm9, %v2494_v39, %v2492_v41  ;;  %v2496_v44 = vsel %vm1678_vm9, %v2492_v41, %v2494_v39  ;;  %v2605_v41 = vld [vmem:[%s10745_s6] sm:$0xf] }
 0x2ef   : > { %v2510_v45 = vmul.bf16 %v2505_v43, %v9834_v27  ;;  %v2509_v46 = vmul.bf16 %v2496_v44, %v9850_v40 }
 0x2f0   : > { %8098 = vmatmul.mubr.msk.bf16.vlgmr.msra.gmra.mrb[0].mxu1 %vm1921_vm10, %v8957_v60 }
 0x2f1   : > { %2359 = vmatpush1.bf16.msra.mxu1 %v2343_v7  ;;  %2390 = vmatprep.mubr.bf16.mxu1 %v9394_v3 }
 0x2f2   : > { %2360 = vmatprep.subr.bf16.mxu1 %v2346_v10 }
 0x2f4   : > { %v2579_v51 = vpop.permute.xlu0 %2578 }
 0x2f5   : > { %2361 = vmatpush1.bf16.msra.mxu1 %v2345_v12  ;;  %v2574_v47 = vpop.permute.xlu1 %2573 }
 0x2f6   : > { %2440 = vmatprep.subr.bf16.mxu1 %v2426_v13 }
 0x2fc   : > { %8102 = vmatmul.mubr.msk.bf16.vlgmr.msra.gmra.mrb[0].mxu1 %vm1921_vm10, %v8958_v19  ;;  %v8111_v19 = vld [vmem:[%s10745_s6 + $0x4] sm:$0xf] }
 0x2fd   : > { %2441 = vmatpush1.bf16.msra.mxu1 %v2425_v28  ;;  %2472 = vmatprep.mubr.bf16.mxu1 %v9394_v3 }
 0x2fe   : > { %2442 = vmatprep.subr.bf16.mxu1 %v2428_v34 }
 0x301   : > { %2443 = vmatpush1.bf16.msra.mxu1 %v2427_v37 }
 0x302   : > { %2522 = vmatprep.subr.bf16.mxu1 %v2508_v38 }
 0x308   : > { %8106 = vmatmul.mubr.msk.bf16.vlgmr.msra.gmra.mrb[0].mxu1 %vm1921_vm10, %v8959_v42 }
 0x309   : > { %2523 = vmatpush1.bf16.msra.mxu1 %v2507_v22  ;;  %2554 = vmatprep.mubr.bf16.mxu1 %v9394_v3  ;;  %v8114_v22 = vld [vmem:[%s10745_s6 + $0x8] sm:$0xf] }
 0x30a   : > { %2524 = vmatprep.subr.bf16.mxu1 %v2510_v45 }
 0x30d   : > { %2525 = vmatpush1.bf16.msra.mxu1 %v2509_v46 }
 0x314   : > { %8110 = vmatmul.mubr.msk.bf16.vlgmr.msra.gmra.mrb[0].mxu1 %vm1921_vm10, %v8960_v1 }
 0x315   : > { %2655 = vmatprep.mubr.bf16.mxu1 %v9394_v3 }
 0x3e7   : > { %v2556_v48 = vpop.f32.mrb[0].mxu1 }
 0x3e8   : > { %v2581_v50 = vadd.f32 %v2574_v47, %v2556_v48  ;;  %v2558_v0 = vpop.f32.mrb[1].mxu1 }
 0x3e9   : > { %v2582_v52 = vadd.f32 %v2574_v47, %v2558_v0  ;;  %v2560_v25 = vpop.f32.mrb[2].mxu1  ;;  %v8116_v47 = vld [vmem:[%s10745_s6 + $0xc] sm:$0xf] }
 0x3ea   : > { %v2583_v53 = vadd.f32 %v2579_v51, %v2560_v25  ;;  %v2562_v24 = vpop.f32.mrb[3].mxu1  ;;  %v2585_v55 = vmax.f32 %v2581_v50, 0.0  ;;  %v8118_v25 = vld [vmem:[%s10745_s6 + $0x10] sm:$0xf] }
 0x3eb   : > { %v2584_v54 = vadd.f32 %v2579_v51, %v2562_v24  ;;  %v2586_v57 = vmax.f32 %v2582_v52, 0.0 }
 0x3ec   : > { %v2587_v56 = vmax.f32 %v2583_v53, 0.0 }
 0x3ed   : > { %v2588_v59 = vmax.f32 %v2584_v54, 0.0 }
 0x3ee   : > { %v10067_v60 = vpack.c.bf16 %v2587_v56, %v2585_v55 }
 0x3ef   : > { %v2590_v62 = vpack.c.bf16 %v2588_v59, %v2586_v57  ;;  %v8120_v59 = vld [vmem:[%s10745_s6 + $0x14] sm:$0xf] }
 0x3f0   : > { %2608 = vrot.lane.b32.xlu0 %v10067_v60, %s10778_s23 }
 0x3f1   : > { %2606 = vrot.lane.b32.xlu1 %v2590_v62, %s10778_s23 }
 0x3f4   : > { %2595 = vrot.lane.b32.xlu0 %v10067_v60, %s10776_s24 }
 0x3f5   : > { %2592 = vrot.lane.b32.xlu1 %v2590_v62, %s10776_s24 }
 0x3f8   : > { %2710 = vrot.lane.b32.xlu0 %v10067_v60, %s10774_s25 }
 0x3f9   : > { %2708 = vrot.lane.b32.xlu1 %v2590_v62, %s10774_s25 }
 0x3fc   : > { %2770 = vrot.lane.b32.xlu0 %v10067_v60, %s10795_s2 }
 0x3fd   : > { %2768 = vrot.lane.b32.xlu1 %v2590_v62, %s10795_s2 }
 0x400   : > { %2878 = vrot.lane.b32.xlu0 %v2590_v62, %s10796_s0 }
 0x401   : > { %2876 = vrot.lane.b32.xlu1 %v10067_v60, %s10796_s0 }
 0x404   : > { %2938 = vrot.lane.b32.xlu0 %v2590_v62, %s10797_s26 }
 0x405   : > { %2936 = vrot.lane.b32.xlu1 %v10067_v60, %s10797_s26 }
 0x408   : > { %2998 = vrot.lane.b32.xlu0 %v2590_v62, %s10798_s28 }
 0x409   : > { %2996 = vrot.lane.b32.xlu1 %v10067_v60, %s10798_s28 }
 0x40c   : > { %3058 = vrot.lane.b32.xlu0 %v2590_v62, %s10799_s29 }
 0x40d   : > { %3056 = vrot.lane.b32.xlu1 %v10067_v60, %s10799_s29 }
 0x411   : > { %3119 = vperm.xlu1 %8932, %v3116_v63  }
 0x462   : > { %v2609_v5 = vpop.permute.xlu0 %2608 }
 0x463   : > { %v2607_v7 = vpop.permute.xlu1 %2606 }
 0x464   : > { %v2610_v9 = vsel %vm675_vm1, %v2609_v5, %v2607_v7  ;;  %v2614_v10 = vsel %vm675_vm1, %v2607_v7, %v2609_v5 }
 0x465   : > { %v2616_v11 = vmul.bf16 %v2614_v10, %v9659_v33  ;;  %v2617_v12 = vmul.bf16 %v2610_v9, %v9656_v32  ;;  %v8122_v10 = vld [vmem:[%s10745_s6 + $0x18] sm:$0xf] }
 0x466   : > { %v2596_v13 = vpop.permute.xlu0 %2595 }
 0x467   : > { %v2593_v15 = vpop.permute.xlu1 %2592  ;;  %2623 = vmatprep.subr.bf16.mxu1 %v2617_v12 }
 0x468   : > { %v2597_v17 = vsel %vm619_vm0, %v2596_v13, %v2593_v15  ;;  %v2601_v18 = vsel %vm619_vm0, %v2593_v15, %v2596_v13  ;;  %2624 = vmatpush1.bf16.msra.mxu1 %v2616_v11  ;;  %v8124_v15 = vld [vmem:[%s10745_s6 + $0x1c] sm:$0xf] }
 0x469   : > { %v2603_v21 = vmul.bf16 %v2601_v18, %v9650_v30  ;;  %v2604_v23 = vmul.bf16 %v2597_v17, %v9653_v31  ;;  %v8126_v18 = vld [vmem:[%s10745_s6 + $0x20] sm:$0xf] }
 0x46a   : > { %v2711_v26 = vpop.permute.xlu0 %2710 }
 0x46b   : > { %v2709_v28 = vpop.permute.xlu1 %2708  ;;  %8112 = vmatmul.mubr.msk.bf16.vlgmr.msra.gmra.mrb[4].mxu1 %vm675_vm1, %v8111_v19  ;;  %2667 = vmatprep.subr.bf16.mxu1 %v2604_v23  ;;  %v8961_v19 = vld [vmem:[#allocation2 + $0x40] sm:$0xff]  }
 0x46c   : > { %v2712_v29 = vsel %vm885_vm3, %v2711_v26, %v2709_v28  ;;  %2668 = vmatpush1.bf16.msra.mxu1 %v2603_v21  ;;  %2699 = vmatprep.mubr.bf16.mxu1 %v9394_v3  ;;  %v2716_v37 = vsel %vm885_vm3, %v2709_v28, %v2711_v26  ;;  %v8962_v21 = vld [vmem:[#allocation2] sm:$0xff]   ;;  %v8965_v28 = vld [vmem:[#allocation2 + $0x48] sm:$0xff]  }
 0x46d   : > { %v2719_v34 = vmul.bf16 %v2712_v29, %v9662_v36  ;;  %v2718_v42 = vmul.bf16 %v2716_v37, %v9693_v58  ;;  %8518 = vmatprep.subr.bf16.mxu0 %v8961_v19  ;;  %v8963_v23 = vld [vmem:[#allocation2 + $0xc0] sm:$0xff]   ;;  %v8966_v29 = vld [vmem:[#allocation2 + $0x8] sm:$0xff]   ;;  %v8969_v37 = vld [vmem:[#allocation2 + $0x50] sm:$0xff]  }
 0x46e   : > { %v2771_v2 = vpop.permute.xlu0 %2770  ;;  %v8964_v26 = vld [vmem:[#allocation2 + $0x80] sm:$0xff]   ;;  %8519 = vmatpush3.bf16.msra.mxu0 %v8962_v21 }
 0x46f   : > { %v2769_v38 = vpop.permute.xlu1 %2768  ;;  %2725 = vmatprep.subr.bf16.mxu1 %v2719_v34  ;;  %8520 = vmatprep.subr.bf16.mxu0 %v8965_v28  ;;  %v8967_v34 = vld [vmem:[#allocation2 + $0xc8] sm:$0xff]  }
 0x470   : > { %v2772_v39 = vsel %vm1026_vm5, %v2771_v2, %v2769_v38  ;;  %v2776_v43 = vsel %vm1026_vm5, %v2769_v38, %v2771_v2  ;;  %v8968_v2 = vld [vmem:[#allocation2 + $0x88] sm:$0xff]   ;;  %v8970_v38 = vld [vmem:[#allocation2 + $0x10] sm:$0xff]  }
 0x471   : > { %v2779_v14 = vmul.bf16 %v2772_v39, %v9715_v8  ;;  %v2778_v44 = vmul.bf16 %v2776_v43, %v9728_v16  ;;  %v8971_v39 = vld [vmem:[#allocation2 + $0xd0] sm:$0xff]   ;;  %v8975_v43 = vld [vmem:[#allocation2 + $0xd8] sm:$0xff]  }
 0x472   : > { %v2879_v45 = vpop.permute.xlu0 %2878  ;;  %8521 = vmatpush3.bf16.msra.mxu0 %v8966_v29 }
 0x473   : > { %8113 = vmatmul.mubr.msk.bf16.vlgmr.msra.gmra.mrb[8].mxu1 %vm675_vm1, %v2605_v41  ;;  %v2877_v46 = vpop.permute.xlu1 %2876  ;;  %8522 = vmatprep.subr.bf16.mxu0 %v8969_v37  ;;  %v8972_v41 = vld [vmem:[#allocation2 + $0x90] sm:$0xff]  }
 0x474   : > { %2726 = vmatpush1.bf16.msra.mxu1 %v2718_v42  ;;  %2757 = vmatprep.mubr.bf16.mxu1 %v9394_v3  ;;  %v2884_v1 = vsel %vm1255_vm6, %v2879_v45, %v2877_v46  ;;  %v2880_v51 = vsel %vm1255_vm6, %v2877_v46, %v2879_v45  ;;  %v8974_v42 = vld [vmem:[#allocation2 + $0x18] sm:$0xff]   ;;  %v8978_v45 = vld [vmem:[#allocation2 + $0x20] sm:$0xff]  }
 0x475   : > { %2785 = vmatprep.subr.bf16.mxu1 %v2779_v14  ;;  %v2887_v48 = vmul.bf16 %v2884_v1, %v9758_v35  ;;  %v2886_v53 = vmul.bf16 %v2880_v51, %v9773_v4  ;;  %v8973_v14 = vld [vmem:[#allocation2 + $0x58] sm:$0xff]   ;;  %v8979_v46 = vld [vmem:[#allocation2 + $0xe0] sm:$0xff]   ;;  %v8985_v51 = vld [vmem:[#allocation2 + $0x70] sm:$0xff]  }
 0x476   : > { %v2939_v50 = vpop.permute.xlu0 %2938  ;;  %8523 = vmatpush3.bf16.msra.mxu0 %v8970_v38  ;;  %v8980_v1 = vld [vmem:[#allocation2 + $0xa0] sm:$0xff]  }
 0x477   : > { %v2937_v0 = vpop.permute.xlu1 %2936  ;;  %8524 = vmatprep.subr.bf16.mxu0 %v8973_v14 }
 0x478   : > { %v2944_v52 = vsel %vm1396_vm7, %v2939_v50, %v2937_v0  ;;  %v2940_v56 = vsel %vm1396_vm7, %v2937_v0, %v2939_v50  ;;  %v8983_v50 = vld [vmem:[#allocation2 + $0xe8] sm:$0xff]  }
 0x479   : > { %v2947_v24 = vmul.bf16 %v2944_v52, %v9780_v49  ;;  %v8984_v0 = vld [vmem:[#allocation2 + $0xa8] sm:$0xff]   ;;  %v8986_v52 = vld [vmem:[#allocation2 + $0x30] sm:$0xff]  }
 0x47a   : > { %v2999_v54 = vpop.permute.xlu0 %2998  ;;  %8525 = vmatpush3.bf16.msra.mxu0 %v8974_v42 }
 0x47b   : > { %8115 = vmatmul.mubr.msk.bf16.vlgmr.msra.gmra.mrb[12].mxu1 %vm675_vm1, %v8114_v22  ;;  %v2997_v55 = vpop.permute.xlu1 %2996  ;;  %v8976_v22 = vld [vmem:[#allocation2 + $0x98] sm:$0xff]  }
 0x47c   : > { %2786 = vmatpush1.bf16.msra.mxu1 %v2778_v44  ;;  %2817 = vmatprep.mubr.bf16.mxu1 %v9394_v3  ;;  %v3004_v57 = vsel %vm1537_vm8, %v2999_v54, %v2997_v55  ;;  %v3000_v7 = vsel %vm1537_vm8, %v2997_v55, %v2999_v54  ;;  %v8977_v44 = vld [vmem:[#allocation2 + $0x60] sm:$0xff]   ;;  %v8990_v54 = vld [vmem:[#allocation2 + $0x38] sm:$0xff]  }
 0x47d   : > { %2833 = vmatprep.subr.bf16.mxu1 %v2590_v62  ;;  %v3007_v62 = vmul.bf16 %v3004_v57, %v9807_v6  ;;  %v3006_v11 = vmul.bf16 %v3000_v7, %v9827_v20  ;;  %8526 = vmatprep.subr.bf16.mxu0 %v8977_v44  ;;  %v8991_v55 = vld [vmem:[#allocation2 + $0xf8] sm:$0xff]   ;;  %v8993_v57 = vld [vmem:[#allocation2 + $0x140] sm:$0xff]  }
 0x47e   : > { %v3059_v63 = vpop.permute.xlu0 %3058  ;;  %8527 = vmatpush3.bf16.msra.mxu0 %v8978_v45 }
 0x47f   : > { %v3057_v5 = vpop.permute.xlu1 %3056 }
 0x480   : > { %v3064_v9 = vsel %vm1678_vm9, %v3059_v63, %v3057_v5  ;;  %v3060_v13 = vsel %vm1678_vm9, %v3057_v5, %v3059_v63 }
 0x481   : > { %v3067_v12 = vmul.bf16 %v3064_v9, %v9834_v27  ;;  %v3066_v17 = vmul.bf16 %v3060_v13, %v9850_v40 }
 0x483   : > { %8117 = vmatmul.mubr.msk.bf16.vlgmr.msra.gmra.mrb[16].mxu1 %vm675_vm1, %v8116_v47  ;;  %v8981_v47 = vld [vmem:[#allocation2 + $0x68] sm:$0xff]  }
 0x484   : > { %2834 = vmatpush1.bf16.msra.mxu1 %v10067_v60  ;;  %2865 = vmatprep.mubr.bf16.mxu1 %v9394_v3  ;;  %v2946_v60 = vmul.bf16 %v2940_v56, %v9800_v61  ;;  %v8992_v56 = vld [vmem:[#allocation2 + $0xb8] sm:$0xff]  }
 0x485   : > { %2893 = vmatprep.subr.bf16.mxu1 %v2887_v48  ;;  %v8982_v48 = vld [vmem:[#allocation2 + $0x28] sm:$0xff]   ;;  %8528 = vmatprep.subr.bf16.mxu0 %v8981_v47 }
 0x486   : > { %8529 = vmatpush3.bf16.msra.mxu0 %v8982_v48 }
 0x487   : > { %8530 = vmatprep.subr.bf16.mxu0 %v8985_v51 }
 0x48a   : > { %8531 = vmatpush3.bf16.msra.mxu0 %v8986_v52 }
 0x48b   : > { %8119 = vmatmul.mubr.msk.bf16.vlgmr.msra.gmra.mrb[20].mxu1 %vm675_vm1, %v8118_v25  ;;  %v8987_v25 = vld [vmem:[#allocation2 + $0xf0] sm:$0xff]  }
 0x48c   : > { %2894 = vmatpush1.bf16.msra.mxu1 %v2886_v53  ;;  %2925 = vmatprep.mubr.bf16.mxu1 %v9394_v3  ;;  %v8988_v53 = vld [vmem:[#allocation2 + $0xb0] sm:$0xff]  }
 0x48d   : > { %2953 = vmatprep.subr.bf16.mxu1 %v2947_v24  ;;  %v8989_v24 = vld [vmem:[#allocation2 + $0x78] sm:$0xff]  }
 0x48e   : > { %8532 = vmatprep.subr.bf16.mxu0 %v8989_v24 }
 0x48f   : > { %8533 = vmatpush3.bf16.msra.mxu0 %v8990_v54 }
 0x490   : > { %8562 = vmatprep.subr.bf16.mxu0 %v8993_v57 }
 0x493   : > { %8121 = vmatmul.mubr.msk.bf16.vlgmr.msra.gmra.mrb[24].mxu1 %vm675_vm1, %v8120_v59  ;;  %v8995_v59 = vld [vmem:[#allocation2 + $0x1c0] sm:$0xff]  }
 0x494   : > { %2954 = vmatpush1.bf16.msra.mxu1 %v2946_v60  ;;  %2985 = vmatprep.mubr.bf16.mxu1 %v9394_v3 }
 0x495   : > { %3013 = vmatprep.subr.bf16.mxu1 %v3007_v62 }
 0x49b   : > { %8123 = vmatmul.mubr.msk.bf16.vlgmr.msra.gmra.mrb[28].mxu1 %vm675_vm1, %v8122_v10 }
 0x49c   : > { %3014 = vmatpush1.bf16.msra.mxu1 %v3006_v11  ;;  %3045 = vmatprep.mubr.bf16.mxu1 %v9394_v3 }
 0x49d   : > { %3073 = vmatprep.subr.bf16.mxu1 %v3067_v12 }
 0x4a3   : > { %8125 = vmatmul.mubr.msk.bf16.vlgmr.msra.gmra.mrb[32].mxu1 %vm675_vm1, %v8124_v15 }
 0x4a4   : > { %3074 = vmatpush1.bf16.msra.mxu1 %v3066_v17  ;;  %3105 = vmatprep.mubr.bf16.mxu1 %v9394_v3 }
 0x4a5   : > { %8540 = vmatprep.subr.bf16.mxu1 %v8963_v23 }
 0x4ab   : > { %8127 = vmatmul.mubr.msk.bf16.vlgmr.msra.gmra.mrb[36].mxu1 %vm675_vm1, %v8126_v18 }
 0x4ac   : > { %8541 = vmatpush3.bf16.msra.mxu1 %v8964_v26 }
 0x4ad   : > { %8542 = vmatprep.subr.bf16.mxu1 %v8967_v34 }
 0x4b0   : > { %8543 = vmatpush3.bf16.msra.mxu1 %v8968_v2 }
 0x4b1   : > { %8544 = vmatprep.subr.bf16.mxu1 %v8971_v39 }
 0x4b4   : > { %8545 = vmatpush3.bf16.msra.mxu1 %v8972_v41 }
 0x4b5   : > { %8546 = vmatprep.subr.bf16.mxu1 %v8975_v43 }
 0x4b8   : > { %8547 = vmatpush3.bf16.msra.mxu1 %v8976_v22 }
 0x4b9   : > { %8548 = vmatprep.subr.bf16.mxu1 %v8979_v46 }
 0x4bc   : > { %8549 = vmatpush3.bf16.msra.mxu1 %v8980_v1 }
 0x4bd   : > { %8550 = vmatprep.subr.bf16.mxu1 %v8983_v50 }
 0x4c0   : > { %8551 = vmatpush3.bf16.msra.mxu1 %v8984_v0 }
 0x4c1   : > { %8552 = vmatprep.subr.bf16.mxu1 %v8987_v25 }
 0x4c4   : > { %8553 = vmatpush3.bf16.msra.mxu1 %v8988_v53 }
 0x4c5   : > { %8554 = vmatprep.subr.bf16.mxu1 %v8991_v55 }
 0x4c8   : > { %8555 = vmatpush3.bf16.msra.mxu1 %v8992_v56 }
 0x4c9   : > { %8584 = vmatprep.subr.bf16.mxu1 %v8995_v59 }
 0x53e   : > { %v2657_v60 = vpop.f32.mrb[4].mxu1 }
 0x53f   : > { %v2659_v62 = vpop.f32.mrb[5].mxu1 }
 0x540   : > { %v2661_v63 = vpop.f32.mrb[6].mxu1 }
 0x541   : > { %v2662_v5 = vpop.f32.mrb[7].mxu1  ;;  %v3120_v63 = vpop.permute.xlu1 %3119 }
 0x546   : > { %v2701_v7 = vpop.f32.mrb[8].mxu1 }
 0x547   : > { %v2702_v9 = vadd.f32 %v2701_v7, %v2657_v60  ;;  %v2703_v10 = vpop.f32.mrb[9].mxu1 }
 0x548   : > { %v2704_v11 = vadd.f32 %v2703_v10, %v2659_v62  ;;  %v2705_v12 = vpop.f32.mrb[10].mxu1 }
 0x549   : > { %v2706_v13 = vpop.f32.mrb[11].mxu1 }
 0x54e   : > { %v2759_v15 = vpop.f32.mrb[12].mxu1 }
 0x54f   : > { %v2766_v17 = vadd.f32 %v2759_v15, %v2702_v9  ;;  %v2761_v18 = vpop.f32.mrb[13].mxu1 }
 0x550   : > { %v2767_v19 = vadd.f32 %v2761_v18, %v2704_v11  ;;  %v2763_v21 = vpop.f32.mrb[14].mxu1  ;;  %v8994_v18 = vld [vmem:[#allocation2 + $0x100] sm:$0xff]  }
 0x551   : > { %v2764_v23 = vpop.f32.mrb[15].mxu1 }
 0x552   : > { %v8996_v23 = vld [vmem:[#allocation2 + $0x180] sm:$0xff]  }
 0x556   : > { %v2819_v26 = vpop.f32.mrb[16].mxu1 }
 0x557   : > { %v2826_v28 = vadd.f32 %v2819_v26, %v2766_v17  ;;  %v2821_v29 = vpop.f32.mrb[17].mxu1  ;;  %v8997_v26 = vld [vmem:[#allocation2 + $0x148] sm:$0xff]  }
 0x558   : > { %v2827_v34 = vadd.f32 %v2821_v29, %v2767_v19  ;;  %v2823_v2 = vpop.f32.mrb[18].mxu1  ;;  %v8999_v29 = vld [vmem:[#allocation2 + $0x1c8] sm:$0xff]  }
 0x559   : > { %v2824_v37 = vpop.f32.mrb[19].mxu1  ;;  %v8998_v2 = vld [vmem:[#allocation2 + $0x108] sm:$0xff]  }
 0x55a   : > { %v9001_v37 = vld [vmem:[#allocation2 + $0x150] sm:$0xff]  }
 0x55e   : > { %v2867_v38 = vpop.f32.mrb[20].mxu1 }
 0x55f   : > { %v2874_v39 = vadd.f32 %v2867_v38, %v2826_v28  ;;  %v2869_v41 = vpop.f32.mrb[21].mxu1  ;;  %v9000_v38 = vld [vmem:[#allocation2 + $0x188] sm:$0xff]  }
 0x560   : > { %v2875_v14 = vadd.f32 %v2869_v41, %v2827_v34  ;;  %v2871_v42 = vpop.f32.mrb[22].mxu1  ;;  %v9002_v41 = vld [vmem:[#allocation2 + $0x110] sm:$0xff]  }
 0x561   : > { %v2872_v43 = vpop.f32.mrb[23].mxu1  ;;  %v9004_v42 = vld [vmem:[#allocation2 + $0x190] sm:$0xff]  }
 0x562   : > { %v9007_v43 = vld [vmem:[#allocation2 + $0x1d8] sm:$0xff]  }
 0x566   : > { %v2927_v22 = vpop.f32.mrb[24].mxu1 }
 0x567   : > { %v2934_v44 = vadd.f32 %v2927_v22, %v2874_v39  ;;  %v2929_v45 = vpop.f32.mrb[25].mxu1  ;;  %v9003_v39 = vld [vmem:[#allocation2 + $0x1d0] sm:$0xff]   ;;  %v9006_v22 = vld [vmem:[#allocation2 + $0x118] sm:$0xff]  }
 0x568   : > { %v2935_v46 = vadd.f32 %v2929_v45, %v2875_v14  ;;  %v2931_v1 = vpop.f32.mrb[26].mxu1  ;;  %v9005_v14 = vld [vmem:[#allocation2 + $0x158] sm:$0xff]  }
 0x569   : > { %v2932_v47 = vpop.f32.mrb[27].mxu1  ;;  %v9008_v45 = vld [vmem:[#allocation2 + $0x198] sm:$0xff]   ;;  %v9010_v1 = vld [vmem:[#allocation2 + $0x120] sm:$0xff]  }
 0x56a   : > { %v9013_v47 = vld [vmem:[#allocation2 + $0x168] sm:$0xff]  }
 0x56e   : > { %v2987_v48 = vpop.f32.mrb[28].mxu1 }
 0x56f   : > { %v2994_v50 = vadd.f32 %v2987_v48, %v2934_v44  ;;  %v2989_v0 = vpop.f32.mrb[29].mxu1  ;;  %v9009_v44 = vld [vmem:[#allocation2 + $0x160] sm:$0xff]  }
 0x570   : > { %v2995_v51 = vadd.f32 %v2989_v0, %v2935_v46  ;;  %v2991_v52 = vpop.f32.mrb[30].mxu1  ;;  %v9011_v46 = vld [vmem:[#allocation2 + $0x1e0] sm:$0xff]   ;;  %v9014_v0 = vld [vmem:[#allocation2 + $0x128] sm:$0xff]  }
 0x571   : > { %v2992_v25 = vpop.f32.mrb[31].mxu1  ;;  %v9012_v48 = vld [vmem:[#allocation2 + $0x1a0] sm:$0xff]   ;;  %v9016_v52 = vld [vmem:[#allocation2 + $0x1a8] sm:$0xff]  }
 0x572   : > { %v9019_v25 = vld [vmem:[#allocation2 + $0x1f0] sm:$0xff]  }
 0x576   : > { %v3047_v53 = vpop.f32.mrb[32].mxu1 }
 0x577   : > { %v3054_v24 = vadd.f32 %v3047_v53, %v2994_v50  ;;  %v3049_v54 = vpop.f32.mrb[33].mxu1  ;;  %v9015_v50 = vld [vmem:[#allocation2 + $0x1e8] sm:$0xff]   ;;  %v9018_v53 = vld [vmem:[#allocation2 + $0x130] sm:$0xff]  }
 0x578   : > { %v3055_v55 = vadd.f32 %v3049_v54, %v2995_v51  ;;  %v3051_v56 = vpop.f32.mrb[34].mxu1  ;;  %v9017_v51 = vld [vmem:[#allocation2 + $0x170] sm:$0xff]  }
 0x579   : > { %v3052_v57 = vpop.f32.mrb[35].mxu1  ;;  %v9020_v54 = vld [vmem:[#allocation2 + $0x1b0] sm:$0xff]   ;;  %v9022_v56 = vld [vmem:[#allocation2 + $0x138] sm:$0xff]  }
 0x57a   : > { %v9025_v57 = vld [vmem:[#allocation2 + $0x240] sm:$0xff]  }
 0x57e   : > { %v3107_v59 = vpop.f32.mrb[36].mxu1 }
 0x57f   : > { %v3114_v60 = vadd.f32 %v3107_v59, %v3054_v24  ;;  %v3109_v62 = vpop.f32.mrb[37].mxu1  ;;  %v9021_v24 = vld [vmem:[#allocation2 + $0x178] sm:$0xff]  }
 0x580   : > { %v3115_v5 = vadd.f32 %v3109_v62, %v3055_v55  ;;  %v3111_v7 = vpop.f32.mrb[38].mxu1  ;;  %v9023_v55 = vld [vmem:[#allocation2 + $0x1f8] sm:$0xff]   ;;  %v9026_v62 = vld [vmem:[#allocation2 + $0x200] sm:$0xff]  }
 0x581   : > { %v3122_v9 = vadd.f32 %v3120_v63, %v3114_v60  ;;  %v3112_v10 = vpop.f32.mrb[39].mxu1  ;;  %v9024_v59 = vld [vmem:[#allocation2 + $0x1b8] sm:$0xff]   ;;  %v9027_v60 = vld [vmem:[#allocation2 + $0x2c0] sm:$0xff]  }
 0x582   : > { %v3123_v11 = vadd.f32 %v3120_v63, %v3115_v5  ;;  %v9029_v5 = vld [vmem:[#allocation2 + $0x248] sm:$0xff]  }
 0x583   : > { %v3124_v12 = vmax.f32 %v3122_v9, 0.0  ;;  %v9028_v9 = vld [vmem:[#allocation2 + $0x280] sm:$0xff]  }
 0x584   : > { %v3125_v13 = vmax.f32 %v3123_v11, 0.0  ;;  %v9031_v11 = vld [vmem:[#allocation2 + $0x2c8] sm:$0xff]  }
 0x585   : > { %v10173_v15 = vpack.c.bf16 %v3124_v12, %v3124_v12 }
 0x586   : > { %v10175_v17 = vpack.c.bf16 %v3125_v13, %v3125_v13  ;;  %v9030_v13 = vld [vmem:[#allocation2 + $0x208] sm:$0xff]  }
 0x587   : > { %v10184_v28 = vshrl.u32 %v10173_v15, 16  ;;  %v3511_v63 = vrot.slane %v10173_v15, 1 }
 0x588   : > { %3289 = vmatprep.mubr.bf16.mxu0 %v10175_v17  ;;  %v10179_v19 = vshrl.u32 %v10175_v17, 16  ;;  %v3512_v21 = vrot.slane %v10175_v17, 1  ;;  %v3860_v7 = vrot.slane %v10175_v17, 2 }
 0x589   : > { %3290 = vmatmul.mubr.bf16.vlgmr.msra.gmra.mrb[8].mxu0 %v10173_v15  ;;  %v3685_v10 = vrot.slane %v10184_v28, 1 }
 0x58a   : > { %8563 = vmatpush3.bf16.msra.mxu0 %v8994_v18  ;;  %3467 = vmatprep.mubr.bf16.mxu1 %v10179_v19  ;;  %v3686_v34 = vrot.slane %v10179_v19, 1  ;;  %v4034_v12 = vrot.slane %v10179_v19, 2  ;;  %v9033_v18 = vld [vmem:[#allocation2 + $0x250] sm:$0xff]  }
 0x58b   : > { %3643 = vmatprep.mubr.bf16.mxu0 %v3512_v21  ;;  %3468 = vmatmul.mubr.bf16.vlgmr.msra.gmra.mrb[40].mxu1 %v10184_v28  ;;  %v9032_v21 = vld [vmem:[#allocation2 + $0x288] sm:$0xff]  }
 0x58c   : > { %8585 = vmatpush3.bf16.msra.mxu1 %v8996_v23  ;;  %8564 = vmatprep.subr.bf16.mxu0 %v8997_v26  ;;  %v9035_v23 = vld [vmem:[#allocation2 + $0x2d0] sm:$0xff]  }
 0x58d   : > { %3817 = vmatprep.mubr.bf16.mxu1 %v3686_v34  ;;  %8586 = vmatprep.subr.bf16.mxu1 %v8999_v29  ;;  %v9034_v26 = vld [vmem:[#allocation2 + $0x210] sm:$0xff]   ;;  %v9037_v29 = vld [vmem:[#allocation2 + $0x258] sm:$0xff]  }
 0x58e   : > { %8565 = vmatpush3.bf16.msra.mxu0 %v8998_v2  ;;  %v9036_v34 = vld [vmem:[#allocation2 + $0x290] sm:$0xff]   ;;  %v9039_v2 = vld [vmem:[#allocation2 + $0x2d8] sm:$0xff]  }
 0x58f   : > { %8566 = vmatprep.subr.bf16.mxu0 %v9001_v37  ;;  %v9038_v37 = vld [vmem:[#allocation2 + $0x218] sm:$0xff]  }
 0x590   : > { %8587 = vmatpush3.bf16.msra.mxu1 %v9000_v38  ;;  %v9041_v38 = vld [vmem:[#allocation2 + $0x260] sm:$0xff]  }
 0x591   : > { %8588 = vmatprep.subr.bf16.mxu1 %v9003_v39  ;;  %v9040_v39 = vld [vmem:[#allocation2 + $0x298] sm:$0xff]  }
 0x592   : > { %8567 = vmatpush3.bf16.msra.mxu0 %v9002_v41  ;;  %v9043_v41 = vld [vmem:[#allocation2 + $0x2e0] sm:$0xff]  }
 0x593   : > { %8568 = vmatprep.subr.bf16.mxu0 %v9005_v14  ;;  %v9042_v14 = vld [vmem:[#allocation2 + $0x220] sm:$0xff]  }
 0x594   : > { %8589 = vmatpush3.bf16.msra.mxu1 %v9004_v42  ;;  %v9045_v42 = vld [vmem:[#allocation2 + $0x268] sm:$0xff]  }
 0x595   : > { %8590 = vmatprep.subr.bf16.mxu1 %v9007_v43  ;;  %v9044_v43 = vld [vmem:[#allocation2 + $0x2a0] sm:$0xff]  }
 0x596   : > { %8569 = vmatpush3.bf16.msra.mxu0 %v9006_v22  ;;  %v9047_v22 = vld [vmem:[#allocation2 + $0x2e8] sm:$0xff]  }
 0x597   : > { %8570 = vmatprep.subr.bf16.mxu0 %v9009_v44  ;;  %v9046_v44 = vld [vmem:[#allocation2 + $0x228] sm:$0xff]  }
 0x598   : > { %8591 = vmatpush3.bf16.msra.mxu1 %v9008_v45  ;;  %v9049_v45 = vld [vmem:[#allocation2 + $0x270] sm:$0xff]  }
 0x599   : > { %8592 = vmatprep.subr.bf16.mxu1 %v9011_v46  ;;  %v9048_v46 = vld [vmem:[#allocation2 + $0x2a8] sm:$0xff]  }
 0x59a   : > { %8571 = vmatpush3.bf16.msra.mxu0 %v9010_v1  ;;  %v9051_v1 = vld [vmem:[#allocation2 + $0x2f0] sm:$0xff]  }
 0x59b   : > { %8572 = vmatprep.subr.bf16.mxu0 %v9013_v47  ;;  %v9050_v47 = vld [vmem:[#allocation2 + $0x230] sm:$0xff]  }
 0x59c   : > { %8593 = vmatpush3.bf16.msra.mxu1 %v9012_v48  ;;  %v9053_v48 = vld [vmem:[#allocation2 + $0x278] sm:$0xff]  }
 0x59d   : > { %8594 = vmatprep.subr.bf16.mxu1 %v9015_v50  ;;  %v9052_v50 = vld [vmem:[#allocation2 + $0x2b0] sm:$0xff]  }
 0x59e   : > { %8573 = vmatpush3.bf16.msra.mxu0 %v9014_v0  ;;  %v9055_v0 = vld [vmem:[#allocation2 + $0x2f8] sm:$0xff]  }
 0x59f   : > { %8574 = vmatprep.subr.bf16.mxu0 %v9017_v51  ;;  %v9054_v51 = vld [vmem:[#allocation2 + $0x238] sm:$0xff]  }
 0x5a0   : > { %8595 = vmatpush3.bf16.msra.mxu1 %v9016_v52  ;;  %v9057_v52 = vld [vmem:[#allocation2 + $0x340] sm:$0xff]  }
 0x5a1   : > { %8596 = vmatprep.subr.bf16.mxu1 %v9019_v25  ;;  %v9056_v25 = vld [vmem:[#allocation2 + $0x2b8] sm:$0xff]  }
 0x5a2   : > { %8575 = vmatpush3.bf16.msra.mxu0 %v9018_v53  ;;  %v9059_v53 = vld [vmem:[#allocation2 + $0x3c0] sm:$0xff]  }
 0x5a3   : > { %8576 = vmatprep.subr.bf16.mxu0 %v9021_v24  ;;  %v9058_v24 = vld [vmem:[#allocation2 + $0x300] sm:$0xff]  }
 0x5a4   : > { %8597 = vmatpush3.bf16.msra.mxu1 %v9020_v54  ;;  %v3859_v54 = vrot.slane %v10173_v15, 2 }
 0x5a5   : > { %8598 = vmatprep.subr.bf16.mxu1 %v9023_v55  ;;  %v9061_v55 = vld [vmem:[#allocation2 + $0x348] sm:$0xff]  }
 0x5a6   : > { %8577 = vmatpush3.bf16.msra.mxu0 %v9022_v56  ;;  %v4208_v56 = vrot.slane %v10175_v17, 3  ;;  %v9066_v17 = vld [vmem:[#allocation2 + $0x310] sm:$0xff]  }
 0x5a7   : > { %8606 = vmatprep.subr.bf16.mxu0 %v9025_v57  ;;  %v9060_v57 = vld [vmem:[#allocation2 + $0x380] sm:$0xff]  }
 0x5a8   : > { %8599 = vmatpush3.bf16.msra.mxu1 %v9024_v59  ;;  %v4033_v59 = vrot.slane %v10184_v28, 2 }
 0x5a9   : > { %3644 = vmatmul.mubr.bf16.vlgmr.msra.gmra.mrb[12].mxu0 %v3511_v63  ;;  %8628 = vmatprep.subr.bf16.mxu1 %v9027_v60  ;;  %v9063_v60 = vld [vmem:[#allocation2 + $0x3c8] sm:$0xff]  }
 0x5aa   : > { %8607 = vmatpush3.bf16.msra.mxu0 %v9026_v62  ;;  %3991 = vmatprep.mubr.bf16.mxu0 %v3860_v7  ;;  %v4382_v62 = vrot.slane %v10179_v19, 3  ;;  %v9062_v63 = vld [vmem:[#allocation2 + $0x308] sm:$0xff]   ;;  %v9073_v19 = vld [vmem:[#allocation2 + $0x360] sm:$0xff]  }
 0x5ab   : > { %3818 = vmatmul.mubr.bf16.vlgmr.msra.gmra.mrb[44].mxu1 %v3685_v10  ;;  %8608 = vmatprep.subr.bf16.mxu0 %v9029_v5  ;;  %v9065_v5 = vld [vmem:[#allocation2 + $0x350] sm:$0xff]   ;;  %v9064_v7 = vld [vmem:[#allocation2 + $0x388] sm:$0xff]   ;;  %v9069_v10 = vld [vmem:[#allocation2 + $0x358] sm:$0xff]  }
 0x5ac   : > { %8629 = vmatpush3.bf16.msra.mxu1 %v9028_v9  ;;  %4165 = vmatprep.mubr.bf16.mxu1 %v4034_v12  ;;  %v9067_v9 = vld [vmem:[#allocation2 + $0x3d0] sm:$0xff]   ;;  %v9071_v12 = vld [vmem:[#allocation2 + $0x3d8] sm:$0xff]  }
 0x5ad   : > { %8630 = vmatprep.subr.bf16.mxu1 %v9031_v11  ;;  %v9068_v11 = vld [vmem:[#allocation2 + $0x390] sm:$0xff]  }
 0x5ae   : > { %8609 = vmatpush3.bf16.msra.mxu0 %v9030_v13  ;;  %v9070_v13 = vld [vmem:[#allocation2 + $0x318] sm:$0xff]  }
 0x5af   : > { %8610 = vmatprep.subr.bf16.mxu0 %v9033_v18  ;;  %v9072_v18 = vld [vmem:[#allocation2 + $0x398] sm:$0xff]  }
 0x5b0   : > { %8631 = vmatpush3.bf16.msra.mxu1 %v9032_v21  ;;  %v9075_v21 = vld [vmem:[#allocation2 + $0x3e0] sm:$0xff]  }
 0x5b1   : > { %8632 = vmatprep.subr.bf16.mxu1 %v9035_v23  ;;  %v9074_v23 = vld [vmem:[#allocation2 + $0x320] sm:$0xff]  }
 0x5b2   : > { %8611 = vmatpush3.bf16.msra.mxu0 %v9034_v26  ;;  %v9077_v26 = vld [vmem:[#allocation2 + $0x368] sm:$0xff]  }
 0x5b3   : > { %8612 = vmatprep.subr.bf16.mxu0 %v9037_v29  ;;  %v9076_v29 = vld [vmem:[#allocation2 + $0x3a0] sm:$0xff]  }
 0x5b4   : > { %8633 = vmatpush3.bf16.msra.mxu1 %v9036_v34  ;;  %v9079_v34 = vld [vmem:[#allocation2 + $0x3e8] sm:$0xff]  }
 0x5b5   : > { %8634 = vmatprep.subr.bf16.mxu1 %v9039_v2  ;;  %v9078_v2 = vld [vmem:[#allocation2 + $0x328] sm:$0xff]  }
 0x5b6   : > { %8613 = vmatpush3.bf16.msra.mxu0 %v9038_v37  ;;  %v9081_v37 = vld [vmem:[#allocation2 + $0x370] sm:$0xff]  }
 0x5b7   : > { %8614 = vmatprep.subr.bf16.mxu0 %v9041_v38  ;;  %v9080_v38 = vld [vmem:[#allocation2 + $0x3a8] sm:$0xff]  }
 0x5b8   : > { %8635 = vmatpush3.bf16.msra.mxu1 %v9040_v39  ;;  %v9083_v39 = vld [vmem:[#allocation2 + $0x3f0] sm:$0xff]  }
 0x5b9   : > { %8636 = vmatprep.subr.bf16.mxu1 %v9043_v41  ;;  %v9082_v41 = vld [vmem:[#allocation2 + $0x330] sm:$0xff]  }
 0x5ba   : > { %8615 = vmatpush3.bf16.msra.mxu0 %v9042_v14  ;;  %v9085_v14 = vld [vmem:[#allocation2 + $0x378] sm:$0xff]  }
 0x5bb   : > { %8616 = vmatprep.subr.bf16.mxu0 %v9045_v42  ;;  %v9084_v42 = vld [vmem:[#allocation2 + $0x3b0] sm:$0xff]  }
 0x5bc   : > { %8637 = vmatpush3.bf16.msra.mxu1 %v9044_v43  ;;  %v9087_v43 = vld [vmem:[#allocation2 + $0x3f8] sm:$0xff]  }
 0x5bd   : > { %8638 = vmatprep.subr.bf16.mxu1 %v9047_v22  ;;  %v9086_v22 = vld [vmem:[#allocation2 + $0x338] sm:$0xff]  }
 0x5be   : > { %8617 = vmatpush3.bf16.msra.mxu0 %v9046_v44  ;;  %v9088_v44 = vld [vmem:[#allocation2 + $0x3b8] sm:$0xff]  }
 0x5bf   : > { %8618 = vmatprep.subr.bf16.mxu0 %v9049_v45  ;;  %v4207_v45 = vrot.slane %v10173_v15, 3  ;;  %v9098_v15 = vld [vmem:[#allocation4 + $0x90] ss:$8 sps:$4 sm:$0xff]  }
 0x5c0   : > { %8639 = vmatpush3.bf16.msra.mxu1 %v9048_v46  ;;  %v4381_v46 = vrot.slane %v10184_v28, 3  ;;  %v9106_v28 = vld [vmem:[#allocation4 + $0xa4] ss:$8 sps:$4 sm:$0xff]  }
 0x5c1   : > { %8640 = vmatprep.subr.bf16.mxu1 %v9051_v1  ;;  %v9089_v1 = vld [vmem:[#allocation4] ss:$8 sps:$4 sm:$0xff]  }
 0x5c2   : > { %8619 = vmatpush3.bf16.msra.mxu0 %v9050_v47  ;;  %v9091_v47 = vld [vmem:[#allocation4 + $0x4] ss:$8 sps:$4 sm:$0xff]  }
 0x5c3   : > { %8620 = vmatprep.subr.bf16.mxu0 %v9053_v48  ;;  %v9092_v48 = vld [vmem:[#allocation4 + $0x80] ss:$8 sps:$4 sm:$0xff]  }
 0x5c4   : > { %8641 = vmatpush3.bf16.msra.mxu1 %v9052_v50  ;;  %v9094_v50 = vld [vmem:[#allocation4 + $0x84] ss:$8 sps:$4 sm:$0xff]  }
 0x5c5   : > { %8642 = vmatprep.subr.bf16.mxu1 %v9055_v0  ;;  %v9097_v0 = vld [vmem:[#allocation4 + $0x14] ss:$8 sps:$4 sm:$0xff]  }
 0x5c6   : > { %8621 = vmatpush3.bf16.msra.mxu0 %v9054_v51  ;;  %v9100_v51 = vld [vmem:[#allocation4 + $0x94] ss:$8 sps:$4 sm:$0xff]  }
 0x5c7   : > { %8650 = vmatprep.subr.bf16.mxu0 %v9057_v52  ;;  %v9095_v52 = vld [vmem:[#allocation4 + $0x10] ss:$8 sps:$4 sm:$0xff]  }
 0x5c8   : > { %8643 = vmatpush3.bf16.msra.mxu1 %v9056_v25  ;;  %v9103_v25 = vld [vmem:[#allocation4 + $0x24] ss:$8 sps:$4 sm:$0xff]  }
 0x5c9   : > { %3992 = vmatmul.mubr.bf16.vlgmr.msra.gmra.mrb[16].mxu0 %v3859_v54  ;;  %8672 = vmatprep.subr.bf16.mxu1 %v9059_v53  ;;  %v9101_v53 = vld [vmem:[#allocation4 + $0x20] ss:$8 sps:$4 sm:$0xff]   ;;  %v9109_v54 = vld [vmem:[#allocation4 + $0x34] ss:$8 sps:$4 sm:$0xff]  }
 0x5ca   : > { %8651 = vmatpush3.bf16.msra.mxu0 %v9058_v24  ;;  %4339 = vmatprep.mubr.bf16.mxu0 %v4208_v56  ;;  %v9104_v24 = vld [vmem:[#allocation4 + $0xa0] ss:$8 sps:$4 sm:$0xff]   ;;  %v9107_v56 = vld [vmem:[#allocation4 + $0x30] ss:$8 sps:$4 sm:$0xff]  }
 0x5cb   : > { %4166 = vmatmul.mubr.bf16.vlgmr.msra.gmra.mrb[48].mxu1 %v4033_v59  ;;  %8652 = vmatprep.subr.bf16.mxu0 %v9061_v55  ;;  %v9112_v55 = vld [vmem:[#allocation4 + $0xb4] ss:$8 sps:$4 sm:$0xff]   ;;  %v9115_v59 = vld [vmem:[#allocation4 + $0x44] ss:$8 sps:$4 sm:$0xff]  }
 0x5cc   : > { %8673 = vmatpush3.bf16.msra.mxu1 %v9060_v57  ;;  %4513 = vmatprep.mubr.bf16.mxu1 %v4382_v62  ;;  %v9110_v57 = vld [vmem:[#allocation4 + $0xb0] ss:$8 sps:$4 sm:$0xff]   ;;  %v9113_v62 = vld [vmem:[#allocation4 + $0x40] ss:$8 sps:$4 sm:$0xff]  }
 0x5cd   : > { %8674 = vmatprep.subr.bf16.mxu1 %v9063_v60  ;;  %v9118_v60 = vld [vmem:[#allocation4 + $0xc4] ss:$8 sps:$4 sm:$0xff]  }
 0x5ce   : > { %8653 = vmatpush3.bf16.msra.mxu0 %v9062_v63  ;;  %v9116_v63 = vld [vmem:[#allocation4 + $0xc0] ss:$8 sps:$4 sm:$0xff]  }
 0x5cf   : > { %8654 = vmatprep.subr.bf16.mxu0 %v9065_v5  ;;  %v9121_v5 = vld [vmem:[#allocation4 + $0x54] ss:$8 sps:$4 sm:$0xff]  }
 0x5d0   : > { %8675 = vmatpush3.bf16.msra.mxu1 %v9064_v7  ;;  %v9124_v7 = vld [vmem:[#allocation4 + $0xd4] ss:$8 sps:$4 sm:$0xff]  }
 0x5d1   : > { %8676 = vmatprep.subr.bf16.mxu1 %v9067_v9  ;;  %v9119_v9 = vld [vmem:[#allocation4 + $0x50] ss:$8 sps:$4 sm:$0xff]  }
 0x5d2   : > { %8655 = vmatpush3.bf16.msra.mxu0 %v9066_v17  ;;  %v9122_v17 = vld [vmem:[#allocation4 + $0xd0] ss:$8 sps:$4 sm:$0xff]  }
 0x5d3   : > { %8656 = vmatprep.subr.bf16.mxu0 %v9069_v10  ;;  %v9127_v10 = vld [vmem:[#allocation4 + $0x64] ss:$8 sps:$4 sm:$0xff]  }
 0x5d4   : > { %8677 = vmatpush3.bf16.msra.mxu1 %v9068_v11  ;;  %v9130_v11 = vld [vmem:[#allocation4 + $0xe4] ss:$8 sps:$4 sm:$0xff]  }
 0x5d5   : > { %8678 = vmatprep.subr.bf16.mxu1 %v9071_v12  ;;  %v9125_v12 = vld [vmem:[#allocation4 + $0x60] ss:$8 sps:$4 sm:$0xff]  }
 0x5d6   : > { %8657 = vmatpush3.bf16.msra.mxu0 %v9070_v13  ;;  %v9128_v13 = vld [vmem:[#allocation4 + $0xe0] ss:$8 sps:$4 sm:$0xff]  }
 0x5d7   : > { %8658 = vmatprep.subr.bf16.mxu0 %v9073_v19  ;;  %v9133_v19 = vld [vmem:[#allocation4 + $0x74] ss:$8 sps:$4 sm:$0xff]  }
 0x5d8   : > { %8679 = vmatpush3.bf16.msra.mxu1 %v9072_v18  ;;  %v9136_v18 = vld [vmem:[#allocation4 + $0xf4] ss:$8 sps:$4 sm:$0xff]  }
 0x5d9   : > { %8680 = vmatprep.subr.bf16.mxu1 %v9075_v21  ;;  %v9131_v21 = vld [vmem:[#allocation4 + $0x70] ss:$8 sps:$4 sm:$0xff]  }
 0x5da   : > { %8659 = vmatpush3.bf16.msra.mxu0 %v9074_v23  ;;  %v9134_v23 = vld [vmem:[#allocation4 + $0xf0] ss:$8 sps:$4 sm:$0xff]  }
 0x5db   : > { %8660 = vmatprep.subr.bf16.mxu0 %v9077_v26  ;;  %v9139_v26 = vld [vmem:[#allocation4 + $0x104] ss:$8 sps:$4 sm:$0xff]  }
 0x5dc   : > { %8681 = vmatpush3.bf16.msra.mxu1 %v9076_v29  ;;  %v9142_v29 = vld [vmem:[#allocation4 + $0x184] ss:$8 sps:$4 sm:$0xff]  }
 0x5dd   : > { %8682 = vmatprep.subr.bf16.mxu1 %v9079_v34 }
 0x5de   : > { %8661 = vmatpush3.bf16.msra.mxu0 %v9078_v2  ;;  %v3128_v2 = vld [vmem:[%s10748_s9] sm:$0x1] }
 0x5df   : > { %8662 = vmatprep.subr.bf16.mxu0 %v9081_v37 }
 0x5e0   : > { %8683 = vmatpush3.bf16.msra.mxu1 %v9080_v38 }
 0x5e1   : > { %8684 = vmatprep.subr.bf16.mxu1 %v9083_v39 }
 0x5e2   : > { %8663 = vmatpush3.bf16.msra.mxu0 %v9082_v41 }
 0x5e3   : > { %8664 = vmatprep.subr.bf16.mxu0 %v9085_v14 }
 0x5e4   : > { %8685 = vmatpush3.bf16.msra.mxu1 %v9084_v42 }
 0x5e5   : > { %8686 = vmatprep.subr.bf16.mxu1 %v9087_v43 }
 0x5e6   : > { %8665 = vmatpush3.bf16.msra.mxu0 %v9086_v22 }
 0x5e7   : > { %4619 = vmatprep.subr.bf16.mxu0 %v9091_v47 }
 0x5e8   : > { %8687 = vmatpush3.bf16.msra.mxu1 %v9088_v44 }
 0x5e9   : > { %4340 = vmatmul.mubr.bf16.vlgmr.msra.gmra.mrb[20].mxu0 %v4207_v45  ;;  %4757 = vmatprep.subr.bf16.mxu1 %v9094_v50 }
 0x5ea   : > { %4651 = vmatprep.mubr.bf16.mxu0 %v9394_v3  ;;  %4620 = vmatpush1.bf16.msra.mxu0 %v9089_v1 }
 0x5eb   : > { %4514 = vmatmul.mubr.bf16.vlgmr.msra.gmra.mrb[52].mxu1 %v4381_v46  ;;  %4621 = vmatprep.subr.bf16.mxu0 %v9097_v0 }
 0x5ec   : > { %4789 = vmatprep.mubr.bf16.mxu1 %v9394_v3  ;;  %4758 = vmatpush1.bf16.msra.mxu1 %v9092_v48 }
 0x5ed   : > { %4759 = vmatprep.subr.bf16.mxu1 %v9100_v51 }
 0x5ee   : > { %4622 = vmatpush1.bf16.msra.mxu0 %v9095_v52 }
 0x5ef   : > { %4623 = vmatprep.subr.bf16.mxu0 %v9103_v25 }
 0x5f0   : > { %4760 = vmatpush1.bf16.msra.mxu1 %v9098_v15 }
 0x5f1   : > { %4761 = vmatprep.subr.bf16.mxu1 %v9106_v28 }
 0x5f2   : > { %4624 = vmatpush1.bf16.msra.mxu0 %v9101_v53 }
 0x5f3   : > { %4625 = vmatprep.subr.bf16.mxu0 %v9109_v54 }
 0x5f4   : > { %4762 = vmatpush1.bf16.msra.mxu1 %v9104_v24 }
 0x5f5   : > { %4763 = vmatprep.subr.bf16.mxu1 %v9112_v55 }
 0x5f6   : > { %4626 = vmatpush1.bf16.msra.mxu0 %v9107_v56 }
 0x5f7   : > { %4627 = vmatprep.subr.bf16.mxu0 %v9115_v59 }
 0x5f8   : > { %4764 = vmatpush1.bf16.msra.mxu1 %v9110_v57 }
 0x5f9   : > { %4765 = vmatprep.subr.bf16.mxu1 %v9118_v60 }
 0x5fa   : > { %4628 = vmatpush1.bf16.msra.mxu0 %v9113_v62 }
 0x5fb   : > { %4629 = vmatprep.subr.bf16.mxu0 %v9121_v5 }
 0x5fc   : > { %4766 = vmatpush1.bf16.msra.mxu1 %v9116_v63 }
 0x5fd   : > { %4767 = vmatprep.subr.bf16.mxu1 %v9124_v7 }
 0x5fe   : > { %4630 = vmatpush1.bf16.msra.mxu0 %v9119_v9 }
 0x5ff   : > { %4631 = vmatprep.subr.bf16.mxu0 %v9127_v10 }
 0x600   : > { %4768 = vmatpush1.bf16.msra.mxu1 %v9122_v17 }
 0x601   : > { %4769 = vmatprep.subr.bf16.mxu1 %v9130_v11 }
 0x602   : > { %4632 = vmatpush1.bf16.msra.mxu0 %v9125_v12 }
 0x603   : > { %4633 = vmatprep.subr.bf16.mxu0 %v9133_v19 }
 0x604   : > { %4770 = vmatpush1.bf16.msra.mxu1 %v9128_v13 }
 0x605   : > { %4771 = vmatprep.subr.bf16.mxu1 %v9136_v18 }
 0x606   : > { %4634 = vmatpush1.bf16.msra.mxu0 %v9131_v21 }
 0x607   : > { %4895 = vmatprep.subr.bf16.mxu0 %v9139_v26 }
 0x608   : > { %4772 = vmatpush1.bf16.msra.mxu1 %v9134_v23 }
 0x609   : > { %5033 = vmatprep.subr.bf16.mxu1 %v9142_v29 }
 0x65c   : > { %v8534_v34 = vpop.f32.mrb[8].mxu0 }
 0x65d   : > { %v8535_v37 = vpop.f32.mrb[9].mxu0 }
 0x65e   : > { %v8536_v38 = vadd.f32 %v8535_v37, %v8534_v34  ;;  %v8537_v39 = vpop.f32.mrb[10].mxu0  ;;  %v8556_v41 = vpop.f32.mrb[40].mxu1  ;;  %v9137_v37 = vld [vmem:[#allocation4 + $0x100] ss:$8 sps:$4 sm:$0xff]  }
 0x65f   : > { %v8538_v14 = vpop.f32.mrb[11].mxu0  ;;  %v8557_v42 = vpop.f32.mrb[41].mxu1 }
 0x660   : > { %v3297_v43 = vadd.f32 %v8536_v38, %v3128_v2  ;;  %v8558_v22 = vadd.f32 %v8557_v42, %v8556_v41  ;;  %v8559_v44 = vpop.f32.mrb[42].mxu1  ;;  %v9140_v38 = vld [vmem:[#allocation4 + $0x180] ss:$8 sps:$4 sm:$0xff]   ;;  %v9145_v41 = vld [vmem:[#allocation4 + $0x114] ss:$8 sps:$4 sm:$0xff]  }
 0x661   : > { %v8560_v45 = vpop.f32.mrb[43].mxu1  ;;  %v9148_v14 = vld [vmem:[#allocation4 + $0x194] ss:$8 sps:$4 sm:$0xff]   ;;  %v9143_v42 = vld [vmem:[#allocation4 + $0x110] ss:$8 sps:$4 sm:$0xff]  }
 0x662   : > { %v3475_v46 = vadd.f32 %v8558_v22, %v3297_v43  ;;  %v9146_v43 = vld [vmem:[#allocation4 + $0x190] ss:$8 sps:$4 sm:$0xff]   ;;  %v9151_v22 = vld [vmem:[#allocation4 + $0x124] ss:$8 sps:$4 sm:$0xff]   ;;  %v9149_v45 = vld [vmem:[#allocation4 + $0x120] ss:$8 sps:$4 sm:$0xff]  }
 0x663   : > { %v9154_v44 = vld [vmem:[#allocation4 + $0x1a4] ss:$8 sps:$4 sm:$0xff]  }
 0x67c   : > { %v8578_v1 = vpop.f32.mrb[12].mxu0 }
 0x67d   : > { %v8579_v47 = vpop.f32.mrb[13].mxu0 }
 0x67e   : > { %v8580_v48 = vadd.f32 %v8579_v47, %v8578_v1  ;;  %v8581_v50 = vpop.f32.mrb[14].mxu0  ;;  %v8600_v0 = vpop.f32.mrb[44].mxu1  ;;  %v9157_v1 = vld [vmem:[#allocation4 + $0x134] ss:$8 sps:$4 sm:$0xff]  }
 0x67f   : > { %v8582_v51 = vpop.f32.mrb[15].mxu0  ;;  %v8601_v52 = vpop.f32.mrb[45].mxu1  ;;  %v9160_v47 = vld [vmem:[#allocation4 + $0x1b4] ss:$8 sps:$4 sm:$0xff]   ;;  %v9158_v50 = vld [vmem:[#allocation4 + $0x1b0] ss:$8 sps:$4 sm:$0xff]  }
 0x680   : > { %v3651_v15 = vadd.f32 %v8580_v48, %v3475_v46  ;;  %v8602_v25 = vadd.f32 %v8601_v52, %v8600_v0  ;;  %v8603_v28 = vpop.f32.mrb[46].mxu1  ;;  %v9152_v46 = vld [vmem:[#allocation4 + $0x1a0] ss:$8 sps:$4 sm:$0xff]   ;;  %v9155_v48 = vld [vmem:[#allocation4 + $0x130] ss:$8 sps:$4 sm:$0xff]  }
 0x681   : > { %v8604_v53 = vpop.f32.mrb[47].mxu1  ;;  %v9163_v0 = vld [vmem:[#allocation4 + $0x144] ss:$8 sps:$4 sm:$0xff]   ;;  %v9161_v52 = vld [vmem:[#allocation4 + $0x140] ss:$8 sps:$4 sm:$0xff]  }
 0x682   : > { %v3825_v24 = vadd.f32 %v8602_v25, %v3651_v15  ;;  %v9166_v51 = vld [vmem:[#allocation4 + $0x1c4] ss:$8 sps:$4 sm:$0xff]   ;;  %v9164_v15 = vld [vmem:[#allocation4 + $0x1c0] ss:$8 sps:$4 sm:$0xff]   ;;  %v9169_v25 = vld [vmem:[#allocation4 + $0x154] ss:$8 sps:$4 sm:$0xff]  }
 0x683   : > { %v9172_v28 = vld [vmem:[#allocation4 + $0x1d4] ss:$8 sps:$4 sm:$0xff]   ;;  %v9167_v53 = vld [vmem:[#allocation4 + $0x150] ss:$8 sps:$4 sm:$0xff]  }
 0x69c   : > { %v8622_v54 = vpop.f32.mrb[16].mxu0 }
 0x69d   : > { %v8623_v55 = vpop.f32.mrb[17].mxu0 }
 0x69e   : > { %v8624_v56 = vadd.f32 %v8623_v55, %v8622_v54  ;;  %v8625_v57 = vpop.f32.mrb[18].mxu0  ;;  %v8644_v59 = vpop.f32.mrb[48].mxu1  ;;  %v9175_v54 = vld [vmem:[#allocation4 + $0x164] ss:$8 sps:$4 sm:$0xff]  }
 0x69f   : > { %v8626_v60 = vpop.f32.mrb[19].mxu0  ;;  %v8645_v62 = vpop.f32.mrb[49].mxu1  ;;  %v9178_v55 = vld [vmem:[#allocation4 + $0x1e4] ss:$8 sps:$4 sm:$0xff]   ;;  %v9176_v57 = vld [vmem:[#allocation4 + $0x1e0] ss:$8 sps:$4 sm:$0xff]  }
 0x6a0   : > { %v3999_v63 = vadd.f32 %v8624_v56, %v3825_v24  ;;  %v8646_v5 = vadd.f32 %v8645_v62, %v8644_v59  ;;  %v8647_v7 = vpop.f32.mrb[50].mxu1  ;;  %v9170_v24 = vld [vmem:[#allocation4 + $0x1d0] ss:$8 sps:$4 sm:$0xff]   ;;  %v9173_v56 = vld [vmem:[#allocation4 + $0x160] ss:$8 sps:$4 sm:$0xff]  }
 0x6a1   : > { %v8648_v9 = vpop.f32.mrb[51].mxu1  ;;  %v9181_v59 = vld [vmem:[#allocation4 + $0x174] ss:$8 sps:$4 sm:$0xff]   ;;  %v9179_v62 = vld [vmem:[#allocation4 + $0x170] ss:$8 sps:$4 sm:$0xff]  }
 0x6a2   : > { %v4173_v17 = vadd.f32 %v8646_v5, %v3999_v63  ;;  %v9184_v60 = vld [vmem:[#allocation4 + $0x1f4] ss:$8 sps:$4 sm:$0xff]   ;;  %v9182_v63 = vld [vmem:[#allocation4 + $0x1f0] ss:$8 sps:$4 sm:$0xff]   ;;  %v9187_v5 = vld [vmem:[#allocation4 + $0x204] ss:$8 sps:$4 sm:$0xff]  }
 0x6a3   : > { %v9190_v7 = vld [vmem:[#allocation4 + $0x284] ss:$8 sps:$4 sm:$0xff]   ;;  %v9185_v9 = vld [vmem:[#allocation4 + $0x200] ss:$8 sps:$4 sm:$0xff]  }
 0x6bc   : > { %v8666_v10 = vpop.f32.mrb[20].mxu0 }
 0x6bd   : > { %v8667_v11 = vpop.f32.mrb[21].mxu0 }
 0x6be   : > { %v8668_v12 = vadd.f32 %v8667_v11, %v8666_v10  ;;  %v8669_v13 = vpop.f32.mrb[22].mxu0  ;;  %v8688_v19 = vpop.f32.mrb[52].mxu1  ;;  %v9193_v10 = vld [vmem:[#allocation4 + $0x214] ss:$8 sps:$4 sm:$0xff]  }
 0x6bf   : > { %v8670_v18 = vpop.f32.mrb[23].mxu0  ;;  %v8689_v21 = vpop.f32.mrb[53].mxu1  ;;  %v9196_v11 = vld [vmem:[#allocation4 + $0x294] ss:$8 sps:$4 sm:$0xff]   ;;  %v9194_v13 = vld [vmem:[#allocation4 + $0x290] ss:$8 sps:$4 sm:$0xff]  }
 0x6c0   : > { %v4347_v23 = vadd.f32 %v8668_v12, %v4173_v17  ;;  %v8690_v26 = vadd.f32 %v8689_v21, %v8688_v19  ;;  %v8691_v29 = vpop.f32.mrb[54].mxu1  ;;  %v9188_v17 = vld [vmem:[#allocation4 + $0x280] ss:$8 sps:$4 sm:$0xff]   ;;  %v9191_v12 = vld [vmem:[#allocation4 + $0x210] ss:$8 sps:$4 sm:$0xff]  }
 0x6c1   : > { %v8692_v34 = vpop.f32.mrb[55].mxu1  ;;  %v9199_v19 = vld [vmem:[#allocation4 + $0x224] ss:$8 sps:$4 sm:$0xff]   ;;  %v9197_v21 = vld [vmem:[#allocation4 + $0x220] ss:$8 sps:$4 sm:$0xff]  }
 0x6c2   : > { %v4521_v2 = vadd.f32 %v8690_v26, %v4347_v23  ;;  %v9202_v18 = vld [vmem:[#allocation4 + $0x2a4] ss:$8 sps:$4 sm:$0xff]   ;;  %v9200_v23 = vld [vmem:[#allocation4 + $0x2a0] ss:$8 sps:$4 sm:$0xff]   ;;  %v9205_v26 = vld [vmem:[#allocation4 + $0x234] ss:$8 sps:$4 sm:$0xff]  }
 0x6c3   : > { %v9208_v29 = vld [vmem:[#allocation4 + $0x2b4] ss:$8 sps:$4 sm:$0xff]   ;;  %v9203_v34 = vld [vmem:[#allocation4 + $0x230] ss:$8 sps:$4 sm:$0xff]  }
 0x6c4   : > { %v10204_v39 = vpack.c.bf16 %v4521_v2, %v4521_v2  ;;  %v9206_v2 = vld [vmem:[#allocation4 + $0x2b0] ss:$8 sps:$4 sm:$0xff]  }
 0x6c6   : > { %4652 = vmatmul.mubr.bf16.vlgmr.msra.gmra.mrb[24].mxu0 %v10204_v39  ;;  %4790 = vmatmul.mubr.bf16.vlgmr.msra.gmra.mrb[56].mxu1 %v10204_v39 }
 0x6c7   : > { %4896 = vmatpush1.bf16.msra.mxu0 %v9137_v37  ;;  %5034 = vmatpush1.bf16.msra.mxu1 %v9140_v38  ;;  %v9211_v37 = vld [vmem:[#allocation4 + $0x244] ss:$8 sps:$4 sm:$0xff]  }
 0x6c8   : > { %4897 = vmatprep.subr.bf16.mxu0 %v9145_v41  ;;  %5035 = vmatprep.subr.bf16.mxu1 %v9148_v14  ;;  %v9214_v38 = vld [vmem:[#allocation4 + $0x2c4] ss:$8 sps:$4 sm:$0xff]   ;;  %v9209_v41 = vld [vmem:[#allocation4 + $0x240] ss:$8 sps:$4 sm:$0xff]  }
 0x6c9   : > { %4927 = vmatprep.mubr.bf16.mxu0 %v9394_v3  ;;  %5065 = vmatprep.mubr.bf16.mxu1 %v9394_v3  ;;  %v9212_v14 = vld [vmem:[#allocation4 + $0x2c0] ss:$8 sps:$4 sm:$0xff]  }
 0x6cb   : > { %4898 = vmatpush1.bf16.msra.mxu0 %v9143_v42  ;;  %5036 = vmatpush1.bf16.msra.mxu1 %v9146_v43  ;;  %v9217_v42 = vld [vmem:[#allocation4 + $0x254] ss:$8 sps:$4 sm:$0xff]  }
 0x6cc   : > { %4899 = vmatprep.subr.bf16.mxu0 %v9151_v22  ;;  %5037 = vmatprep.subr.bf16.mxu1 %v9154_v44  ;;  %v9220_v43 = vld [vmem:[#allocation4 + $0x2d4] ss:$8 sps:$4 sm:$0xff]   ;;  %v9215_v22 = vld [vmem:[#allocation4 + $0x250] ss:$8 sps:$4 sm:$0xff]  }
 0x6cd   : > { %v9218_v44 = vld [vmem:[#allocation4 + $0x2d0] ss:$8 sps:$4 sm:$0xff]  }
 0x6cf   : > { %4900 = vmatpush1.bf16.msra.mxu0 %v9149_v45  ;;  %5038 = vmatpush1.bf16.msra.mxu1 %v9152_v46  ;;  %v9223_v45 = vld [vmem:[#allocation4 + $0x264] ss:$8 sps:$4 sm:$0xff]  }
 0x6d0   : > { %4901 = vmatprep.subr.bf16.mxu0 %v9157_v1  ;;  %5039 = vmatprep.subr.bf16.mxu1 %v9160_v47  ;;  %v9226_v46 = vld [vmem:[#allocation4 + $0x2e4] ss:$8 sps:$4 sm:$0xff]   ;;  %v9221_v1 = vld [vmem:[#allocation4 + $0x260] ss:$8 sps:$4 sm:$0xff]  }
 0x6d1   : > { %v9224_v47 = vld [vmem:[#allocation4 + $0x2e0] ss:$8 sps:$4 sm:$0xff]  }
 0x6d3   : > { %4902 = vmatpush1.bf16.msra.mxu0 %v9155_v48  ;;  %5040 = vmatpush1.bf16.msra.mxu1 %v9158_v50  ;;  %v9229_v48 = vld [vmem:[#allocation4 + $0x274] ss:$8 sps:$4 sm:$0xff]  }
 0x6d4   : > { %4903 = vmatprep.subr.bf16.mxu0 %v9163_v0  ;;  %5041 = vmatprep.subr.bf16.mxu1 %v9166_v51  ;;  %v9232_v50 = vld [vmem:[#allocation4 + $0x2f4] ss:$8 sps:$4 sm:$0xff]   ;;  %v9227_v0 = vld [vmem:[#allocation4 + $0x270] ss:$8 sps:$4 sm:$0xff]  }
 0x6d5   : > { %v9230_v51 = vld [vmem:[#allocation4 + $0x2f0] ss:$8 sps:$4 sm:$0xff]  }
 0x6d7   : > { %4904 = vmatpush1.bf16.msra.mxu0 %v9161_v52  ;;  %5042 = vmatpush1.bf16.msra.mxu1 %v9164_v15  ;;  %v9235_v52 = vld [vmem:[#allocation4 + $0x304] ss:$8 sps:$4 sm:$0xff]  }
 0x6d8   : > { %4905 = vmatprep.subr.bf16.mxu0 %v9169_v25  ;;  %5043 = vmatprep.subr.bf16.mxu1 %v9172_v28  ;;  %v9238_v15 = vld [vmem:[#allocation4 + $0x384] ss:$8 sps:$4 sm:$0xff]   ;;  %v9233_v25 = vld [vmem:[#allocation4 + $0x300] ss:$8 sps:$4 sm:$0xff]  }
 0x6d9   : > { %v9236_v28 = vld [vmem:[#allocation4 + $0x380] ss:$8 sps:$4 sm:$0xff]  }
 0x6db   : > { %4906 = vmatpush1.bf16.msra.mxu0 %v9167_v53  ;;  %5044 = vmatpush1.bf16.msra.mxu1 %v9170_v24  ;;  %v9241_v53 = vld [vmem:[#allocation4 + $0x314] ss:$8 sps:$4 sm:$0xff]  }
 0x6dc   : > { %4907 = vmatprep.subr.bf16.mxu0 %v9175_v54  ;;  %5045 = vmatprep.subr.bf16.mxu1 %v9178_v55  ;;  %v9244_v24 = vld [vmem:[#allocation4 + $0x394] ss:$8 sps:$4 sm:$0xff]   ;;  %v9239_v54 = vld [vmem:[#allocation4 + $0x310] ss:$8 sps:$4 sm:$0xff]  }
 0x6dd   : > { %v9242_v55 = vld [vmem:[#allocation4 + $0x390] ss:$8 sps:$4 sm:$0xff]  }
 0x6df   : > { %4908 = vmatpush1.bf16.msra.mxu0 %v9173_v56  ;;  %5046 = vmatpush1.bf16.msra.mxu1 %v9176_v57  ;;  %v9247_v56 = vld [vmem:[#allocation4 + $0x324] ss:$8 sps:$4 sm:$0xff]  }
 0x6e0   : > { %4909 = vmatprep.subr.bf16.mxu0 %v9181_v59  ;;  %5047 = vmatprep.subr.bf16.mxu1 %v9184_v60  ;;  %v9250_v57 = vld [vmem:[#allocation4 + $0x3a4] ss:$8 sps:$4 sm:$0xff]   ;;  %v9245_v59 = vld [vmem:[#allocation4 + $0x320] ss:$8 sps:$4 sm:$0xff]  }
 0x6e1   : > { %v9248_v60 = vld [vmem:[#allocation4 + $0x3a0] ss:$8 sps:$4 sm:$0xff]  }
 0x6e3   : > { %4910 = vmatpush1.bf16.msra.mxu0 %v9179_v62  ;;  %5048 = vmatpush1.bf16.msra.mxu1 %v9182_v63  ;;  %v9253_v62 = vld [vmem:[#allocation4 + $0x334] ss:$8 sps:$4 sm:$0xff]  }
 0x6e4   : > { %5171 = vmatprep.subr.bf16.mxu0 %v9187_v5  ;;  %5309 = vmatprep.subr.bf16.mxu1 %v9190_v7  ;;  %v9256_v63 = vld [vmem:[#allocation4 + $0x3b4] ss:$8 sps:$4 sm:$0xff]   ;;  %v9251_v5 = vld [vmem:[#allocation4 + $0x330] ss:$8 sps:$4 sm:$0xff]  }
 0x6e5   : > { %v9254_v7 = vld [vmem:[#allocation4 + $0x3b0] ss:$8 sps:$4 sm:$0xff]  }
 0x6e6   : > { %4928 = vmatmul.mubr.bf16.vlgmr.msra.gmra.mrb[28].mxu0 %v10204_v39  ;;  %5066 = vmatmul.mubr.bf16.vlgmr.msra.gmra.mrb[60].mxu1 %v10204_v39 }
 0x6e7   : > { %5172 = vmatpush1.bf16.msra.mxu0 %v9185_v9  ;;  %5310 = vmatpush1.bf16.msra.mxu1 %v9188_v17  ;;  %v9259_v9 = vld [vmem:[#allocation4 + $0x344] ss:$8 sps:$4 sm:$0xff]  }
 0x6e8   : > { %5173 = vmatprep.subr.bf16.mxu0 %v9193_v10  ;;  %5311 = vmatprep.subr.bf16.mxu1 %v9196_v11  ;;  %v9262_v17 = vld [vmem:[#allocation4 + $0x3c4] ss:$8 sps:$4 sm:$0xff]   ;;  %v9257_v10 = vld [vmem:[#allocation4 + $0x340] ss:$8 sps:$4 sm:$0xff]  }
 0x6e9   : > { %5203 = vmatprep.mubr.bf16.mxu0 %v9394_v3  ;;  %5341 = vmatprep.mubr.bf16.mxu1 %v9394_v3  ;;  %v9260_v11 = vld [vmem:[#allocation4 + $0x3c0] ss:$8 sps:$4 sm:$0xff]  }
 0x6eb   : > { %5174 = vmatpush1.bf16.msra.mxu0 %v9191_v12  ;;  %5312 = vmatpush1.bf16.msra.mxu1 %v9194_v13  ;;  %v9265_v12 = vld [vmem:[#allocation4 + $0x354] ss:$8 sps:$4 sm:$0xff]  }
 0x6ec   : > { %5175 = vmatprep.subr.bf16.mxu0 %v9199_v19  ;;  %5313 = vmatprep.subr.bf16.mxu1 %v9202_v18  ;;  %v9268_v13 = vld [vmem:[#allocation4 + $0x3d4] ss:$8 sps:$4 sm:$0xff]   ;;  %v9263_v19 = vld [vmem:[#allocation4 + $0x350] ss:$8 sps:$4 sm:$0xff]  }
 0x6ed   : > { %v9266_v18 = vld [vmem:[#allocation4 + $0x3d0] ss:$8 sps:$4 sm:$0xff]  }
 0x6ef   : > { %5176 = vmatpush1.bf16.msra.mxu0 %v9197_v21  ;;  %5314 = vmatpush1.bf16.msra.mxu1 %v9200_v23  ;;  %v9271_v21 = vld [vmem:[#allocation4 + $0x364] ss:$8 sps:$4 sm:$0xff]  }
 0x6f0   : > { %5177 = vmatprep.subr.bf16.mxu0 %v9205_v26  ;;  %5315 = vmatprep.subr.bf16.mxu1 %v9208_v29  ;;  %v9274_v23 = vld [vmem:[#allocation4 + $0x3e4] ss:$8 sps:$4 sm:$0xff]   ;;  %v9269_v26 = vld [vmem:[#allocation4 + $0x360] ss:$8 sps:$4 sm:$0xff]  }
 0x6f1   : > { %v9272_v29 = vld [vmem:[#allocation4 + $0x3e0] ss:$8 sps:$4 sm:$0xff]  }
 0x6f3   : > { %5178 = vmatpush1.bf16.msra.mxu0 %v9203_v34  ;;  %5316 = vmatpush1.bf16.msra.mxu1 %v9206_v2  ;;  %v9277_v34 = vld [vmem:[#allocation4 + $0x374] ss:$8 sps:$4 sm:$0xff]  }
 0x6f4   : > { %5179 = vmatprep.subr.bf16.mxu0 %v9211_v37  ;;  %5317 = vmatprep.subr.bf16.mxu1 %v9214_v38  ;;  %v9280_v2 = vld [vmem:[#allocation4 + $0x3f4] ss:$8 sps:$4 sm:$0xff]   ;;  %v9275_v37 = vld [vmem:[#allocation4 + $0x370] ss:$8 sps:$4 sm:$0xff]  }
 0x6f5   : > { %v9278_v38 = vld [vmem:[#allocation4 + $0x3f0] ss:$8 sps:$4 sm:$0xff]  }
 0x6f7   : > { %5180 = vmatpush1.bf16.msra.mxu0 %v9209_v41  ;;  %5318 = vmatpush1.bf16.msra.mxu1 %v9212_v14 }
 0x6f8   : > { %5181 = vmatprep.subr.bf16.mxu0 %v9217_v42  ;;  %5319 = vmatprep.subr.bf16.mxu1 %v9220_v43 }
 0x6fb   : > { %5182 = vmatpush1.bf16.msra.mxu0 %v9215_v22  ;;  %5320 = vmatpush1.bf16.msra.mxu1 %v9218_v44 }
 0x6fc   : > { %5183 = vmatprep.subr.bf16.mxu0 %v9223_v45  ;;  %5321 = vmatprep.subr.bf16.mxu1 %v9226_v46 }
 0x6ff   : > { %5184 = vmatpush1.bf16.msra.mxu0 %v9221_v1  ;;  %5322 = vmatpush1.bf16.msra.mxu1 %v9224_v47 }
 0x700   : > { %5185 = vmatprep.subr.bf16.mxu0 %v9229_v48  ;;  %5323 = vmatprep.subr.bf16.mxu1 %v9232_v50 }
 0x703   : > { %5186 = vmatpush1.bf16.msra.mxu0 %v9227_v0  ;;  %5324 = vmatpush1.bf16.msra.mxu1 %v9230_v51 }
 0x704   : > { %5447 = vmatprep.subr.bf16.mxu0 %v9235_v52  ;;  %5585 = vmatprep.subr.bf16.mxu1 %v9238_v15 }
 0x706   : > { %5204 = vmatmul.mubr.bf16.vlgmr.msra.gmra.mrb[32].mxu0 %v10204_v39  ;;  %5342 = vmatmul.mubr.bf16.vlgmr.msra.gmra.mrb[64].mxu1 %v10204_v39 }
 0x707   : > { %5448 = vmatpush1.bf16.msra.mxu0 %v9233_v25  ;;  %5586 = vmatpush1.bf16.msra.mxu1 %v9236_v28 }
 0x708   : > { %5449 = vmatprep.subr.bf16.mxu0 %v9241_v53  ;;  %5587 = vmatprep.subr.bf16.mxu1 %v9244_v24 }
 0x709   : > { %5479 = vmatprep.mubr.bf16.mxu0 %v9394_v3  ;;  %5617 = vmatprep.mubr.bf16.mxu1 %v9394_v3 }
 0x70b   : > { %5450 = vmatpush1.bf16.msra.mxu0 %v9239_v54  ;;  %5588 = vmatpush1.bf16.msra.mxu1 %v9242_v55 }
 0x70c   : > { %5451 = vmatprep.subr.bf16.mxu0 %v9247_v56  ;;  %5589 = vmatprep.subr.bf16.mxu1 %v9250_v57 }
 0x70f   : > { %5452 = vmatpush1.bf16.msra.mxu0 %v9245_v59  ;;  %5590 = vmatpush1.bf16.msra.mxu1 %v9248_v60 }
 0x710   : > { %5453 = vmatprep.subr.bf16.mxu0 %v9253_v62  ;;  %5591 = vmatprep.subr.bf16.mxu1 %v9256_v63 }
 0x713   : > { %5454 = vmatpush1.bf16.msra.mxu0 %v9251_v5  ;;  %5592 = vmatpush1.bf16.msra.mxu1 %v9254_v7 }
 0x714   : > { %5455 = vmatprep.subr.bf16.mxu0 %v9259_v9  ;;  %5593 = vmatprep.subr.bf16.mxu1 %v9262_v17 }
 0x717   : > { %5456 = vmatpush1.bf16.msra.mxu0 %v9257_v10  ;;  %5594 = vmatpush1.bf16.msra.mxu1 %v9260_v11 }
 0x718   : > { %5457 = vmatprep.subr.bf16.mxu0 %v9265_v12  ;;  %5595 = vmatprep.subr.bf16.mxu1 %v9268_v13 }
 0x71b   : > { %5458 = vmatpush1.bf16.msra.mxu0 %v9263_v19  ;;  %5596 = vmatpush1.bf16.msra.mxu1 %v9266_v18 }
 0x71c   : > { %5459 = vmatprep.subr.bf16.mxu0 %v9271_v21  ;;  %5597 = vmatprep.subr.bf16.mxu1 %v9274_v23 }
 0x71f   : > { %5460 = vmatpush1.bf16.msra.mxu0 %v9269_v26  ;;  %5598 = vmatpush1.bf16.msra.mxu1 %v9272_v29 }
 0x720   : > { %5461 = vmatprep.subr.bf16.mxu0 %v9277_v34  ;;  %5599 = vmatprep.subr.bf16.mxu1 %v9280_v2 }
 0x723   : > { %5462 = vmatpush1.bf16.msra.mxu0 %v9275_v37  ;;  %5600 = vmatpush1.bf16.msra.mxu1 %v9278_v38 }
 0x726   : > { %5480 = vmatmul.mubr.bf16.vlgmr.msra.gmra.mrb[36].mxu0 %v10204_v39  ;;  %5618 = vmatmul.mubr.bf16.vlgmr.msra.gmra.mrb[68].mxu1 %v10204_v39 }
 0x727   : > { %5774 = vmatprep.mubr.bf16.mxu0 %v9394_v3  ;;  %6477 = vmatprep.mubr.bf16.mxu1 %v9394_v3 }
 0x799   : > { %v4653_v41 = vpop.f32.mrb[24].mxu0  ;;  %v4791_v14 = vpop.f32.mrb[56].mxu1 }
 0x79a   : > { %v5628_v42 = vrot.slane %v4791_v14, 7  ;;  %v4655_v43 = vpop.f32.mrb[25].mxu0  ;;  %v4793_v22 = vpop.f32.mrb[57].mxu1 }
 0x79b   : > { %v5629_v44 = vrot.slane %v4793_v22, 7  ;;  %v4657_v45 = vpop.f32.mrb[26].mxu0  ;;  %v4795_v46 = vpop.f32.mrb[58].mxu1 }
 0x79c   : > { %v5669_v1 = vsel %vm5668_vm11, %v4653_v41, %v5628_v42  ;;  %v4658_v47 = vpop.f32.mrb[27].mxu0  ;;  %v4796_v48 = vpop.f32.mrb[59].mxu1 }
 0x79d   : > { %v5670_v50 = vsel %vm5668_vm11, %v4655_v43, %v5629_v44  ;;  %v5688_v43 = vld [vmem:[%s10750_s11] sm:$0xff]  ;;  %v5689_v47 = vld [vmem:[%s10750_s11 + $0x8] sm:$0xff] }
 0x7b9   : > { %v4929_v0 = vpop.f32.mrb[28].mxu0  ;;  %v5067_v51 = vpop.f32.mrb[60].mxu1 }
 0x7ba   : > { %v5634_v39 = vrot.slane %v4929_v0, 6  ;;  %v5640_v52 = vrot.slane %v5067_v51, 5  ;;  %v4931_v15 = vpop.f32.mrb[29].mxu0  ;;  %v5069_v25 = vpop.f32.mrb[61].mxu1 }
 0x7bb   : > { %v5635_v28 = vrot.slane %v4931_v15, 6  ;;  %v5641_v53 = vrot.slane %v5069_v25, 5  ;;  %v4933_v24 = vpop.f32.mrb[30].mxu0  ;;  %v5071_v54 = vpop.f32.mrb[62].mxu1 }
 0x7bc   : > { %v5671_v55 = vsel %vm746_vm2, %v5669_v1, %v5634_v39  ;;  %v4934_v56 = vpop.f32.mrb[31].mxu0  ;;  %v5072_v57 = vpop.f32.mrb[63].mxu1  ;;  %v6363_v54 = vld [vmem:[%s10752_s13 + $0x8] sm:$0xff] }
 0x7bd   : > { %v5674_v59 = vsel %vm5673_vm12, %v5671_v55, %v5640_v52  ;;  %v5672_v60 = vsel %vm746_vm2, %v5670_v50, %v5635_v28  ;;  %vm5685_vm2 = vcmask 1046528   ;;  %v6362_v55 = vld [vmem:[%s10752_s13] sm:$0xff] }
 0x7be   : > { %v5675_v62 = vsel %vm5673_vm12, %v5672_v60, %v5641_v53 }
 0x7d9   : > { %v5205_v63 = vpop.f32.mrb[32].mxu0  ;;  %v5343_v5 = vpop.f32.mrb[64].mxu1 }
 0x7da   : > { %v5646_v7 = vrot.slane %v5205_v63, 4  ;;  %v5652_v9 = vrot.slane %v5343_v5, 3  ;;  %v5207_v17 = vpop.f32.mrb[33].mxu0  ;;  %v5345_v10 = vpop.f32.mrb[65].mxu1 }
 0x7db   : > { %v5647_v11 = vrot.slane %v5207_v17, 4  ;;  %v5653_v12 = vrot.slane %v5345_v10, 3  ;;  %v5209_v13 = vpop.f32.mrb[34].mxu0  ;;  %v5347_v19 = vpop.f32.mrb[66].mxu1  ;;  %v9281_v17 = vld [vmem:[%s10751_s12 + $0x8] sm:$0xff]  }
 0x7dc   : > { %v5677_v18 = vsel %vm5676_vm13, %v5674_v59, %v5646_v7  ;;  %v5210_v21 = vpop.f32.mrb[35].mxu0  ;;  %v5348_v23 = vpop.f32.mrb[67].mxu1 }
 0x7dd   : > { %v5680_v26 = vsel %vm5679_vm14, %v5677_v18, %v5652_v9  ;;  %v5678_v29 = vsel %vm5676_vm13, %v5675_v62, %v5647_v11 }
 0x7de   : > { %v5681_v34 = vsel %vm5679_vm14, %v5678_v29, %v5653_v12 }
 0x7f9   : > { %v5481_v2 = vpop.f32.mrb[36].mxu0  ;;  %v5619_v37 = vpop.f32.mrb[68].mxu1 }
 0x7fa   : > { %v5658_v38 = vrot.slane %v5481_v2, 2  ;;  %v5664_v41 = vrot.slane %v5619_v37, 1  ;;  %v5483_v14 = vpop.f32.mrb[37].mxu0  ;;  %v5621_v42 = vpop.f32.mrb[69].mxu1 }
 0x7fb   : > { %v5659_v22 = vrot.slane %v5483_v14, 2  ;;  %v5665_v44 = vrot.slane %v5621_v42, 1  ;;  %v5485_v45 = vpop.f32.mrb[38].mxu0  ;;  %v5623_v46 = vpop.f32.mrb[70].mxu1 }
 0x7fc   : > { %v5683_v1 = vsel %vm5682_vm15, %v5680_v26, %v5658_v38  ;;  %v5486_v48 = vpop.f32.mrb[39].mxu0  ;;  %v5624_v50 = vpop.f32.mrb[71].mxu1  ;;  %v9282_v38 = vld [vmem:[%s10751_s12] sm:$0xff]  }
 0x7fd   : > { %v5686_v0 = vsel %vm5685_vm2, %v5683_v1, %v5664_v41  ;;  %v5684_v51 = vsel %vm5682_vm15, %v5681_v34, %v5659_v22 }
 0x7fe   : > { %v5690_v39 = vadd.f32 %v5688_v43, %v5686_v0  ;;  %v5687_v52 = vsel %vm5685_vm2, %v5684_v51, %v5665_v44  ;;  %v9283_v44 = vld [vmem:[%s10751_s12 + $0x10] sm:$0xff]  }
 0x7ff   : > { %v5691_v15 = vadd.f32 %v5689_v47, %v5687_v52  ;;  %v9284_v47 = vld [vmem:[%s10751_s12 + $0x18] sm:$0xff]  }
 0x800   : > { %v5692_v25 = vmax.f32 %v5690_v39, 0.0 }
 0x801   : > { %v5693_v28 = vmax.f32 %v5691_v15, 0.0 }
 0x802   : > { %v10234_v53 = vpack.c.bf16 %v5692_v25, %v5692_v25  ;;  %v9285_v25 = vld [vmem:[%s10751_s12 + $0x20] sm:$0xff]  }
 0x803   : > { %v10236_v24 = vpack.c.bf16 %v5693_v28, %v5693_v28 }
 0x804   : > { %5714 = vrot.lane.b32.xlu1 %v10234_v53, %s10778_s23  ;;  %v6006_v0 = vsel %vm5676_vm13, %v10234_v53, 0 }
 0x805   : > { %5712 = vrot.lane.b32.xlu0 %v10236_v24, %s10778_s23 }
 0x808   : > { %5700 = vrot.lane.b32.xlu1 %v10234_v53, %s10776_s24 }
 0x809   : > { %5697 = vrot.lane.b32.xlu0 %v10236_v24, %s10776_s24 }
 0x80c   : > { %5844 = vrot.lane.b32.xlu1 %v10234_v53, %s10774_s25 }
 0x80d   : > { %5842 = vrot.lane.b32.xlu0 %v10236_v24, %s10774_s25 }
 0x810   : > { %5920 = vrot.lane.b32.xlu1 %v10234_v53, %s10795_s2 }
 0x811   : > { %5918 = vrot.lane.b32.xlu0 %v10236_v24, %s10795_s2 }
 0x814   : > { %6060 = vrot.lane.b32.xlu1 %v10236_v24, %s10796_s0 }
 0x815   : > { %6058 = vrot.lane.b32.xlu0 %v10234_v53, %s10796_s0 }
 0x818   : > { %6136 = vrot.lane.b32.xlu1 %v10236_v24, %s10797_s26 }
 0x819   : > { %6134 = vrot.lane.b32.xlu0 %v10234_v53, %s10797_s26 }
 0x81c   : > { %6212 = vrot.lane.b32.xlu1 %v10236_v24, %s10798_s28 }
 0x81d   : > { %6210 = vrot.lane.b32.xlu0 %v10234_v53, %s10798_s28 }
 0x820   : > { %6288 = vrot.lane.b32.xlu1 %v10236_v24, %s10799_s29 }
 0x821   : > { %6286 = vrot.lane.b32.xlu0 %v10234_v53, %s10799_s29 }
 0x824   : > { %6371 = vperm.xlu1 %8932, %v6363_v54  }
 0x825   : > { %6366 = vperm.xlu0 %8931, %v6362_v55  }
 0x876   : > { %v5715_v56 = vpop.permute.xlu1 %5714 }
 0x877   : > { %v5713_v57 = vpop.permute.xlu0 %5712 }
 0x878   : > { %v5716_v59 = vsel %vm675_vm1, %v5715_v56, %v5713_v57  ;;  %v5720_v60 = vsel %vm675_vm1, %v5713_v57, %v5715_v56 }
 0x879   : > { %v5722_v62 = vmul.bf16 %v5720_v60, %v9659_v33  ;;  %v5723_v63 = vmul.bf16 %v5716_v59, %v9656_v32  ;;  %v9286_v59 = vld [vmem:[%s10751_s12 + $0x28] sm:$0xff]  }
 0x87a   : > { %v5701_v5 = vpop.permute.xlu1 %5700 }
 0x87b   : > { %8387 = vmatprep.subr.msk.bf16.mxu0 %vm5676_vm13, %v5723_v63  ;;  %v5698_v7 = vpop.permute.xlu0 %5697  ;;  %v5737_v9 = vsel %vm5676_vm13, %v5722_v62, 0 }
 0x87c   : > { %v5702_v10 = vsel %vm619_vm0, %v5701_v5, %v5698_v7  ;;  %v5706_v11 = vsel %vm619_vm0, %v5698_v7, %v5701_v5  ;;  %5743 = vmatpush1.bf16.msra.mxu0 %v5737_v9 }
 0x87d   : > { %v5708_v12 = vmul.bf16 %v5706_v11, %v9650_v30  ;;  %v5709_v13 = vmul.bf16 %v5702_v10, %v9653_v31  ;;  %v9287_v10 = vld [vmem:[%s10751_s12 + $0x30] sm:$0xff]  }
 0x87e   : > { %v5845_v19 = vpop.permute.xlu1 %5844 }
 0x87f   : > { %8388 = vmatmul.mubr.msk.bf16.vlgmr.msra.gmra.mrb[40].mxu0 %vm5732_vm4, %v9281_v17  ;;  %8390 = vmatprep.subr.msk.bf16.mxu0 %vm5676_vm13, %v5709_v13  ;;  %v5843_v18 = vpop.permute.xlu0 %5842  ;;  %v5794_v21 = vsel %vm5676_vm13, %v5708_v12, 0 }
 0x880   : > { %v5846_v23 = vsel %vm885_vm3, %v5845_v19, %v5843_v18  ;;  %5800 = vmatpush1.bf16.msra.mxu0 %v5794_v21  ;;  %5831 = vmatprep.mubr.bf16.mxu0 %v9394_v3  ;;  %v5850_v29 = vsel %vm885_vm3, %v5843_v18, %v5845_v19  ;;  %v9288_v21 = vld [vmem:[%s10751_s12 + $0x38] sm:$0xff]  }
 0x881   : > { %v5853_v26 = vmul.bf16 %v5846_v23, %v9662_v36  ;;  %v5852_v37 = vmul.bf16 %v5850_v29, %v9693_v58 }
 0x882   : > { %v5921_v34 = vpop.permute.xlu1 %5920 }
 0x883   : > { %8395 = vmatprep.subr.msk.bf16.mxu0 %vm5676_vm13, %v5853_v26  ;;  %v5919_v2 = vpop.permute.xlu0 %5918  ;;  %v5866_v42 = vsel %vm5676_vm13, %v5852_v37, 0  ;;  %v9289_v26 = vld [vmem:[%s10751_s12 + $0x40] sm:$0xff]  }
 0x884   : > { %v5922_v41 = vsel %vm1026_vm5, %v5921_v34, %v5919_v2  ;;  %v5926_v43 = vsel %vm1026_vm5, %v5919_v2, %v5921_v34 }
 0x885   : > { %v5929_v14 = vmul.bf16 %v5922_v41, %v9715_v8  ;;  %v5928_v22 = vmul.bf16 %v5926_v43, %v9728_v16 }
 0x886   : > { %v6061_v46 = vpop.permute.xlu1 %6060 }
 0x887   : > { %v5942_v45 = vsel %vm5676_vm13, %v5928_v22, 0  ;;  %v6059_v1 = vpop.permute.xlu0 %6058 }
 0x888   : > { %v6066_v48 = vsel %vm1255_vm6, %v6061_v46, %v6059_v1  ;;  %v6062_v51 = vsel %vm1255_vm6, %v6059_v1, %v6061_v46 }
 0x889   : > { %v6069_v50 = vmul.bf16 %v6066_v48, %v9758_v35  ;;  %v6068_v15 = vmul.bf16 %v6062_v51, %v9773_v4  ;;  %v7206_v51 = vld [vmem:[%s10754_s15 + $0x18] sm:$0xff] }
 0x88a   : > { %v6137_v39 = vpop.permute.xlu1 %6136 }
 0x88b   : > { %8391 = vmatmul.mubr.msk.bf16.vlgmr.msra.gmra.mrb[40].mxu0 %vm5732_vm4, %v9282_v38  ;;  %v6135_v52 = vpop.permute.xlu0 %6134  ;;  %v6082_v53 = vsel %vm5676_vm13, %v6068_v15, 0 }
 0x88c   : > { %5872 = vmatpush1.bf16.msra.mxu0 %v5866_v42  ;;  %5903 = vmatprep.mubr.bf16.mxu0 %v9394_v3  ;;  %v6142_v28 = vsel %vm1396_vm7, %v6137_v39, %v6135_v52  ;;  %v6138_v54 = vsel %vm1396_vm7, %v6135_v52, %v6137_v39  ;;  %v7205_v39 = vld [vmem:[%s10754_s15 + $0x10] sm:$0xff] }
 0x88d   : > { %8400 = vmatprep.subr.msk.bf16.mxu0 %vm5676_vm13, %v5929_v14  ;;  %v6144_v57 = vmul.bf16 %v6138_v54, %v9800_v61 }
 0x88e   : > { %v6213_v55 = vpop.permute.xlu1 %6212 }
 0x88f   : > { %v6211_v56 = vpop.permute.xlu0 %6210  ;;  %v6158_v63 = vsel %vm5676_vm13, %v6144_v57, 0 }
 0x890   : > { %v6218_v60 = vsel %vm1537_vm8, %v6213_v55, %v6211_v56  ;;  %v6214_v5 = vsel %vm1537_vm8, %v6211_v56, %v6213_v55  ;;  %v9290_v56 = vld [vmem:[%s10753_s14 + $0x18] sm:$0xff]  }
 0x891   : > { %v6221_v62 = vmul.bf16 %v6218_v60, %v9807_v6  ;;  %v6220_v17 = vmul.bf16 %v6214_v5, %v9827_v20 }
 0x892   : > { %v6289_v7 = vpop.permute.xlu1 %6288 }
 0x893   : > { %v6287_v9 = vpop.permute.xlu0 %6286  ;;  %v6234_v13 = vsel %vm5676_vm13, %v6220_v17, 0 }
 0x894   : > { %v6294_v11 = vsel %vm1678_vm9, %v6289_v7, %v6287_v9  ;;  %v6290_v19 = vsel %vm1678_vm9, %v6287_v9, %v6289_v7 }
 0x895   : > { %v6297_v12 = vmul.bf16 %v6294_v11, %v9834_v27  ;;  %v6296_v18 = vmul.bf16 %v6290_v19, %v9850_v40 }
 0x897   : > { %8396 = vmatmul.mubr.msk.bf16.vlgmr.msra.gmra.mrb[40].mxu0 %vm5732_vm4, %v9283_v44  ;;  %v6310_v23 = vsel %vm5676_vm13, %v6296_v18, 0 }
 0x898   : > { %5948 = vmatpush1.bf16.msra.mxu0 %v5942_v45  ;;  %5979 = vmatprep.mubr.bf16.mxu0 %v9394_v3 }
 0x899   : > { %8405 = vmatprep.subr.msk.bf16.mxu0 %vm5676_vm13, %v10236_v24  ;;  %v6145_v24 = vmul.bf16 %v6142_v28, %v9780_v49 }
 0x8a3   : > { %8401 = vmatmul.mubr.msk.bf16.vlgmr.msra.gmra.mrb[40].mxu0 %vm5732_vm4, %v9284_v47  ;;  %v6372_v38 = vpop.permute.xlu1 %6371 }
 0x8a4   : > { %6012 = vmatpush1.bf16.msra.mxu0 %v6006_v0  ;;  %6043 = vmatprep.mubr.bf16.mxu0 %v9394_v3  ;;  %v6367_v29 = vpop.permute.xlu0 %6366  ;;  %v7203_v0 = vld [vmem:[%s10754_s15] sm:$0xff] }
 0x8a5   : > { %8410 = vmatprep.subr.msk.bf16.mxu0 %vm5676_vm13, %v6069_v50  ;;  %v7204_v50 = vld [vmem:[%s10754_s15 + $0x8] sm:$0xff] }
 0x8af   : > { %8406 = vmatmul.mubr.msk.bf16.vlgmr.msra.gmra.mrb[40].mxu0 %vm5732_vm4, %v9285_v25 }
 0x8b0   : > { %6088 = vmatpush1.bf16.msra.mxu0 %v6082_v53  ;;  %6119 = vmatprep.mubr.bf16.mxu0 %v9394_v3 }
 0x8b1   : > { %8415 = vmatprep.subr.msk.bf16.mxu0 %vm5676_vm13, %v6145_v24 }
 0x8bb   : > { %8411 = vmatmul.mubr.msk.bf16.vlgmr.msra.gmra.mrb[40].mxu0 %vm5732_vm4, %v9286_v59 }
 0x8bc   : > { %6164 = vmatpush1.bf16.msra.mxu0 %v6158_v63  ;;  %6195 = vmatprep.mubr.bf16.mxu0 %v9394_v3  ;;  %v9305_v63 = vld [vmem:[%s10753_s14 + $0x10] sm:$0xff]  }
 0x8bd   : > { %8420 = vmatprep.subr.msk.bf16.mxu0 %vm5676_vm13, %v6221_v62 }
 0x8c7   : > { %8416 = vmatmul.mubr.msk.bf16.vlgmr.msra.gmra.mrb[40].mxu0 %vm5732_vm4, %v9287_v10 }
 0x8c8   : > { %6240 = vmatpush1.bf16.msra.mxu0 %v6234_v13  ;;  %6271 = vmatprep.mubr.bf16.mxu0 %v9394_v3  ;;  %v9291_v13 = vld [vmem:[%s10753_s14] sm:$0xff]  }
 0x8c9   : > { %8425 = vmatprep.subr.msk.bf16.mxu0 %vm5676_vm13, %v6297_v12 }
 0x8d3   : > { %8421 = vmatmul.mubr.msk.bf16.vlgmr.msra.gmra.mrb[40].mxu0 %vm5732_vm4, %v9288_v21 }
 0x8d4   : > { %6316 = vmatpush1.bf16.msra.mxu0 %v6310_v23  ;;  %6347 = vmatprep.mubr.bf16.mxu0 %v9394_v3  ;;  %v9292_v23 = vld [vmem:[%s10753_s14 + $0x8] sm:$0xff]  }
 0x8df   : > { %8426 = vmatmul.mubr.msk.bf16.vlgmr.msra.gmra.mrb[40].mxu0 %vm5732_vm4, %v9289_v26 }
 0x8e0   : > { %6467 = vmatprep.mubr.bf16.mxu0 %v9394_v3 }
 0x9b2   : > { %v6349_v34 = vpop.f32.mrb[40].mxu0 }
 0x9b3   : > { %v6374_v2 = vadd.f32 %v6367_v29, %v6349_v34  ;;  %v6351_v37 = vpop.f32.mrb[41].mxu0 }
 0x9b4   : > { %v6375_v41 = vadd.f32 %v6367_v29, %v6351_v37  ;;  %v6353_v14 = vpop.f32.mrb[42].mxu0  ;;  %v9293_v29 = vld [vmem:[%s10753_s14 + $0x20] sm:$0xff]  }
 0x9b5   : > { %v6376_v42 = vadd.f32 %v6372_v38, %v6353_v14  ;;  %v6355_v43 = vpop.f32.mrb[43].mxu0  ;;  %v6378_v44 = vmax.f32 %v6374_v2, 0.0  ;;  %v9294_v2 = vld [vmem:[%s10753_s14 + $0x28] sm:$0xff]  }
 0x9b6   : > { %v6377_v22 = vadd.f32 %v6372_v38, %v6355_v43  ;;  %v6379_v46 = vmax.f32 %v6375_v41, 0.0  ;;  %v9295_v41 = vld [vmem:[%s10753_s14 + $0x30] sm:$0xff]   ;;  %v9296_v43 = vld [vmem:[%s10753_s14 + $0x38] sm:$0xff]  }
 0x9b7   : > { %v6380_v45 = vmax.f32 %v6376_v42, 0.0 }
 0x9b8   : > { %v6381_v1 = vmax.f32 %v6377_v22, 0.0 }
 0x9b9   : > { %v10373_v47 = vpack.c.bf16 %v6380_v45, %v6378_v44 }
 0x9ba   : > { %v10375_v48 = vpack.c.bf16 %v6381_v1, %v6379_v46  ;;  %v9297_v46 = vld [vmem:[%s10753_s14 + $0x40] sm:$0xff]  }
 0x9bb   : > { %6404 = vrot.lane.b32.xlu1 %v10373_v47, %s10778_s23 }
 0x9bc   : > { %6402 = vrot.lane.b32.xlu0 %v10375_v48, %s10778_s23 }
 0x9bf   : > { %6388 = vrot.lane.b32.xlu1 %v10373_v47, %s10776_s24 }
 0x9c0   : > { %6385 = vrot.lane.b32.xlu0 %v10375_v48, %s10776_s24 }
 0x9c3   : > { %6559 = vrot.lane.b32.xlu1 %v10373_v47, %s10774_s25 }
 0x9c4   : > { %6557 = vrot.lane.b32.xlu0 %v10375_v48, %s10774_s25 }
 0x9c7   : > { %6653 = vrot.lane.b32.xlu1 %v10373_v47, %s10795_s2 }
 0x9c8   : > { %6651 = vrot.lane.b32.xlu0 %v10375_v48, %s10795_s2 }
 0x9cb   : > { %6829 = vrot.lane.b32.xlu1 %v10375_v48, %s10796_s0 }
 0x9cc   : > { %6827 = vrot.lane.b32.xlu0 %v10373_v47, %s10796_s0 }
 0x9cf   : > { %6923 = vrot.lane.b32.xlu1 %v10375_v48, %s10797_s26 }
 0x9d0   : > { %6921 = vrot.lane.b32.xlu0 %v10373_v47, %s10797_s26 }
 0x9d3   : > { %7017 = vrot.lane.b32.xlu1 %v10375_v48, %s10798_s28 }
 0x9d4   : > { %7015 = vrot.lane.b32.xlu0 %v10373_v47, %s10798_s28 }
 0x9d7   : > { %7111 = vrot.lane.b32.xlu1 %v10375_v48, %s10799_s29 }
 0x9d8   : > { %7109 = vrot.lane.b32.xlu0 %v10373_v47, %s10799_s29 }
 0x9db   : > { %7214 = vperm.xlu1 %8932, %v7204_v50   ;;  %v9298_v50 = vld [vmem:[%s10753_s14 + $0x48] sm:$0xff]  }
 0x9dc   : > { %7209 = vperm.xlu0 %8931, %v7203_v0  }
 0x9df   : > { %7224 = vperm.xlu1 %8932, %v7206_v51  }
 0x9e0   : > { %7219 = vperm.xlu0 %8931, %v7205_v39  }
 0xa2d   : > { %v6405_v52 = vpop.permute.xlu1 %6404 }
 0xa2e   : > { %v6403_v15 = vpop.permute.xlu0 %6402 }
 0xa2f   : > { %v6406_v25 = vsel %vm675_vm1, %v6405_v52, %v6403_v15  ;;  %v6410_v28 = vsel %vm675_vm1, %v6403_v15, %v6405_v52  ;;  %v9299_v52 = vld [vmem:[%s10753_s14 + $0x50] sm:$0xff]  }
 0xa30   : > { %v6412_v24 = vmul.bf16 %v6410_v28, %v9659_v33  ;;  %v6413_v53 = vmul.bf16 %v6406_v25, %v9656_v32 }
 0xa31   : > { %v6389_v54 = vpop.permute.xlu1 %6388 }
 0xa32   : > { %6435 = vmatprep.subr.bf16.mxu0 %v6413_v53  ;;  %8694 = vmatprep.subr.bf16.mxu1 %v6413_v53  ;;  %v6386_v55 = vpop.permute.xlu0 %6385 }
 0xa33   : > { %v6390_v57 = vsel %vm619_vm0, %v6389_v54, %v6386_v55  ;;  %v6394_v59 = vsel %vm619_vm0, %v6386_v55, %v6389_v54  ;;  %6436 = vmatpush1.bf16.msra.mxu0 %v6412_v24  ;;  %8695 = vmatpush1.bf16.msra.mxu1 %v6412_v24  ;;  %v9300_v24 = vld [vmem:[%s10753_s14 + $0x58] sm:$0xff]  }
 0xa34   : > { %v6396_v60 = vmul.bf16 %v6394_v59, %v9650_v30  ;;  %v6397_v62 = vmul.bf16 %v6390_v57, %v9653_v31 }
 0xa35   : > { %v6560_v5 = vpop.permute.xlu1 %6559 }
 0xa36   : > { %8434 = vmatmul.mubr.msk.bf16.vlgmr.msra.gmra.mrb[72].mxu1 %vm675_vm1, %v9290_v56  ;;  %6504 = vmatprep.subr.bf16.mxu1 %v6397_v62  ;;  %v6558_v7 = vpop.permute.xlu0 %6557  ;;  %v9301_v56 = vld [vmem:[%s10753_s14 + $0x60] sm:$0xff]   ;;  %v9302_v62 = vld [vmem:[%s10753_s14 + $0x68] sm:$0xff]  }
 0xa37   : > { %v6561_v9 = vsel %vm885_vm3, %v6560_v5, %v6558_v7  ;;  %6505 = vmatpush1.bf16.msra.mxu1 %v6396_v60  ;;  %6536 = vmatprep.mubr.bf16.mxu1 %v9394_v3  ;;  %v6565_v11 = vsel %vm885_vm3, %v6558_v7, %v6560_v5  ;;  %v9303_v5 = vld [vmem:[%s10753_s14 + $0x70] sm:$0xff]  }
 0xa38   : > { %v6568_v17 = vmul.bf16 %v6561_v9, %v9662_v36  ;;  %8433 = vmatmul.mubr.msk.bf16.vlgmr.msra.gmra.mrb[44].mxu0 %vm675_vm1, %v9305_v63  ;;  %v6567_v21 = vmul.bf16 %v6565_v11, %v9693_v58  ;;  %v9304_v9 = vld [vmem:[%s10753_s14 + $0x78] sm:$0xff]  }
 0xa39   : > { %v6654_v10 = vpop.permute.xlu1 %6653  ;;  %7337 = vmatprep.mubr.bf16.mxu0 %v9394_v3 }
 0xa3a   : > { %6590 = vmatprep.subr.bf16.mxu1 %v6568_v17  ;;  %v6652_v12 = vpop.permute.xlu0 %6651  ;;  %v9306_v17 = vld [vmem:[%s10753_s14 + $0x80] sm:$0xff]  }
 0xa3b   : > { %v6655_v19 = vsel %vm1026_vm5, %v6654_v10, %v6652_v12  ;;  %v6659_v26 = vsel %vm1026_vm5, %v6652_v12, %v6654_v10  ;;  %v9307_v10 = vld [vmem:[%s10753_s14 + $0x88] sm:$0xff]  }
 0xa3c   : > { %v6662_v18 = vmul.bf16 %v6655_v19, %v9715_v8  ;;  %v6661_v34 = vmul.bf16 %v6659_v26, %v9728_v16 }
 0xa3d   : > { %v6830_v37 = vpop.permute.xlu1 %6829 }
 0xa3e   : > { %8437 = vmatmul.mubr.msk.bf16.vlgmr.msra.gmra.mrb[76].mxu1 %vm675_vm1, %v9291_v13  ;;  %v6828_v38 = vpop.permute.xlu0 %6827 }
 0xa3f   : > { %6591 = vmatpush1.bf16.msra.mxu1 %v6567_v21  ;;  %6546 = vmatprep.mubr.bf16.mxu1 %v9394_v3  ;;  %v6835_v14 = vsel %vm1255_vm6, %v6830_v37, %v6828_v38  ;;  %v6831_v45 = vsel %vm1255_vm6, %v6828_v38, %v6830_v37 }
 0xa40   : > { %6684 = vmatprep.subr.bf16.mxu1 %v6662_v18  ;;  %v6838_v42 = vmul.bf16 %v6835_v14, %v9758_v35 }
 0xa41   : > { %v6924_v22 = vpop.permute.xlu1 %6923 }
 0xa42   : > { %v6922_v44 = vpop.permute.xlu0 %6921 }
 0xa43   : > { %v6929_v1 = vsel %vm1396_vm7, %v6924_v22, %v6922_v44  ;;  %v6925_v39 = vsel %vm1396_vm7, %v6922_v44, %v6924_v22 }
 0xa44   : > { %v6931_v25 = vmul.bf16 %v6925_v39, %v9800_v61 }
 0xa45   : > { %v7018_v0 = vpop.permute.xlu1 %7017 }
 0xa46   : > { %8438 = vmatmul.mubr.msk.bf16.gmra.mrb[72].mxu1 %vm675_vm1, %v9292_v23  ;;  %v7016_v51 = vpop.permute.xlu0 %7015 }
 0xa47   : > { %6622 = vmatprep.mubr.bf16.mxu1 %v9394_v3  ;;  %v7023_v15 = vsel %vm1537_vm8, %v7018_v0, %v7016_v51  ;;  %v7019_v55 = vsel %vm1537_vm8, %v7016_v51, %v7018_v0 }
 0xa48   : > { %v7026_v28 = vmul.bf16 %v7023_v15, %v9807_v6  ;;  %v7025_v59 = vmul.bf16 %v7019_v55, %v9827_v20 }
 0xa49   : > { %v7112_v53 = vpop.permute.xlu1 %7111 }
 0xa4a   : > { %v7110_v54 = vpop.permute.xlu0 %7109 }
 0xa4b   : > { %v7117_v57 = vsel %vm1678_vm9, %v7112_v53, %v7110_v54  ;;  %v7113_v63 = vsel %vm1678_vm9, %v7110_v54, %v7112_v53 }
 0xa4c   : > { %v7120_v60 = vmul.bf16 %v7117_v57, %v9834_v27  ;;  %v7119_v7 = vmul.bf16 %v7113_v63, %v9850_v40 }
 0xa4e   : > { %8445 = vmatmul.mubr.msk.bf16.vlgmr.msra.gmra.mrb[76].mxu1 %vm675_vm1, %v9293_v29 }
 0xa4f   : > { %6685 = vmatpush1.bf16.msra.mxu1 %v6661_v34  ;;  %6632 = vmatprep.mubr.bf16.mxu1 %v9394_v3 }
 0xa50   : > { %6766 = vmatprep.subr.bf16.mxu1 %v10375_v48  ;;  %v6932_v48 = vmul.bf16 %v6929_v1, %v9780_v49 }
 0xa56   : > { %8446 = vmatmul.mubr.msk.bf16.gmra.mrb[72].mxu1 %vm675_vm1, %v9294_v2 }
 0xa57   : > { %6716 = vmatprep.mubr.bf16.mxu1 %v9394_v3 }
 0xa5b   : > { %v7210_v26 = vpop.permute.xlu0 %7209 }
 0xa5e   : > { %8453 = vmatmul.mubr.msk.bf16.vlgmr.msra.gmra.mrb[76].mxu1 %vm675_vm1, %v9295_v41  ;;  %v7215_v41 = vpop.permute.xlu1 %7214 }
 0xa5f   : > { %6767 = vmatpush1.bf16.msra.mxu1 %v10373_v47  ;;  %6726 = vmatprep.mubr.bf16.mxu1 %v9394_v3  ;;  %v6837_v47 = vmul.bf16 %v6831_v45, %v9773_v4 }
 0xa60   : > { %6860 = vmatprep.subr.bf16.mxu1 %v6838_v42 }
 0xa62   : > { %v7225_v39 = vpop.permute.xlu1 %7224 }
 0xa66   : > { %8454 = vmatmul.mubr.msk.bf16.gmra.mrb[72].mxu1 %vm675_vm1, %v9296_v43 }
 0xa67   : > { %6798 = vmatprep.mubr.bf16.mxu1 %v9394_v3 }
 0xa6e   : > { %8461 = vmatmul.mubr.msk.bf16.vlgmr.msra.gmra.mrb[76].mxu1 %vm675_vm1, %v9297_v46  ;;  %v7220_v46 = vpop.permute.xlu0 %7219 }
 0xa6f   : > { %6861 = vmatpush1.bf16.msra.mxu1 %v6837_v47  ;;  %6808 = vmatprep.mubr.bf16.mxu1 %v9394_v3 }
 0xa70   : > { %6954 = vmatprep.subr.bf16.mxu1 %v6932_v48 }
 0xa76   : > { %8462 = vmatmul.mubr.msk.bf16.gmra.mrb[72].mxu1 %vm675_vm1, %v9298_v50 }
 0xa77   : > { %6892 = vmatprep.mubr.bf16.mxu1 %v9394_v3 }
 0xa7e   : > { %8469 = vmatmul.mubr.msk.bf16.vlgmr.msra.gmra.mrb[76].mxu1 %vm675_vm1, %v9299_v52 }
 0xa7f   : > { %6955 = vmatpush1.bf16.msra.mxu1 %v6931_v25  ;;  %6902 = vmatprep.mubr.bf16.mxu1 %v9394_v3 }
 0xa80   : > { %7048 = vmatprep.subr.bf16.mxu1 %v7026_v28 }
 0xa86   : > { %8470 = vmatmul.mubr.msk.bf16.gmra.mrb[72].mxu1 %vm675_vm1, %v9300_v24 }
 0xa87   : > { %6986 = vmatprep.mubr.bf16.mxu1 %v9394_v3 }
 0xa8e   : > { %8477 = vmatmul.mubr.msk.bf16.vlgmr.msra.gmra.mrb[76].mxu1 %vm675_vm1, %v9301_v56 }
 0xa8f   : > { %7049 = vmatpush1.bf16.msra.mxu1 %v7025_v59  ;;  %6996 = vmatprep.mubr.bf16.mxu1 %v9394_v3 }
 0xa90   : > { %7142 = vmatprep.subr.bf16.mxu1 %v7120_v60 }
 0xa96   : > { %8478 = vmatmul.mubr.msk.bf16.gmra.mrb[72].mxu1 %vm675_vm1, %v9302_v62  ;;  %v7870_v62 = vld [vmem:[%s10756_s17] sm:$0xf] }
 0xa97   : > { %7080 = vmatprep.mubr.bf16.mxu1 %v9394_v3 }
 0xa9e   : > { %8485 = vmatmul.mubr.msk.bf16.vlgmr.msra.gmra.mrb[76].mxu1 %vm675_vm1, %v9303_v5 }
 0xa9f   : > { %7143 = vmatpush1.bf16.msra.mxu1 %v7119_v7  ;;  %7090 = vmatprep.mubr.bf16.mxu1 %v9394_v3 }
 0xaa6   : > { %8486 = vmatmul.mubr.msk.bf16.gmra.mrb[72].mxu1 %vm675_vm1, %v9304_v9 }
 0xaa7   : > { %7174 = vmatprep.mubr.bf16.mxu1 %v9394_v3 }
 0xaae   : > { %8493 = vmatmul.mubr.msk.bf16.vlgmr.msra.gmra.mrb[76].mxu1 %vm675_vm1, %v9306_v17 }
 0xaaf   : > { %7184 = vmatprep.mubr.bf16.mxu1 %v9394_v3 }
 0xab6   : > { %8494 = vmatmul.mubr.msk.bf16.gmra.mrb[72].mxu1 %vm675_vm1, %v9307_v10 }
 0xb0b   : > { %v6469_v11 = vpop.f32.mrb[44].mxu0 }
 0xb0c   : > { %v6471_v12 = vpop.f32.mrb[45].mxu0 }
 0xb0d   : > { %v6473_v13 = vpop.f32.mrb[46].mxu0 }
 0xb0e   : > { %v6475_v19 = vpop.f32.mrb[47].mxu0 }
 0xb81   : > { %v7176_v18 = vpop.f32.mrb[76].mxu1 }
 0xb82   : > { %v8696_v21 = vadd.f32 %v7176_v18, %v6469_v11  ;;  %v7178_v23 = vpop.f32.mrb[77].mxu1 }
 0xb83   : > { %v8697_v29 = vadd.f32 %v7178_v23, %v6471_v12  ;;  %v7180_v34 = vpop.f32.mrb[78].mxu1 }
 0xb84   : > { %v7227_v2 = vadd.f32 %v8696_v21, %v7210_v26  ;;  %v8698_v37 = vadd.f32 %v7180_v34, %v6473_v13  ;;  %v7182_v38 = vpop.f32.mrb[79].mxu1 }
 0xb85   : > { %v7228_v14 = vadd.f32 %v8697_v29, %v7210_v26  ;;  %v8699_v42 = vadd.f32 %v7182_v38, %v6475_v19 }
 0xb86   : > { %v7229_v43 = vadd.f32 %v8698_v37, %v7215_v41  ;;  %v7235_v44 = vmax.f32 %v7227_v2, 0.0  ;;  %v8495_v2 = vld [vmem:[%s10755_s16 + $0x2] sm:$0x3] }
 0xb87   : > { %v7230_v22 = vadd.f32 %v8699_v42, %v7215_v41  ;;  %v7236_v1 = vmax.f32 %v7228_v14, 0.0 }
 0xb88   : > { %v7237_v45 = vmax.f32 %v7229_v43, 0.0 }
 0xb89   : > { %v7238_v47 = vmax.f32 %v7230_v22, 0.0  ;;  %v7186_v48 = vpop.f32.mrb[72].mxu1 }
 0xb8a   : > { %v10544_v50 = vpack.c.bf16 %v7237_v45, %v7235_v44  ;;  %v7231_v0 = vadd.f32 %v7220_v46, %v7186_v48  ;;  %v7188_v51 = vpop.f32.mrb[73].mxu1 }
 0xb8b   : > { %v10546_v52 = vpack.c.bf16 %v7238_v47, %v7236_v1  ;;  %v7232_v15 = vadd.f32 %v7220_v46, %v7188_v51  ;;  %v7190_v25 = vpop.f32.mrb[74].mxu1  ;;  %v7275_v1 = vld [vmem:[%s10755_s16] sm:$0x3] }
 0xb8c   : > { %v7233_v28 = vadd.f32 %v7225_v39, %v7190_v25  ;;  %v7192_v24 = vpop.f32.mrb[75].mxu1  ;;  %7280 = vrot.lane.b32.xlu1 %v10544_v50, %s10800_s27  ;;  %v7239_v54 = vmax.f32 %v7231_v0, 0.0 }
 0xb8d   : > { %v7234_v53 = vadd.f32 %v7225_v39, %v7192_v24  ;;  %7276 = vrot.lane.b32.xlu0 %v10546_v52, %s10800_s27  ;;  %v7240_v56 = vmax.f32 %v7232_v15, 0.0 }
 0xb8e   : > { %v7241_v55 = vmax.f32 %v7233_v28, 0.0 }
 0xb8f   : > { %v7242_v57 = vmax.f32 %v7234_v53, 0.0 }
 0xb90   : > { %v10552_v59 = vpack.c.bf16 %v7241_v55, %v7239_v54  ;;  %v8498_v54 = vld [vmem:[%s10755_s16 + $0x4] sm:$0x3] }
 0xb91   : > { %v10554_v60 = vpack.c.bf16 %v7242_v57, %v7240_v56 }
 0xb92   : > { %7282 = vrot.lane.b32.xlu1 %v10552_v59, %s10800_s27 }
 0xb93   : > { %7278 = vrot.lane.b32.xlu0 %v10554_v60, %s10800_s27  ;;  %s10804_s27 = sld [smem:[#allocation12_spill]] }
 0xb96   : > { %7255 = vrot.lane.b32.xlu1 %v10544_v50, %s10801_s19 }
 0xb97   : > { %7249 = vrot.lane.b32.xlu0 %v10546_v52, %s10801_s19 }
 0xb9a   : > { %7257 = vrot.lane.b32.xlu1 %v10552_v59, %s10801_s19 }
 0xb9b   : > { %7251 = vrot.lane.b32.xlu0 %v10554_v60, %s10801_s19  ;;  %s605_s19 = scalar_lea.vmem %s10804_s27, %s10803_s18 }
 0xb9e   : > { %7394 = vrot.lane.b32.xlu1 %v10544_v50, %s10802_s21 }
 0xb9f   : > { %7390 = vrot.lane.b32.xlu0 %v10546_v52, %s10802_s21 }
 0xba2   : > { %7396 = vrot.lane.b32.xlu1 %v10552_v59, %s10802_s21 }
 0xba3   : > { %7392 = vrot.lane.b32.xlu0 %v10554_v60, %s10802_s21 }
 0xba6   : > { %7466 = vrot.lane.b32.xlu1 %v10544_v50, %s10795_s2 }
 0xba7   : > { %7462 = vrot.lane.b32.xlu0 %v10546_v52, %s10795_s2 }
 0xbaa   : > { %7468 = vrot.lane.b32.xlu1 %v10552_v59, %s10795_s2 }
 0xbab   : > { %7464 = vrot.lane.b32.xlu0 %v10554_v60, %s10795_s2 }
 0xbae   : > { %7584 = vrot.lane.b32.xlu1 %v10546_v52, %s10796_s0 }
 0xbaf   : > { %7582 = vrot.lane.b32.xlu0 %v10544_v50, %s10796_s0 }
 0xbb2   : > { %7588 = vrot.lane.b32.xlu1 %v10554_v60, %s10796_s0 }
 0xbb3   : > { %7586 = vrot.lane.b32.xlu0 %v10552_v59, %s10796_s0 }
 0xbb6   : > { %7656 = vrot.lane.b32.xlu1 %v10546_v52, %s10797_s26 }
 0xbb7   : > { %7654 = vrot.lane.b32.xlu0 %v10544_v50, %s10797_s26 }
 0xbba   : > { %7660 = vrot.lane.b32.xlu1 %v10554_v60, %s10797_s26 }
 0xbbb   : > { %7658 = vrot.lane.b32.xlu0 %v10552_v59, %s10797_s26 }
 0xbbe   : > { %7728 = vrot.lane.b32.xlu1 %v10546_v52, %s10798_s28 }
 0xbbf   : > { %7726 = vrot.lane.b32.xlu0 %v10544_v50, %s10798_s28 }
 0xbc2   : > { %7732 = vrot.lane.b32.xlu1 %v10554_v60, %s10798_s28 }
 0xbc3   : > { %7730 = vrot.lane.b32.xlu0 %v10552_v59, %s10798_s28 }
 0xbc6   : > { %7800 = vrot.lane.b32.xlu1 %v10546_v52, %s10799_s29 }
 0xbc7   : > { %7798 = vrot.lane.b32.xlu0 %v10544_v50, %s10799_s29 }
 0xbca   : > { %7804 = vrot.lane.b32.xlu1 %v10554_v60, %s10799_s29 }
 0xbcb   : > { %7802 = vrot.lane.b32.xlu0 %v10552_v59, %s10799_s29 }
 0xbcf   : > { %7873 = vperm.xlu0 %8931, %v7870_v62  }
 0xbfe   : > { %v7281_v63 = vpop.permute.xlu1 %7280 }
 0xbff   : > { %v7277_v5 = vpop.permute.xlu0 %7276 }
 0xc00   : > { %v7284_v7 = vsel %vm675_vm1, %v7281_v63, %v7277_v5  ;;  %v7290_v9 = vsel %vm675_vm1, %v7277_v5, %v7281_v63 }
 0xc01   : > { %v7296_v17 = vmul.bf16 %v7290_v9, %v9659_v33  ;;  %v7297_v10 = vmul.bf16 %v7284_v7, %v9656_v32 }
 0xc03   : > { %7305 = vmatprep.subr.bf16.mxu0 %v7297_v10 }
 0xc04   : > { %v7283_v11 = vpop.permute.xlu1 %7282  ;;  %7306 = vmatpush1.bf16.msra.mxu0 %v7296_v17  ;;  %v8500_v17 = vld [vmem:[%s10755_s16 + $0x6] sm:$0x3] }
 0xc05   : > { %v7279_v12 = vpop.permute.xlu0 %7278 }
 0xc06   : > { %v7285_v13 = vsel %vm675_vm1, %v7283_v11, %v7279_v12  ;;  %v7294_v19 = vsel %vm675_vm1, %v7279_v12, %v7283_v11 }
 0xc07   : > { %v7298_v18 = vmul.bf16 %v7294_v19, %v9659_v33  ;;  %v7299_v21 = vmul.bf16 %v7285_v13, %v9656_v32 }
 0xc08   : > { %v7256_v23 = vpop.permute.xlu1 %7255 }
 0xc09   : > { %7307 = vmatprep.subr.bf16.mxu0 %v7299_v21  ;;  %v7250_v26 = vpop.permute.xlu0 %7249 }
 0xc0a   : > { %v7259_v29 = vsel %vm619_vm0, %v7256_v23, %v7250_v26  ;;  %v7265_v34 = vsel %vm619_vm0, %v7250_v26, %v7256_v23  ;;  %7308 = vmatpush1.bf16.msra.mxu0 %v7298_v18  ;;  %v8502_v18 = vld [vmem:[%s10755_s16 + $0x8] sm:$0x3] }
 0xc0b   : > { %v7271_v37 = vmul.bf16 %v7265_v34, %v9650_v30  ;;  %v7272_v38 = vmul.bf16 %v7259_v29, %v9653_v31 }
 0xc0c   : > { %v7258_v41 = vpop.permute.xlu1 %7257 }
 0xc0d   : > { %8496 = vmatmul.mubr.msk.bf16.vlgmr.msra.gmra.mrb[48].mxu0 %vm1921_vm10, %v8495_v2  ;;  %7349 = vmatprep.subr.bf16.mxu0 %v7272_v38  ;;  %v7252_v32 = vpop.permute.xlu0 %7251 }
 0xc0e   : > { %v7260_v33 = vsel %vm619_vm0, %v7258_v41, %v7252_v32  ;;  %v7269_v14 = vsel %vm619_vm0, %v7252_v32, %v7258_v41  ;;  %7350 = vmatpush1.bf16.msra.mxu0 %v7271_v37  ;;  %7381 = vmatprep.mubr.bf16.mxu0 %v9394_v3 }
 0xc0f   : > { %v7273_v42 = vmul.bf16 %v7269_v14, %v9650_v30  ;;  %v7274_v43 = vmul.bf16 %v7260_v33, %v9653_v31 }
 0xc10   : > { %v7395_v22 = vpop.permute.xlu1 %7394 }
 0xc11   : > { %7351 = vmatprep.subr.bf16.mxu0 %v7274_v43  ;;  %v7391_v44 = vpop.permute.xlu0 %7390 }
 0xc12   : > { %v7398_v45 = vsel %vm885_vm3, %v7395_v22, %v7391_v44  ;;  %v7404_v46 = vsel %vm885_vm3, %v7391_v44, %v7395_v22  ;;  %7352 = vmatpush1.bf16.msra.mxu0 %v7273_v42 }
 0xc13   : > { %v7410_v47 = vmul.bf16 %v7404_v46, %v9693_v58  ;;  %v7411_v48 = vmul.bf16 %v7398_v45, %v9662_v36 }
 0xc14   : > { %v7397_v0 = vpop.permute.xlu1 %7396 }
 0xc15   : > { %8497 = vmatmul.mubr.msk.bf16.vlgmr.msra.gmra.mrb[52].mxu0 %vm1921_vm10, %v7275_v1  ;;  %7419 = vmatprep.subr.bf16.mxu0 %v7411_v48  ;;  %v7393_v30 = vpop.permute.xlu0 %7392 }
 0xc16   : > { %v7399_v31 = vsel %vm885_vm3, %v7397_v0, %v7393_v30  ;;  %v7408_v51 = vsel %vm885_vm3, %v7393_v30, %v7397_v0  ;;  %7420 = vmatpush1.bf16.msra.mxu0 %v7410_v47  ;;  %7451 = vmatprep.mubr.bf16.mxu0 %v9394_v3 }
 0xc17   : > { %v7412_v39 = vmul.bf16 %v7408_v51, %v9693_v58  ;;  %v7413_v15 = vmul.bf16 %v7399_v31, %v9662_v36 }
 0xc18   : > { %v7467_v25 = vpop.permute.xlu1 %7466 }
 0xc19   : > { %7421 = vmatprep.subr.bf16.mxu0 %v7413_v15  ;;  %v7463_v28 = vpop.permute.xlu0 %7462 }
 0xc1a   : > { %v7470_v24 = vsel %vm1026_vm5, %v7467_v25, %v7463_v28  ;;  %v7476_v53 = vsel %vm1026_vm5, %v7463_v28, %v7467_v25  ;;  %7422 = vmatpush1.bf16.msra.mxu0 %v7412_v39 }
 0xc1b   : > { %v7482_v55 = vmul.bf16 %v7476_v53, %v9728_v16  ;;  %v7483_v56 = vmul.bf16 %v7470_v24, %v9715_v8 }
 0xc1c   : > { %v7469_v57 = vpop.permute.xlu1 %7468 }
 0xc1d   : > { %8499 = vmatmul.mubr.msk.bf16.vlgmr.msra.gmra.mrb[56].mxu0 %vm1921_vm10, %v8498_v54  ;;  %7491 = vmatprep.subr.bf16.mxu0 %v7483_v56  ;;  %v7465_v36 = vpop.permute.xlu0 %7464 }
 0xc1e   : > { %v7471_v58 = vsel %vm1026_vm5, %v7469_v57, %v7465_v36  ;;  %v7480_v62 = vsel %vm1026_vm5, %v7465_v36, %v7469_v57  ;;  %7492 = vmatpush1.bf16.msra.mxu0 %v7482_v55  ;;  %7523 = vmatprep.mubr.bf16.mxu0 %v9394_v3  ;;  %v8510_v55 = vld [vmem:[%s10755_s16 + $0x10] sm:$0x3] }
 0xc1f   : > { %v7484_v63 = vmul.bf16 %v7480_v62, %v9728_v16  ;;  %v7485_v5 = vmul.bf16 %v7471_v58, %v9715_v8 }
 0xc20   : > { %v7585_v7 = vpop.permute.xlu1 %7584 }
 0xc21   : > { %7493 = vmatprep.subr.bf16.mxu0 %v7485_v5  ;;  %v7583_v9 = vpop.permute.xlu0 %7582 }
 0xc22   : > { %7494 = vmatpush1.bf16.msra.mxu0 %v7484_v63  ;;  %v7596_v12 = vsel %vm1255_vm6, %v7585_v7, %v7583_v9  ;;  %v7590_v16 = vsel %vm1255_vm6, %v7583_v9, %v7585_v7 }
 0xc23   : > { %7539 = vmatprep.subr.bf16.mxu0 %v10546_v52  ;;  %v7603_v13 = vmul.bf16 %v7596_v12, %v9758_v35 }
 0xc24   : > { %v7589_v10 = vpop.permute.xlu1 %7588 }
 0xc25   : > { %8501 = vmatmul.mubr.msk.bf16.vlgmr.msra.gmra.mrb[60].mxu0 %vm1921_vm10, %v8500_v17  ;;  %v7587_v11 = vpop.permute.xlu0 %7586 }
 0xc26   : > { %7540 = vmatpush1.bf16.msra.mxu0 %v10544_v50  ;;  %7571 = vmatprep.mubr.bf16.mxu0 %v9394_v3  ;;  %v7600_v52 = vsel %vm1255_vm6, %v7589_v10, %v7587_v11  ;;  %v7602_v50 = vmul.bf16 %v7590_v16, %v9773_v4 }
 0xc27   : > { %7541 = vmatprep.subr.bf16.mxu0 %v10554_v60  ;;  %v7591_v60 = vsel %vm1255_vm6, %v7587_v11, %v7589_v10  ;;  %v7605_v23 = vmul.bf16 %v7600_v52, %v9758_v35  ;;  %v8504_v35 = vld [vmem:[%s10755_s16 + $0xa] sm:$0x3] }
 0xc28   : > { %v7657_v8 = vpop.permute.xlu1 %7656 }
 0xc29   : > { %v7655_v19 = vpop.permute.xlu0 %7654 }
 0xc2a   : > { %7542 = vmatpush1.bf16.msra.mxu0 %v10552_v59  ;;  %v7668_v29 = vsel %vm1396_vm7, %v7657_v8, %v7655_v19  ;;  %v7604_v59 = vmul.bf16 %v7591_v60, %v9773_v4  ;;  %v7662_v2 = vsel %vm1396_vm7, %v7655_v19, %v7657_v8 }
 0xc2b   : > { %7611 = vmatprep.subr.bf16.mxu0 %v7603_v13  ;;  %v7675_v37 = vmul.bf16 %v7668_v29, %v9780_v49  ;;  %v7674_v32 = vmul.bf16 %v7662_v2, %v9800_v61 }
 0xc2c   : > { %v7661_v21 = vpop.permute.xlu1 %7660 }
 0xc2d   : > { %8503 = vmatmul.mubr.msk.bf16.vlgmr.msra.gmra.mrb[64].mxu0 %vm1921_vm10, %v8502_v18  ;;  %v7659_v26 = vpop.permute.xlu0 %7658 }
 0xc2e   : > { %7612 = vmatpush1.bf16.msra.mxu0 %v7602_v50  ;;  %7643 = vmatprep.mubr.bf16.mxu0 %v9394_v3  ;;  %v7672_v41 = vsel %vm1396_vm7, %v7661_v21, %v7659_v26  ;;  %v7663_v14 = vsel %vm1396_vm7, %v7659_v26, %v7661_v21 }
 0xc2f   : > { %7613 = vmatprep.subr.bf16.mxu0 %v7605_v23  ;;  %v7677_v4 = vmul.bf16 %v7672_v41, %v9780_v49  ;;  %v7676_v22 = vmul.bf16 %v7663_v14, %v9800_v61  ;;  %v8506_v49 = vld [vmem:[%s10755_s16 + $0xc] sm:$0x3] }
 0xc30   : > { %v7729_v34 = vpop.permute.xlu1 %7728 }
 0xc31   : > { %v7727_v38 = vpop.permute.xlu0 %7726 }
 0xc32   : > { %7614 = vmatpush1.bf16.msra.mxu0 %v7604_v59  ;;  %v7740_v43 = vsel %vm1537_vm8, %v7729_v34, %v7727_v38  ;;  %v7734_v44 = vsel %vm1537_vm8, %v7727_v38, %v7729_v34 }
 0xc33   : > { %7683 = vmatprep.subr.bf16.mxu0 %v7675_v37  ;;  %v7747_v45 = vmul.bf16 %v7740_v43, %v9807_v6  ;;  %v7746_v48 = vmul.bf16 %v7734_v44, %v9827_v20 }
 0xc34   : > { %v7733_v33 = vpop.permute.xlu1 %7732 }
 0xc35   : > { %8505 = vmatmul.mubr.msk.bf16.vlgmr.msra.gmra.mrb[68].mxu0 %vm1921_vm10, %v8504_v35  ;;  %v7731_v42 = vpop.permute.xlu0 %7730 }
 0xc36   : > { %7684 = vmatpush1.bf16.msra.mxu0 %v7674_v32  ;;  %7715 = vmatprep.mubr.bf16.mxu0 %v9394_v3  ;;  %v7744_v47 = vsel %vm1537_vm8, %v7733_v33, %v7731_v42  ;;  %v7735_v0 = vsel %vm1537_vm8, %v7731_v42, %v7733_v33 }
 0xc37   : > { %7685 = vmatprep.subr.bf16.mxu0 %v7677_v4  ;;  %v7749_v61 = vmul.bf16 %v7744_v47, %v9807_v6  ;;  %v7748_v39 = vmul.bf16 %v7735_v0, %v9827_v20  ;;  %v8508_v6 = vld [vmem:[%s10755_s16 + $0xe] sm:$0x3] }
 0xc38   : > { %v7801_v46 = vpop.permute.xlu1 %7800 }
 0xc39   : > { %v7799_v1 = vpop.permute.xlu0 %7798 }
 0xc3a   : > { %7686 = vmatpush1.bf16.msra.mxu0 %v7676_v22  ;;  %v7812_v30 = vsel %vm1678_vm9, %v7801_v46, %v7799_v1  ;;  %v7806_v15 = vsel %vm1678_vm9, %v7799_v1, %v7801_v46 }
 0xc3b   : > { %7755 = vmatprep.subr.bf16.mxu0 %v7747_v45  ;;  %v7819_v25 = vmul.bf16 %v7812_v30, %v9834_v27  ;;  %v7818_v24 = vmul.bf16 %v7806_v15, %v9850_v40 }
 0xc3c   : > { %v7805_v31 = vpop.permute.xlu1 %7804 }
 0xc3d   : > { %8507 = vmatmul.mubr.msk.bf16.vlgmr.msra.gmra.mrb[72].mxu0 %vm1921_vm10, %v8506_v49  ;;  %v7803_v51 = vpop.permute.xlu0 %7802 }
 0xc3e   : > { %7756 = vmatpush1.bf16.msra.mxu0 %v7746_v48  ;;  %7787 = vmatprep.mubr.bf16.mxu0 %v9394_v3  ;;  %v7816_v28 = vsel %vm1678_vm9, %v7805_v31, %v7803_v51  ;;  %v7807_v53 = vsel %vm1678_vm9, %v7803_v51, %v7805_v31 }
 0xc3f   : > { %7757 = vmatprep.subr.bf16.mxu0 %v7749_v61  ;;  %v7821_v54 = vmul.bf16 %v7816_v28, %v9834_v27  ;;  %v7820_v20 = vmul.bf16 %v7807_v53, %v9850_v40 }
 0xc42   : > { %7758 = vmatpush1.bf16.msra.mxu0 %v7748_v39 }
 0xc43   : > { %7827 = vmatprep.subr.bf16.mxu0 %v7819_v25 }
 0xc45   : > { %8509 = vmatmul.mubr.msk.bf16.vlgmr.msra.gmra.mrb[76].mxu0 %vm1921_vm10, %v8508_v6 }
 0xc46   : > { %7828 = vmatpush1.bf16.msra.mxu0 %v7818_v24  ;;  %7859 = vmatprep.mubr.bf16.mxu0 %v9394_v3 }
 0xc47   : > { %7829 = vmatprep.subr.bf16.mxu0 %v7821_v54 }
 0xc4a   : > { %7830 = vmatpush1.bf16.msra.mxu0 %v7820_v20 }
 0xc4d   : > { %8511 = vmatmul.mubr.msk.bf16.vlgmr.msra.gmra.mrb[80].mxu0 %vm1921_vm10, %v8510_v55 }
 0xc4e   : > { %v7874_v0 = vpop.permute.xlu0 %7873 }
 0xce0   : > { %v7339_v56 = vpop.f32.mrb[48].mxu0 }
 0xce1   : > { %v7341_v57 = vpop.f32.mrb[49].mxu0 }
 0xce2   : > { %v7343_v36 = vpop.f32.mrb[50].mxu0 }
 0xce3   : > { %v7344_v58 = vpop.f32.mrb[51].mxu0 }
 0xce8   : > { %v7383_v27 = vpop.f32.mrb[52].mxu0 }
 0xce9   : > { %v7384_v62 = vadd.f32 %v7383_v27, %v7339_v56  ;;  %v7385_v63 = vpop.f32.mrb[53].mxu0 }
 0xcea   : > { %v7386_v5 = vadd.f32 %v7385_v63, %v7341_v57  ;;  %v7387_v7 = vpop.f32.mrb[54].mxu0 }
 0xceb   : > { %v7388_v3 = vpop.f32.mrb[55].mxu0 }
 0xcf0   : > { %v7453_v9 = vpop.f32.mrb[56].mxu0 }
 0xcf1   : > { %v7460_v17 = vadd.f32 %v7453_v9, %v7384_v62  ;;  %v7455_v40 = vpop.f32.mrb[57].mxu0 }
 0xcf2   : > { %v7461_v10 = vadd.f32 %v7455_v40, %v7386_v5  ;;  %v7457_v11 = vpop.f32.mrb[58].mxu0 }
 0xcf3   : > { %v7458_v12 = vpop.f32.mrb[59].mxu0 }
 0xcf8   : > { %v7525_v8 = vpop.f32.mrb[60].mxu0 }
 0xcf9   : > { %v7532_v16 = vadd.f32 %v7525_v8, %v7460_v17  ;;  %v7527_v13 = vpop.f32.mrb[61].mxu0 }
 0xcfa   : > { %v7533_v19 = vadd.f32 %v7527_v13, %v7461_v10  ;;  %v7529_v52 = vpop.f32.mrb[62].mxu0 }
 0xcfb   : > { %v7530_v18 = vpop.f32.mrb[63].mxu0 }
 0xd00   : > { %v7573_v50 = vpop.f32.mrb[64].mxu0 }
 0xd01   : > { %v7580_v21 = vadd.f32 %v7573_v50, %v7532_v16  ;;  %v7575_v60 = vpop.f32.mrb[65].mxu0 }
 0xd02   : > { %v7581_v23 = vadd.f32 %v7575_v60, %v7533_v19  ;;  %v7577_v26 = vpop.f32.mrb[66].mxu0 }
 0xd03   : > { %v7578_v29 = vpop.f32.mrb[67].mxu0 }
 0xd08   : > { %v7645_v59 = vpop.f32.mrb[68].mxu0 }
 0xd09   : > { %v7652_v34 = vadd.f32 %v7645_v59, %v7580_v21  ;;  %v7647_v2 = vpop.f32.mrb[69].mxu0 }
 0xd0a   : > { %v7653_v37 = vadd.f32 %v7647_v2, %v7581_v23  ;;  %v7649_v38 = vpop.f32.mrb[70].mxu0 }
 0xd0b   : > { %v7650_v41 = vpop.f32.mrb[71].mxu0 }
 0xd10   : > { %v7717_v35 = vpop.f32.mrb[72].mxu0 }
 0xd11   : > { %v7724_v32 = vadd.f32 %v7717_v35, %v7652_v34  ;;  %v7719_v33 = vpop.f32.mrb[73].mxu0 }
 0xd12   : > { %v7725_v14 = vadd.f32 %v7719_v33, %v7653_v37  ;;  %v7721_v4 = vpop.f32.mrb[74].mxu0 }
 0xd13   : > { %v7722_v42 = vpop.f32.mrb[75].mxu0 }
 0xd18   : > { %v7789_v43 = vpop.f32.mrb[76].mxu0 }
 0xd19   : > { %v7796_v22 = vadd.f32 %v7789_v43, %v7724_v32  ;;  %v7791_v44 = vpop.f32.mrb[77].mxu0 }
 0xd1a   : > { %v7797_v45 = vadd.f32 %v7791_v44, %v7725_v14  ;;  %v7793_v46 = vpop.f32.mrb[78].mxu0 }
 0xd1b   : > { %v7794_v1 = vpop.f32.mrb[79].mxu0 }
 0xd20   : > { %v7861_v47 = vpop.f32.mrb[80].mxu0 }
 0xd21   : > { %v7868_v49 = vadd.f32 %v7861_v47, %v7796_v22  ;;  %v7863_v48 = vpop.f32.mrb[81].mxu0 }
 0xd22   : > { %v7869_v61 = vadd.f32 %v7863_v48, %v7797_v45  ;;  %v7865_v30 = vpop.f32.mrb[82].mxu0 }
 0xd23   : > { %v7876_v31 = vadd.f32 %v7874_v0, %v7868_v49  ;;  %v7866_v51 = vpop.f32.mrb[83].mxu0 }
 0xd24   : > { %v7877_v39 = vadd.f32 %v7874_v0, %v7869_v61 }
 0xd25   : > { %v8512_v15 = vmul.f32 -1.442695, %v7876_v31 }
 0xd26   : > { %v8513_v25 = vmul.f32 -1.442695, %v7877_v39 }
 0xd27   : > { %9308 = vpow2.f32 %v8512_v15 }
 0xd28   : > { %9310 = vpow2.f32 %v8513_v25 }
 0xd31   : > { %v9309_v28 = vpop.eup %9308 }
 0xd32   : > { %v9311_v6 = vpop.eup %9310  ;;  %v7884_v24 = vadd.f32 1.0, %v9309_v28 }
 0xd33   : > { %v7885_v53 = vadd.f32 1.0, %v9311_v6 }
 0xd34   : > { %9312 = vrcp.f32 %v7884_v24 }
 0xd35   : > { %9314 = vrcp.f32 %v7885_v53 }
 0xd3e   : > { %v9313_v54 = vpop.eup %9312 }
 0xd3f   : > { %v9315_v20 = vpop.eup %9314 }
 0xd40   : > { %v7892_v55 = vcombine.low %v9313_v54, %v9315_v20 }
 0xd42   : > { %7894 = vst [vmem:[%s605_s19] sm:$0xff] %v7892_v55 }
 0xd43 PF: > { %s10805_s21 = sld [smem:[#allocation8_spill]] }
 0xd49   : > { %s30_s27 = sadd.s32 1, %s10805_s21  }
 0xd4a   : > { %p27_p5 = scmp.ge.s32.totalorder %s30_s27, 4  }
 0xd4c   :  { %29 = sbr.rel (!%p27_p5) target bundleno = 7 (0x7), region = 200 }
 0xd53   :  { %7916 = vsyncpa [#allocation3], 1 }
 0xd54   :  { %7918 = vsyncpa [#allocation3 + $0x1], 1 }
 0xd55   :  { %7919 = vsyncpa [#allocation5], 1 }

</bundles_post_ra>
